<compile_context>
chip_gen: v7x
topology: tpu7x:2x2x1
jax: 0.10.0
libtpu: 0.0.40
codegen_flags: <defaults>
</compile_context>

<pallas_src>
import functools

import jax
import jax.numpy as jnp
from jax.experimental import pallas as pl
from jax.experimental.pallas import tpu as pltpu


def _round_up(x, m):
    return (x + m - 1) // m * m


def _mlp_kernel(x_ref,
                w1_ref, b1_ref,
                w2_ref, b2_ref,
                w3_ref, b3_ref,
                w4_ref, b4_ref,
                w5_ref, b5_ref,
                o_ref):
    # fc1 + ReLU   (TM, D) @ (D, 256): bf16 inputs, f32 MXU accumulation.
    h = jnp.dot(x_ref[...], w1_ref[...], preferred_element_type=jnp.float32)
    h = jnp.maximum(h + b1_ref[...], 0.0)
    # dropout(p=0.3) -> identity in eval/inference mode.

    # fc2 + ReLU   (TM, 256) @ (256, 128)
    h = jnp.dot(h.astype(jnp.bfloat16), w2_ref[...],
                preferred_element_type=jnp.float32)
    h = jnp.maximum(h + b2_ref[...], 0.0)

    # fc3 + ReLU   (TM, 128) @ (128, 64)
    h = jnp.dot(h.astype(jnp.bfloat16), w3_ref[...],
                preferred_element_type=jnp.float32)
    h = jnp.maximum(h + b3_ref[...], 0.0)

    # fc4 + ReLU   (TM, 64) @ (64, 32)
    h = jnp.dot(h.astype(jnp.bfloat16), w4_ref[...],
                preferred_element_type=jnp.float32)
    h = jnp.maximum(h + b4_ref[...], 0.0)          # (TM, 32) f32

    # fc5 (out_features = 1): an N=1 matmul wastes the MXU -> VPU multiply
    # against the broadcast (1, 32) weight row + lane reduction (XLU).
    z = jnp.sum(h * w5_ref[...], axis=-1) + b5_ref[0]        # (TM,) f32

    # Sigmoid: exp and the approximate reciprocal both run on the EUP slot.
    o_ref[0, :] = pl.reciprocal(1.0 + jnp.exp(-z), approx=True)


@functools.partial(jax.jit, static_argnames=("block_rows",))
def simple_fcnn_forward(x, params, *, block_rows=512):
    """x: (B, input_dim) f32.  params: (in,out) weights and (1,out) biases (f32)."""
    B, D = x.shape
    # Batch tile: multiple of 128 so the (1, TM) output store is an unmasked,
    # lane-dense vst; capped at block_rows (sweepable).
    tm = min(_round_up(block_rows, 128), _round_up(B, 128))
    b_pad = _round_up(B, tm)
    num_tiles = b_pad // tm

    x_p = x if b_pad == B else jnp.pad(x, ((0, b_pad - B), (0, 0)))
    x_bf = x_p.astype(jnp.bfloat16)

    w1 = params["w1"].astype(jnp.bfloat16)
    w2 = params["w2"].astype(jnp.bfloat16)
    w3 = params["w3"].astype(jnp.bfloat16)
    w4 = params["w4"].astype(jnp.bfloat16)
    b1, b2, b3, b4 = params["b1"], params["b2"], params["b3"], params["b4"]
    w5_row = params["w5"].T                        # (1, 32) f32 lane-dense row
    b5 = params["b5"].reshape((1,))                # scalar -> SMEM

    dims = [D, 256, 128, 64, 32, 1]
    flops = 2 * b_pad * sum(dims[i] * dims[i + 1] for i in range(5))
    bytes_accessed = (x_bf.size * 2
                      + sum(w.size * 2 for w in (w1, w2, w3, w4))
                      + sum(b.size * 4 for b in (b1, b2, b3, b4))
                      + w5_row.size * 4 + b5.size * 4
                      + b_pad * 4)

    def resident(r, c):
        # Parameter block == full array; same block index every grid step,
        # so it is DMA'd once and stays resident in VMEM.
        return pl.BlockSpec((r, c), lambda i: (0, 0))

    out = pl.pallas_call(
        _mlp_kernel,
        grid=(num_tiles,),
        in_specs=[
            pl.BlockSpec((tm, D), lambda i: (i, 0)),              # x tile
            resident(D, 256), resident(1, 256),                   # fc1
            resident(256, 128), resident(1, 128),                 # fc2
            resident(128, 64), resident(1, 64),                   # fc3
            resident(64, 32), resident(1, 32),                    # fc4
            resident(1, 32),                                      # fc5 weight row
            pl.BlockSpec(memory_space=pltpu.MemorySpace.SMEM),    # fc5 bias scalar
        ],
        out_specs=pl.BlockSpec((1, tm), lambda i: (0, i)),        # lane-dense out
        out_shape=jax.ShapeDtypeStruct((1, b_pad), jnp.float32),
        compiler_params=pltpu.CompilerParams(
            dimension_semantics=("parallel",)),
        cost_estimate=pl.CostEstimate(
            flops=flops,
            transcendentals=2 * b_pad,
            bytes_accessed=bytes_accessed),
    )(x_bf, w1, b1, w2, b2, w3, b3, w4, b4, w5_row, b5)

    return out[0, :B][:, None]                                    # (B, 1)


def init_params(key, input_dim):
    """Deterministic init matching nn.Linear shapes (weights stored transposed)."""
    dims = [input_dim, 256, 128, 64, 32, 1]
    params = {}
    for i in range(5):
        fan_in, fan_out = dims[i], dims[i + 1]
        key, kw, kb = jax.random.split(key, 3)
        bound = 1.0 / jnp.sqrt(jnp.float32(fan_in))
        params[f"w{i+1}"] = jax.random.uniform(
            kw, (fan_in, fan_out), jnp.float32, -bound, bound)
        params[f"b{i+1}"] = jax.random.uniform(
            kb, (1, fan_out), jnp.float32, -bound, bound)
    return params


def reference_forward(x, params):
    """Full-f32 reference of the PyTorch forward (dropout elided in eval)."""
    h = x
    for i in range(1, 5):
        h = jnp.maximum(h @ params[f"w{i}"] + params[f"b{i}"], 0.0)
    z = h @ params["w5"] + params["b5"]
    return jax.nn.sigmoid(z)


if __name__ == "__main__":
    INPUT_DIM = 32
    BATCH = 200          # deliberately not a multiple of the 128-lane tile

    key = jax.random.PRNGKey(0)
    key, kx = jax.random.split(key)
    x = jax.random.normal(kx, (BATCH, INPUT_DIM), dtype=jnp.float32)
    params = init_params(key, INPUT_DIM)

    out = jax.block_until_ready(simple_fcnn_forward(x, params))

    ref = reference_forward(x, params)
    assert out.shape == (BATCH, 1), out.shape
    max_err = float(jnp.max(jnp.abs(out - ref)))
    # bf16 matmul inputs + approximate EUP reciprocal -> relaxed tolerance.
    assert max_err < 2e-2, f"mismatch vs reference: max abs err {max_err}"

    print("KERNEL_OK")
</pallas_src>

<mosaic_0001>
module attributes {stable_mosaic.version = 11 : i64} {
  func.func @_mlp_kernel(%arg0: i32, %arg1: memref<256x32xbf16, #tpu.memory_space<vmem>>, %arg2: memref<32x256xbf16, #tpu.memory_space<vmem>>, %arg3: memref<1x256xf32, #tpu.memory_space<vmem>>, %arg4: memref<256x128xbf16, #tpu.memory_space<vmem>>, %arg5: memref<1x128xf32, #tpu.memory_space<vmem>>, %arg6: memref<128x64xbf16, #tpu.memory_space<vmem>>, %arg7: memref<1x64xf32, #tpu.memory_space<vmem>>, %arg8: memref<64x32xbf16, #tpu.memory_space<vmem>>, %arg9: memref<1x32xf32, #tpu.memory_space<vmem>>, %arg10: memref<1x32xf32, #tpu.memory_space<vmem>>, %arg11: memref<1xf32, #tpu.memory_space<smem>>, %arg12: memref<1x256xf32, #tpu.memory_space<vmem>>) attributes {dimension_semantics = [#tpu.dimension_semantics<parallel>], iteration_bounds = array<i64: 1>, scalar_prefetch = 0 : i64, scratch_operands = 0 : i64, tpu.core_type = #tpu.core_type<tc>, window_params = [{transform_indices = @transform_0, window_bounds = array<i64: 256, 32>}, {pipeline_mode = #tpu.pipeline_mode<synchronous>, transform_indices = @transform_1, window_bounds = array<i64: 32, 256>}, {pipeline_mode = #tpu.pipeline_mode<synchronous>, transform_indices = @transform_2, window_bounds = array<i64: 1, 256>}, {pipeline_mode = #tpu.pipeline_mode<synchronous>, transform_indices = @transform_3, window_bounds = array<i64: 256, 128>}, {pipeline_mode = #tpu.pipeline_mode<synchronous>, transform_indices = @transform_4, window_bounds = array<i64: 1, 128>}, {pipeline_mode = #tpu.pipeline_mode<synchronous>, transform_indices = @transform_5, window_bounds = array<i64: 128, 64>}, {pipeline_mode = #tpu.pipeline_mode<synchronous>, transform_indices = @transform_6, window_bounds = array<i64: 1, 64>}, {pipeline_mode = #tpu.pipeline_mode<synchronous>, transform_indices = @transform_7, window_bounds = array<i64: 64, 32>}, {pipeline_mode = #tpu.pipeline_mode<synchronous>, transform_indices = @transform_8, window_bounds = array<i64: 1, 32>}, {pipeline_mode = #tpu.pipeline_mode<synchronous>, transform_indices = @transform_9, window_bounds = array<i64: 1, 32>}, {transform_indices = @transform_10, window_bounds = array<i64: 1>}, {transform_indices = @transform_11, window_bounds = array<i64: 1, 256>}]} {
    %c0 = arith.constant 0 : index
    %c0_0 = arith.constant 0 : index
    %0 = vector.load %arg1[%c0, %c0_0] : memref<256x32xbf16, #tpu.memory_space<vmem>>, vector<256x32xbf16>
    %c0_1 = arith.constant 0 : index
    %c0_2 = arith.constant 0 : index
    %1 = vector.load %arg2[%c0_1, %c0_2] : memref<32x256xbf16, #tpu.memory_space<vmem>>, vector<32x256xbf16>
    %cst = arith.constant dense<0.000000e+00> : vector<256x256xf32>
    %2 = tpu.matmul %0, %1, %cst {dimension_numbers = #tpu.dot_dimension_numbers<[1], [0], [0], [1], [0, 0, 1, 1], [], []>} : vector<256x32xbf16>, vector<32x256xbf16>, vector<256x256xf32> -> vector<256x256xf32>
    %c0_3 = arith.constant 0 : index
    %c0_4 = arith.constant 0 : index
    %3 = vector.load %arg3[%c0_3, %c0_4] : memref<1x256xf32, #tpu.memory_space<vmem>>, vector<1x256xf32>
    %4 = vector.broadcast %3 : vector<1x256xf32> to vector<256x256xf32>
    %5 = arith.addf %2, %4 : vector<256x256xf32>
    %cst_5 = arith.constant 0.000000e+00 : f32
    %6 = vector.broadcast %cst_5 : f32 to vector<256x256xf32>
    %7 = arith.maximumf %5, %6 : vector<256x256xf32>
    %8 = arith.truncf %7 : vector<256x256xf32> to vector<256x256xbf16>
    %c0_6 = arith.constant 0 : index
    %c0_7 = arith.constant 0 : index
    %9 = vector.load %arg4[%c0_6, %c0_7] : memref<256x128xbf16, #tpu.memory_space<vmem>>, vector<256x128xbf16>
    %cst_8 = arith.constant dense<0.000000e+00> : vector<256x128xf32>
    %10 = tpu.matmul %8, %9, %cst_8 {dimension_numbers = #tpu.dot_dimension_numbers<[1], [0], [0], [1], [0, 0, 1, 1], [], []>} : vector<256x256xbf16>, vector<256x128xbf16>, vector<256x128xf32> -> vector<256x128xf32>
    %c0_9 = arith.constant 0 : index
    %c0_10 = arith.constant 0 : index
    %11 = vector.load %arg5[%c0_9, %c0_10] : memref<1x128xf32, #tpu.memory_space<vmem>>, vector<1x128xf32>
    %12 = vector.broadcast %11 : vector<1x128xf32> to vector<256x128xf32>
    %13 = arith.addf %10, %12 : vector<256x128xf32>
    %cst_11 = arith.constant 0.000000e+00 : f32
    %14 = vector.broadcast %cst_11 : f32 to vector<256x128xf32>
    %15 = arith.maximumf %13, %14 : vector<256x128xf32>
    %16 = arith.truncf %15 : vector<256x128xf32> to vector<256x128xbf16>
    %c0_12 = arith.constant 0 : index
    %c0_13 = arith.constant 0 : index
    %17 = vector.load %arg6[%c0_12, %c0_13] : memref<128x64xbf16, #tpu.memory_space<vmem>>, vector<128x64xbf16>
    %cst_14 = arith.constant dense<0.000000e+00> : vector<256x64xf32>
    %18 = tpu.matmul %16, %17, %cst_14 {dimension_numbers = #tpu.dot_dimension_numbers<[1], [0], [0], [1], [0, 0, 1, 1], [], []>} : vector<256x128xbf16>, vector<128x64xbf16>, vector<256x64xf32> -> vector<256x64xf32>
    %c0_15 = arith.constant 0 : index
    %c0_16 = arith.constant 0 : index
    %19 = vector.load %arg7[%c0_15, %c0_16] : memref<1x64xf32, #tpu.memory_space<vmem>>, vector<1x64xf32>
    %20 = vector.broadcast %19 : vector<1x64xf32> to vector<256x64xf32>
    %21 = arith.addf %18, %20 : vector<256x64xf32>
    %cst_17 = arith.constant 0.000000e+00 : f32
    %22 = vector.broadcast %cst_17 : f32 to vector<256x64xf32>
    %23 = arith.maximumf %21, %22 : vector<256x64xf32>
    %24 = arith.truncf %23 : vector<256x64xf32> to vector<256x64xbf16>
    %c0_18 = arith.constant 0 : index
    %c0_19 = arith.constant 0 : index
    %25 = vector.load %arg8[%c0_18, %c0_19] : memref<64x32xbf16, #tpu.memory_space<vmem>>, vector<64x32xbf16>
    %cst_20 = arith.constant dense<0.000000e+00> : vector<256x32xf32>
    %26 = tpu.matmul %24, %25, %cst_20 {dimension_numbers = #tpu.dot_dimension_numbers<[1], [0], [0], [1], [0, 0, 1, 1], [], []>} : vector<256x64xbf16>, vector<64x32xbf16>, vector<256x32xf32> -> vector<256x32xf32>
    %c0_21 = arith.constant 0 : index
    %c0_22 = arith.constant 0 : index
    %27 = vector.load %arg9[%c0_21, %c0_22] : memref<1x32xf32, #tpu.memory_space<vmem>>, vector<1x32xf32>
    %28 = vector.broadcast %27 : vector<1x32xf32> to vector<256x32xf32>
    %29 = arith.addf %26, %28 : vector<256x32xf32>
    %cst_23 = arith.constant 0.000000e+00 : f32
    %30 = vector.broadcast %cst_23 : f32 to vector<256x32xf32>
    %31 = arith.maximumf %29, %30 : vector<256x32xf32>
    %c0_24 = arith.constant 0 : index
    %c0_25 = arith.constant 0 : index
    %32 = vector.load %arg10[%c0_24, %c0_25] : memref<1x32xf32, #tpu.memory_space<vmem>>, vector<1x32xf32>
    %33 = vector.broadcast %32 : vector<1x32xf32> to vector<256x32xf32>
    %34 = arith.mulf %31, %33 : vector<256x32xf32>
    %cst_26 = arith.constant dense<0.000000e+00> : vector<256xf32>
    %35 = vector.multi_reduction <add>, %34, %cst_26 [1] : vector<256x32xf32> to vector<256xf32>
    %c0_27 = arith.constant 0 : index
    %36 = memref.load %arg11[%c0_27] : memref<1xf32, #tpu.memory_space<smem>>
    %37 = vector.broadcast %36 : f32 to vector<256xf32>
    %38 = arith.addf %35, %37 : vector<256xf32>
    %cst_28 = arith.constant 0.000000e+00 : f32
    %39 = vector.broadcast %cst_28 : f32 to vector<256xf32>
    %40 = arith.subf %39, %38 : vector<256xf32>
    %41 = math.exp %40 : vector<256xf32>
    %cst_29 = arith.constant 1.000000e+00 : f32
    %42 = vector.broadcast %cst_29 : f32 to vector<256xf32>
    %43 = arith.addf %42, %41 : vector<256xf32>
    %44 = tpu.reciprocal %43 {approx = true} : vector<256xf32> -> vector<256xf32>
    %c0_30 = arith.constant 0 : index
    %c0_31 = arith.constant 0 : index
    %45 = vector.load %arg12[%c0_30, %c0_31] : memref<1x256xf32, #tpu.memory_space<vmem>>, vector<1x256xf32>
    %46 = vector.shape_cast %45 : vector<1x256xf32> to vector<256xf32>
    %47 = vector.shape_cast %44 : vector<256xf32> to vector<1x256xf32>
    tpu.vector_store %arg12[%c0_30, %c0_31], %47 {strides = array<i32>} : memref<1x256xf32, #tpu.memory_space<vmem>>, vector<1x256xf32>,
    return
  }
  func.func @transform_0(%arg0: i32) -> (i32, i32) {
    %c0_i32 = arith.constant 0 : i32
    %c0_i32_0 = arith.constant 0 : i32
    return %arg0, %c0_i32 : i32, i32
  }
  func.func @transform_1(%arg0: i32) -> (i32, i32) {
    %c0_i32 = arith.constant 0 : i32
    %c0_i32_0 = arith.constant 0 : i32
    %c0_i32_1 = arith.constant 0 : i32
    return %c0_i32, %c0_i32_0 : i32, i32
  }
  func.func @transform_2(%arg0: i32) -> (i32, i32) {
    %c0_i32 = arith.constant 0 : i32
    %c0_i32_0 = arith.constant 0 : i32
    %c0_i32_1 = arith.constant 0 : i32
    return %c0_i32, %c0_i32_0 : i32, i32
  }
  func.func @transform_3(%arg0: i32) -> (i32, i32) {
    %c0_i32 = arith.constant 0 : i32
    %c0_i32_0 = arith.constant 0 : i32
    %c0_i32_1 = arith.constant 0 : i32
    return %c0_i32, %c0_i32_0 : i32, i32
  }
  func.func @transform_4(%arg0: i32) -> (i32, i32) {
    %c0_i32 = arith.constant 0 : i32
    %c0_i32_0 = arith.constant 0 : i32
    %c0_i32_1 = arith.constant 0 : i32
    return %c0_i32, %c0_i32_0 : i32, i32
  }
  func.func @transform_5(%arg0: i32) -> (i32, i32) {
    %c0_i32 = arith.constant 0 : i32
    %c0_i32_0 = arith.constant 0 : i32
    %c0_i32_1 = arith.constant 0 : i32
    return %c0_i32, %c0_i32_0 : i32, i32
  }
  func.func @transform_6(%arg0: i32) -> (i32, i32) {
    %c0_i32 = arith.constant 0 : i32
    %c0_i32_0 = arith.constant 0 : i32
    %c0_i32_1 = arith.constant 0 : i32
    return %c0_i32, %c0_i32_0 : i32, i32
  }
  func.func @transform_7(%arg0: i32) -> (i32, i32) {
    %c0_i32 = arith.constant 0 : i32
    %c0_i32_0 = arith.constant 0 : i32
    %c0_i32_1 = arith.constant 0 : i32
    return %c0_i32, %c0_i32_0 : i32, i32
  }
  func.func @transform_8(%arg0: i32) -> (i32, i32) {
    %c0_i32 = arith.constant 0 : i32
    %c0_i32_0 = arith.constant 0 : i32
    %c0_i32_1 = arith.constant 0 : i32
    return %c0_i32, %c0_i32_0 : i32, i32
  }
  func.func @transform_9(%arg0: i32) -> (i32, i32) {
    %c0_i32 = arith.constant 0 : i32
    %c0_i32_0 = arith.constant 0 : i32
    %c0_i32_1 = arith.constant 0 : i32
    return %c0_i32, %c0_i32_0 : i32, i32
  }
  func.func @transform_10(%arg0: i32) -> i32 {
    %c0_i32 = arith.constant 0 : i32
    %c0_i32_0 = arith.constant 0 : i32
    return %c0_i32 : i32
  }
  func.func @transform_11(%arg0: i32) -> (i32, i32) {
    %c0_i32 = arith.constant 0 : i32
    %c0_i32_0 = arith.constant 0 : i32
    return %c0_i32, %arg0 : i32, i32
  }
}

</mosaic_0001>

<bundles_post_ra>
// kernel: simple_fcnn_forward.1
= control target key start
LH: loop header
LB: loop body
LE: loop exit
PB: predicated region body
PF: predicated region fallthrough
CT: control target
= control target key end

     0   :  { %v5213_v1 = vmov 0   ;;  %vm188_vm0 = vcmask 261120   ;;  %v78_v37 = vlaneseq  ;;  %vm1189_vm1 = vcmask 523264   ;;  %s6634_s1 = inlined_call_operand.vmem [shape: bf16[32,256], index: 1, kind: input, shape index: {}]   ;;  %s6635_s0 = inlined_call_operand.vmem [shape: bf16[256,32], index: 0, kind: input, shape index: {}]   ;;  %s6636_s3 = inlined_call_operand.vmem [shape: bf16[256,128], index: 3, kind: input, shape index: {}]   ;;  %s6637_s2 = inlined_call_operand.vmem [shape: f32[1,256], index: 2, kind: input, shape index: {}]   ;;  %s6638_s5 = inlined_call_operand.vmem [shape: bf16[128,64], index: 5, kind: input, shape index: {}]   ;;  %s6639_s4 = inlined_call_operand.vmem [shape: f32[1,128], index: 4, kind: input, shape index: {}]   ;;  %s6640_s7 = inlined_call_operand.vmem [shape: bf16[64,32], index: 7, kind: input, shape index: {}]   ;;  %s6641_s6 = inlined_call_operand.vmem [shape: f32[1,64], index: 6, kind: input, shape index: {}]   ;;  %s6642_s8 = inlined_call_operand.vmem [shape: f32[1,32], index: 8, kind: input, shape index: {}]   ;;  %s6643_s9 = inlined_call_operand.vmem [shape: f32[1,32], index: 9, kind: input, shape index: {}]   ;;  %s6644_s10 = inlined_call_operand.<no memory space> [shape: f32[1], index: 10, kind: input, shape index: {}]   ;;  %s6645_s11 = inlined_call_operand.vmem [shape: f32[1,256], index: 11, kind: output, shape index: {}]  }
   0x1   :  { %v5035_v0 = vld [vmem:[%s6634_s1 + $0x4] ss:$8 sps:$4 sm:$0xff]   ;;  %269 = vmatprep.mubr.bf16.mxu0 %v5213_v1  ;;  %5033 = vset.pattern.permute.xlu1 %v5213_v1  ;;  %v5037_v2 = vld [vmem:[%s6634_s1] ss:$8 sps:$4 sm:$0xff]   ;;  %v5038_v3 = vld [vmem:[%s6634_s1 + $0x14] ss:$8 sps:$4 sm:$0xff]  }
   0x2   :  { %5034 = vset.pattern.permute.xlu0 %v5213_v1  ;;  %237 = vmatprep.subr.bf16.mxu0 %v5035_v0  ;;  %v5040_v4 = vld [vmem:[%s6634_s1 + $0x10] ss:$8 sps:$4 sm:$0xff]   ;;  %v5041_v5 = vld [vmem:[%s6635_s0] sm:$0xff]   ;;  %v5042_v6 = vld [vmem:[%s6635_s0 + $0x8] sm:$0xff]   ;;  %v5418_v38 = vshrl.u32 %v78_v37, 7  ;;  %vm4491_vm2 = vcmask 130112  }
   0x3   :  { %238 = vmatpush1.bf16.msra.mxu0 %v5037_v2  ;;  %v5057_v7 = vld [vmem:[%s6636_s3 + $0x40] sm:$0xff]   ;;  %v5043_v8 = vld [vmem:[%s6635_s0 + $0x10] sm:$0xff]   ;;  %v5059_v10 = vld [vmem:[%s6636_s3 + $0x48] sm:$0xff]   ;;  %vm4498_vm3 = vcmask 195712   ;;  %vm4505_vm4 = vcmask 261312   ;;  %vm4512_vm5 = vcmask 326912  }
   0x4   :  { %239 = vmatprep.subr.bf16.mxu0 %v5038_v3  ;;  %v5058_v9 = vld [vmem:[%s6636_s3] sm:$0xff]   ;;  %4779 = vmatprep.subr.bf16.mxu1 %v5057_v7  ;;  %v5060_v11 = vld [vmem:[%s6636_s3 + $0x8] sm:$0xff]   ;;  %v5061_v12 = vld [vmem:[%s6636_s3 + $0x50] sm:$0xff]   ;;  %v5421_v39 = vsub.s32 0, %v5418_v38  ;;  %v5427_v41 = vsub.s32 1, %v5418_v38  ;;  %vm4519_vm6 = vcmask 392512  }
   0x5   :  { %4780 = vmatpush3.bf16.msra.mxu1 %v5058_v9  ;;  %v5062_v13 = vld [vmem:[%s6636_s3 + $0x10] sm:$0xff]   ;;  %v5063_v14 = vld [vmem:[%s6636_s3 + $0x58] sm:$0xff]   ;;  %v5065_v17 = vld [vmem:[%s6636_s3 + $0x60] sm:$0xff]   ;;  %vm4526_vm7 = vcmask 458112   ;;  %vm4533_vm8 = vcmask 523712   ;;  %vm4540_vm9 = vcmask 589312  }
   0x6   :  { %4781 = vmatprep.subr.bf16.mxu1 %v5059_v10  ;;  %v5044_v15 = vld [vmem:[%s6635_s0 + $0x18] sm:$0xff]   ;;  %v5066_v18 = vld [vmem:[%s6636_s3 + $0x20] sm:$0xff]   ;;  %v5067_v19 = vld [vmem:[%s6636_s3 + $0x68] sm:$0xff]   ;;  %vm4547_vm10 = vcmask 654912   ;;  %vm4554_vm11 = vcmask 720512   ;;  %vm4561_vm12 = vcmask 786112  }
   0x7   :  { %240 = vmatpush1.bf16.msra.mxu0 %v5040_v4  ;;  %v5064_v16 = vld [vmem:[%s6636_s3 + $0x18] sm:$0xff]   ;;  %v5045_v20 = vld [vmem:[%s6635_s0 + $0x20] sm:$0xff]   ;;  %v5046_v21 = vld [vmem:[%s6635_s0 + $0x28] sm:$0xff]   ;;  %vm4568_vm13 = vcmask 851712   ;;  %vm4575_vm14 = vcmask 917312   ;;  %vm4582_vm15 = vcmask 982912  }
   0x8   :  { %v5047_v22 = vld [vmem:[%s6635_s0 + $0x30] sm:$0xff]   ;;  %v5048_v23 = vld [vmem:[%s6635_s0 + $0x38] sm:$0xff]   ;;  %v5049_v24 = vld [vmem:[%s6635_s0 + $0x40] sm:$0xff]  }
   0x9   :  { %4782 = vmatpush3.bf16.msra.mxu1 %v5060_v11  ;;  %v5050_v25 = vld [vmem:[%s6635_s0 + $0x48] sm:$0xff]   ;;  %v5051_v26 = vld [vmem:[%s6635_s0 + $0x50] sm:$0xff]   ;;  %v5052_v28 = vld [vmem:[%s6635_s0 + $0x58] sm:$0xff]  }
   0xa   :  { %4715 = vmatmul.mubr.msk.bf16.vlgmr.msra.gmra.mrb[0].mxu0 %vm188_vm0, %v5041_v5  ;;  %4783 = vmatprep.subr.bf16.mxu1 %v5061_v12  ;;  %v5068_v27 = vld [vmem:[%s6636_s3 + $0x28] sm:$0xff]   ;;  %v5069_v29 = vld [vmem:[%s6636_s3 + $0x70] sm:$0xff]   ;;  %v5071_v31 = vld [vmem:[%s6636_s3 + $0x78] sm:$0xff]  }
   0xb   :  { %279 = vmatprep.mubr.bf16.mxu0 %v5213_v1  ;;  %v5070_v30 = vld [vmem:[%s6636_s3 + $0x30] sm:$0xff]   ;;  %v5072_v32 = vld [vmem:[%s6636_s3 + $0x38] sm:$0xff]   ;;  %v5053_v33 = vld [vmem:[%s6635_s0 + $0x60] sm:$0xff]  }
   0xc   :  { %v5054_v34 = vld [vmem:[%s6635_s0 + $0x68] sm:$0xff]   ;;  %v5055_v35 = vld [vmem:[%s6635_s0 + $0x70] sm:$0xff]   ;;  %v5056_v36 = vld [vmem:[%s6635_s0 + $0x78] sm:$0xff]  }
   0xd   :  { %4784 = vmatpush3.bf16.msra.mxu1 %v5062_v13  ;;  %v76_v40 = vld [vmem:[%s6637_s2] sm:$0x3]  ;;  %v5074_v55 = vld [vmem:[%s6638_s5 + $0x8] sm:$0xff]   ;;  %v5075_v61 = vld [vmem:[%s6638_s5 + $0x10] sm:$0xff]  }
   0xe   :  { %4785 = vmatprep.subr.bf16.mxu1 %v5063_v14  ;;  %v5430_v42 = vrot.slane %v76_v40, %v5421_v39  ;;  %v5433_v43 = vrot.slane %v76_v40, %v5427_v41  ;;  %v5073_v53 = vld [vmem:[%s6638_s5] sm:$0xff]   ;;  %v5076_v5 = vld [vmem:[%s6638_s5 + $0x18] sm:$0xff]  }
   0xf   :  { %4935 = vmatprep.subr.bf16.mxu0 %v5073_v53  ;;  %v5077_v13 = vld [vmem:[%s6638_s5 + $0x20] sm:$0xff]  }
  0x10   :  { %4936 = vmatpush3.bf16.msra.mxu0 %v5073_v53 }
  0x11   :  { %4786 = vmatpush3.bf16.msra.mxu1 %v5064_v16  ;;  %4937 = vmatprep.subr.bf16.mxu0 %v5074_v55 }
  0x12   :  { %4716 = vmatmul.mubr.msk.bf16.gmra.mrb[4].mxu0 %vm188_vm0, %v5042_v6  ;;  %4787 = vmatprep.subr.bf16.mxu1 %v5065_v17 }
  0x13   :  { %289 = vmatprep.mubr.bf16.mxu0 %v5213_v1 }
  0x14   :  { %4938 = vmatpush3.bf16.msra.mxu0 %v5074_v55 }
  0x15   :  { %4788 = vmatpush3.bf16.msra.mxu1 %v5066_v18  ;;  %4939 = vmatprep.subr.bf16.mxu0 %v5075_v61 }
  0x16   :  { %4789 = vmatprep.subr.bf16.mxu1 %v5067_v19 }
  0x18   :  { %4940 = vmatpush3.bf16.msra.mxu0 %v5075_v61 }
  0x19   :  { %4790 = vmatpush3.bf16.msra.mxu1 %v5068_v27  ;;  %4941 = vmatprep.subr.bf16.mxu0 %v5076_v5 }
  0x1a   :  { %4717 = vmatmul.mubr.msk.bf16.gmra.mrb[8].mxu0 %vm188_vm0, %v5043_v8  ;;  %4791 = vmatprep.subr.bf16.mxu1 %v5069_v29 }
  0x1b   :  { %299 = vmatprep.mubr.bf16.mxu0 %v5213_v1 }
  0x1c   :  { %4942 = vmatpush3.bf16.msra.mxu0 %v5076_v5 }
  0x1d   :  { %4792 = vmatpush3.bf16.msra.mxu1 %v5070_v30  ;;  %4943 = vmatprep.subr.bf16.mxu0 %v5077_v13 }
  0x1e   :  { %4793 = vmatprep.subr.bf16.mxu1 %v5071_v31 }
  0x20   :  { %4944 = vmatpush3.bf16.msra.mxu0 %v5077_v13 }
  0x21   :  { %4794 = vmatpush3.bf16.msra.mxu1 %v5072_v32 }
  0x22   :  { %4718 = vmatmul.mubr.msk.bf16.gmra.mrb[12].mxu0 %vm188_vm0, %v5044_v15 }
  0x23   :  { %309 = vmatprep.mubr.bf16.mxu0 %v5213_v1 }
  0x2a   :  { %4719 = vmatmul.mubr.msk.bf16.gmra.mrb[16].mxu0 %vm188_vm0, %v5045_v20 }
  0x2b   :  { %319 = vmatprep.mubr.bf16.mxu0 %v5213_v1 }
  0x32   :  { %4720 = vmatmul.mubr.msk.bf16.gmra.mrb[20].mxu0 %vm188_vm0, %v5046_v21 }
  0x33   :  { %329 = vmatprep.mubr.bf16.mxu0 %v5213_v1 }
  0x3a   :  { %4721 = vmatmul.mubr.msk.bf16.gmra.mrb[24].mxu0 %vm188_vm0, %v5047_v22 }
  0x3b   :  { %339 = vmatprep.mubr.bf16.mxu0 %v5213_v1 }
  0x42   :  { %4722 = vmatmul.mubr.msk.bf16.gmra.mrb[28].mxu0 %vm188_vm0, %v5048_v23 }
  0x43   :  { %349 = vmatprep.mubr.bf16.mxu0 %v5213_v1 }
  0x4a   :  { %4723 = vmatmul.mubr.msk.bf16.gmra.mrb[32].mxu0 %vm188_vm0, %v5049_v24 }
  0x4b   :  { %359 = vmatprep.mubr.bf16.mxu0 %v5213_v1 }
  0x52   :  { %4724 = vmatmul.mubr.msk.bf16.gmra.mrb[36].mxu0 %vm188_vm0, %v5050_v25 }
  0x53   :  { %369 = vmatprep.mubr.bf16.mxu0 %v5213_v1 }
  0x5a   :  { %4725 = vmatmul.mubr.msk.bf16.gmra.mrb[40].mxu0 %vm188_vm0, %v5051_v26 }
  0x5b   :  { %379 = vmatprep.mubr.bf16.mxu0 %v5213_v1 }
  0x62   :  { %4726 = vmatmul.mubr.msk.bf16.gmra.mrb[44].mxu0 %vm188_vm0, %v5052_v28 }
  0x63   :  { %389 = vmatprep.mubr.bf16.mxu0 %v5213_v1 }
  0x6a   :  { %4727 = vmatmul.mubr.msk.bf16.gmra.mrb[48].mxu0 %vm188_vm0, %v5053_v33 }
  0x6b   :  { %399 = vmatprep.mubr.bf16.mxu0 %v5213_v1 }
  0x72   :  { %4728 = vmatmul.mubr.msk.bf16.gmra.mrb[52].mxu0 %vm188_vm0, %v5054_v34 }
  0x73   :  { %409 = vmatprep.mubr.bf16.mxu0 %v5213_v1 }
  0x7a   :  { %4729 = vmatmul.mubr.msk.bf16.gmra.mrb[56].mxu0 %vm188_vm0, %v5055_v35 }
  0x7b   :  { %419 = vmatprep.mubr.bf16.mxu0 %v5213_v1 }
  0x82   :  { %4730 = vmatmul.mubr.msk.bf16.gmra.mrb[60].mxu0 %vm188_vm0, %v5056_v36 }
  0xdd   :  { %v271_v44 = vpop.f32.mrb[0].mxu0 }
  0xde   :  { %v272_v45 = vadd.f32 %v271_v44, %v5430_v42  ;;  %v273_v46 = vpop.f32.mrb[1].mxu0 }
  0xdf   :  { %v274_v47 = vadd.f32 %v273_v46, %v5433_v43  ;;  %v275_v48 = vpop.f32.mrb[2].mxu0 }
  0xe0   :  { %v276_v49 = vadd.f32 %v275_v48, %v5430_v42  ;;  %v277_v50 = vpop.f32.mrb[3].mxu0  ;;  %v430_v51 = vmax.f32 %v272_v45, 0.0 }
  0xe1   :  { %v278_v52 = vadd.f32 %v277_v50, %v5433_v43  ;;  %v431_v56 = vmax.f32 %v274_v47, 0.0 }
  0xe2   :  { %v432_v54 = vmax.f32 %v276_v49, 0.0 }
  0xe3   :  { %v433_v57 = vmax.f32 %v278_v52, 0.0 }
  0xe4   :  { %v494_v58 = vpack.c.bf16 %v432_v54, %v430_v51 }
  0xe5   :  { %v281_v59 = vpop.f32.mrb[4].mxu0  ;;  %v495_v60 = vpack.c.bf16 %v433_v57, %v431_v56 }
  0xe6   :  { %v282_v62 = vadd.f32 %v281_v59, %v5430_v42  ;;  %v283_v63 = vpop.f32.mrb[5].mxu0 }
  0xe7   :  { %v284_v0 = vadd.f32 %v283_v63, %v5433_v43  ;;  %v285_v1 = vpop.f32.mrb[6].mxu0  ;;  %693 = vmatprep.mubr.bf16.mxu1 %v495_v60 }
  0xe8   :  { %v286_v2 = vadd.f32 %v285_v1, %v5430_v42  ;;  %v287_v3 = vpop.f32.mrb[7].mxu0  ;;  %694 = vmatmul.mubr.bf16.vlgmr.msra.gmra.mrb[0].mxu1 %v494_v58  ;;  %v434_v6 = vmax.f32 %v282_v62, 0.0 }
  0xe9   :  { %v288_v4 = vadd.f32 %v287_v3, %v5433_v43  ;;  %v435_v8 = vmax.f32 %v284_v0, 0.0 }
  0xea   :  { %v436_v7 = vmax.f32 %v286_v2, 0.0 }
  0xeb   :  { %v437_v9 = vmax.f32 %v288_v4, 0.0 }
  0xec   :  { %v496_v10 = vpack.c.bf16 %v436_v7, %v434_v6 }
  0xed   :  { %v497_v11 = vpack.c.bf16 %v437_v9, %v435_v8  ;;  %v291_v12 = vpop.f32.mrb[8].mxu0 }
  0xee   :  { %v292_v14 = vadd.f32 %v291_v12, %v5430_v42  ;;  %v293_v15 = vpop.f32.mrb[9].mxu0 }
  0xef   :  { %v294_v16 = vadd.f32 %v293_v15, %v5433_v43  ;;  %v295_v17 = vpop.f32.mrb[10].mxu0  ;;  %701 = vmatprep.mubr.bf16.mxu1 %v497_v11 }
  0xf0   :  { %v296_v18 = vadd.f32 %v295_v17, %v5430_v42  ;;  %v297_v19 = vpop.f32.mrb[11].mxu0  ;;  %702 = vmatmul.mubr.bf16.gmra.mrb[4].mxu1 %v496_v10  ;;  %v438_v21 = vmax.f32 %v292_v14, 0.0 }
  0xf1   :  { %v298_v20 = vadd.f32 %v297_v19, %v5433_v43  ;;  %v439_v23 = vmax.f32 %v294_v16, 0.0 }
  0xf2   :  { %v440_v22 = vmax.f32 %v296_v18, 0.0 }
  0xf3   :  { %v441_v24 = vmax.f32 %v298_v20, 0.0 }
  0xf4   :  { %v498_v25 = vpack.c.bf16 %v440_v22, %v438_v21 }
  0xf5   :  { %v499_v26 = vpack.c.bf16 %v441_v24, %v439_v23  ;;  %v301_v27 = vpop.f32.mrb[12].mxu0 }
  0xf6   :  { %v302_v28 = vadd.f32 %v301_v27, %v5430_v42  ;;  %v303_v29 = vpop.f32.mrb[13].mxu0 }
  0xf7   :  { %v304_v30 = vadd.f32 %v303_v29, %v5433_v43  ;;  %v305_v31 = vpop.f32.mrb[14].mxu0  ;;  %709 = vmatprep.mubr.bf16.mxu1 %v499_v26 }
  0xf8   :  { %v306_v32 = vadd.f32 %v305_v31, %v5430_v42  ;;  %v307_v33 = vpop.f32.mrb[15].mxu0  ;;  %710 = vmatmul.mubr.bf16.gmra.mrb[8].mxu1 %v498_v25  ;;  %v442_v35 = vmax.f32 %v302_v28, 0.0 }
  0xf9   :  { %v308_v34 = vadd.f32 %v307_v33, %v5433_v43  ;;  %v443_v40 = vmax.f32 %v304_v30, 0.0 }
  0xfa   :  { %v444_v36 = vmax.f32 %v306_v32, 0.0 }
  0xfb   :  { %v445_v44 = vmax.f32 %v308_v34, 0.0 }
  0xfc   :  { %v500_v45 = vpack.c.bf16 %v444_v36, %v442_v35 }
  0xfd   :  { %v501_v46 = vpack.c.bf16 %v445_v44, %v443_v40  ;;  %v311_v47 = vpop.f32.mrb[16].mxu0 }
  0xfe   :  { %v312_v48 = vadd.f32 %v311_v47, %v5430_v42  ;;  %v313_v49 = vpop.f32.mrb[17].mxu0 }
  0xff   :  { %v314_v50 = vadd.f32 %v313_v49, %v5433_v43  ;;  %v315_v51 = vpop.f32.mrb[18].mxu0  ;;  %717 = vmatprep.mubr.bf16.mxu1 %v501_v46 }
 0x100   :  { %v316_v52 = vadd.f32 %v315_v51, %v5430_v42  ;;  %v317_v53 = vpop.f32.mrb[19].mxu0  ;;  %718 = vmatmul.mubr.bf16.gmra.mrb[12].mxu1 %v500_v45  ;;  %v446_v55 = vmax.f32 %v312_v48, 0.0 }
 0x101   :  { %v318_v54 = vadd.f32 %v317_v53, %v5433_v43  ;;  %v447_v57 = vmax.f32 %v314_v50, 0.0 }
 0x102   :  { %v448_v56 = vmax.f32 %v316_v52, 0.0 }
 0x103   :  { %v449_v58 = vmax.f32 %v318_v54, 0.0 }
 0x104   :  { %v502_v59 = vpack.c.bf16 %v448_v56, %v446_v55 }
 0x105   :  { %v503_v60 = vpack.c.bf16 %v449_v58, %v447_v57  ;;  %v321_v61 = vpop.f32.mrb[20].mxu0 }
 0x106   :  { %v322_v62 = vadd.f32 %v321_v61, %v5430_v42  ;;  %v323_v63 = vpop.f32.mrb[21].mxu0 }
 0x107   :  { %v324_v0 = vadd.f32 %v323_v63, %v5433_v43  ;;  %v325_v1 = vpop.f32.mrb[22].mxu0  ;;  %725 = vmatprep.mubr.bf16.mxu1 %v503_v60 }
 0x108   :  { %v326_v2 = vadd.f32 %v325_v1, %v5430_v42  ;;  %v327_v3 = vpop.f32.mrb[23].mxu0  ;;  %726 = vmatmul.mubr.bf16.gmra.mrb[16].mxu1 %v502_v59  ;;  %v450_v5 = vmax.f32 %v322_v62, 0.0 }
 0x109   :  { %v328_v4 = vadd.f32 %v327_v3, %v5433_v43  ;;  %v451_v7 = vmax.f32 %v324_v0, 0.0 }
 0x10a   :  { %v452_v6 = vmax.f32 %v326_v2, 0.0 }
 0x10b   :  { %v453_v8 = vmax.f32 %v328_v4, 0.0 }
 0x10c   :  { %v504_v9 = vpack.c.bf16 %v452_v6, %v450_v5 }
 0x10d   :  { %v505_v10 = vpack.c.bf16 %v453_v8, %v451_v7  ;;  %v331_v11 = vpop.f32.mrb[24].mxu0 }
 0x10e   :  { %v332_v12 = vadd.f32 %v331_v11, %v5430_v42  ;;  %v333_v13 = vpop.f32.mrb[25].mxu0 }
 0x10f   :  { %v334_v14 = vadd.f32 %v333_v13, %v5433_v43  ;;  %v335_v15 = vpop.f32.mrb[26].mxu0  ;;  %733 = vmatprep.mubr.bf16.mxu1 %v505_v10 }
 0x110   :  { %v336_v16 = vadd.f32 %v335_v15, %v5430_v42  ;;  %v337_v17 = vpop.f32.mrb[27].mxu0  ;;  %734 = vmatmul.mubr.bf16.gmra.mrb[20].mxu1 %v504_v9  ;;  %v454_v19 = vmax.f32 %v332_v12, 0.0 }
 0x111   :  { %v338_v18 = vadd.f32 %v337_v17, %v5433_v43  ;;  %v455_v21 = vmax.f32 %v334_v14, 0.0 }
 0x112   :  { %v456_v20 = vmax.f32 %v336_v16, 0.0 }
 0x113   :  { %v457_v22 = vmax.f32 %v338_v18, 0.0 }
 0x114   :  { %v506_v23 = vpack.c.bf16 %v456_v20, %v454_v19 }
 0x115   :  { %v507_v24 = vpack.c.bf16 %v457_v22, %v455_v21  ;;  %v341_v25 = vpop.f32.mrb[28].mxu0 }
 0x116   :  { %v342_v26 = vadd.f32 %v341_v25, %v5430_v42  ;;  %v343_v27 = vpop.f32.mrb[29].mxu0 }
 0x117   :  { %v344_v28 = vadd.f32 %v343_v27, %v5433_v43  ;;  %v345_v29 = vpop.f32.mrb[30].mxu0  ;;  %741 = vmatprep.mubr.bf16.mxu1 %v507_v24 }
 0x118   :  { %v346_v30 = vadd.f32 %v345_v29, %v5430_v42  ;;  %v347_v31 = vpop.f32.mrb[31].mxu0  ;;  %742 = vmatmul.mubr.bf16.gmra.mrb[24].mxu1 %v506_v23  ;;  %v458_v33 = vmax.f32 %v342_v26, 0.0 }
 0x119   :  { %v348_v32 = vadd.f32 %v347_v31, %v5433_v43  ;;  %v459_v35 = vmax.f32 %v344_v28, 0.0 }
 0x11a   :  { %v460_v34 = vmax.f32 %v346_v30, 0.0 }
 0x11b   :  { %v461_v36 = vmax.f32 %v348_v32, 0.0 }
 0x11c   :  { %v508_v40 = vpack.c.bf16 %v460_v34, %v458_v33 }
 0x11d   :  { %v509_v44 = vpack.c.bf16 %v461_v36, %v459_v35  ;;  %v351_v45 = vpop.f32.mrb[32].mxu0 }
 0x11e   :  { %v352_v46 = vadd.f32 %v351_v45, %v5430_v42  ;;  %v353_v47 = vpop.f32.mrb[33].mxu0 }
 0x11f   :  { %v354_v48 = vadd.f32 %v353_v47, %v5433_v43  ;;  %v355_v49 = vpop.f32.mrb[34].mxu0  ;;  %749 = vmatprep.mubr.bf16.mxu1 %v509_v44 }
 0x120   :  { %v356_v50 = vadd.f32 %v355_v49, %v5430_v42  ;;  %v357_v51 = vpop.f32.mrb[35].mxu0  ;;  %750 = vmatmul.mubr.bf16.gmra.mrb[28].mxu1 %v508_v40  ;;  %v462_v53 = vmax.f32 %v352_v46, 0.0 }
 0x121   :  { %v358_v52 = vadd.f32 %v357_v51, %v5433_v43  ;;  %v463_v55 = vmax.f32 %v354_v48, 0.0  ;;  %v5078_v51 = vld [vmem:[%s6638_s5 + $0x28] sm:$0xff]  }
 0x122   :  { %v464_v54 = vmax.f32 %v356_v50, 0.0  ;;  %4945 = vmatprep.subr.bf16.mxu0 %v5078_v51 }
 0x123   :  { %v465_v56 = vmax.f32 %v358_v52, 0.0  ;;  %4946 = vmatpush3.bf16.msra.mxu0 %v5078_v51 }
 0x124   :  { %v510_v57 = vpack.c.bf16 %v464_v54, %v462_v53 }
 0x125   :  { %v511_v58 = vpack.c.bf16 %v465_v56, %v463_v55  ;;  %v361_v59 = vpop.f32.mrb[36].mxu0 }
 0x126   :  { %v362_v60 = vadd.f32 %v361_v59, %v5430_v42  ;;  %v363_v61 = vpop.f32.mrb[37].mxu0  ;;  %v5079_v59 = vld [vmem:[%s6638_s5 + $0x30] sm:$0xff]  }
 0x127   :  { %v364_v62 = vadd.f32 %v363_v61, %v5433_v43  ;;  %v365_v63 = vpop.f32.mrb[38].mxu0  ;;  %757 = vmatprep.mubr.bf16.mxu1 %v511_v58  ;;  %4947 = vmatprep.subr.bf16.mxu0 %v5079_v59 }
 0x128   :  { %v366_v0 = vadd.f32 %v365_v63, %v5430_v42  ;;  %v367_v1 = vpop.f32.mrb[39].mxu0  ;;  %758 = vmatmul.mubr.bf16.gmra.mrb[32].mxu1 %v510_v57  ;;  %v466_v3 = vmax.f32 %v362_v60, 0.0  ;;  %4948 = vmatpush3.bf16.msra.mxu0 %v5079_v59 }
 0x129   :  { %v368_v2 = vadd.f32 %v367_v1, %v5433_v43  ;;  %v467_v5 = vmax.f32 %v364_v62, 0.0 }
 0x12a   :  { %v468_v4 = vmax.f32 %v366_v0, 0.0 }
 0x12b   :  { %v469_v6 = vmax.f32 %v368_v2, 0.0 }
 0x12c   :  { %v512_v7 = vpack.c.bf16 %v468_v4, %v466_v3  ;;  %v5080_v3 = vld [vmem:[%s6638_s5 + $0x38] sm:$0xff]  }
 0x12d   :  { %v513_v8 = vpack.c.bf16 %v469_v6, %v467_v5  ;;  %v371_v9 = vpop.f32.mrb[40].mxu0  ;;  %4949 = vmatprep.subr.bf16.mxu0 %v5080_v3 }
 0x12e   :  { %v372_v10 = vadd.f32 %v371_v9, %v5430_v42  ;;  %v373_v11 = vpop.f32.mrb[41].mxu0  ;;  %4950 = vmatpush3.bf16.msra.mxu0 %v5080_v3 }
 0x12f   :  { %v374_v12 = vadd.f32 %v373_v11, %v5433_v43  ;;  %v375_v13 = vpop.f32.mrb[42].mxu0  ;;  %765 = vmatprep.mubr.bf16.mxu1 %v513_v8 }
 0x130   :  { %v376_v14 = vadd.f32 %v375_v13, %v5430_v42  ;;  %v377_v15 = vpop.f32.mrb[43].mxu0  ;;  %766 = vmatmul.mubr.bf16.gmra.mrb[36].mxu1 %v512_v7  ;;  %v470_v17 = vmax.f32 %v372_v10, 0.0 }
 0x131   :  { %v378_v16 = vadd.f32 %v377_v15, %v5433_v43  ;;  %v471_v19 = vmax.f32 %v374_v12, 0.0 }
 0x132   :  { %v472_v18 = vmax.f32 %v376_v14, 0.0 }
 0x133   :  { %v473_v20 = vmax.f32 %v378_v16, 0.0 }
 0x134   :  { %v514_v21 = vpack.c.bf16 %v472_v18, %v470_v17 }
 0x135   :  { %v515_v22 = vpack.c.bf16 %v473_v20, %v471_v19  ;;  %v381_v23 = vpop.f32.mrb[44].mxu0 }
 0x136   :  { %v382_v24 = vadd.f32 %v381_v23, %v5430_v42  ;;  %v383_v25 = vpop.f32.mrb[45].mxu0 }
 0x137   :  { %v384_v26 = vadd.f32 %v383_v25, %v5433_v43  ;;  %v385_v27 = vpop.f32.mrb[46].mxu0  ;;  %773 = vmatprep.mubr.bf16.mxu1 %v515_v22 }
 0x138   :  { %v386_v28 = vadd.f32 %v385_v27, %v5430_v42  ;;  %v387_v29 = vpop.f32.mrb[47].mxu0  ;;  %774 = vmatmul.mubr.bf16.gmra.mrb[40].mxu1 %v514_v21  ;;  %v474_v31 = vmax.f32 %v382_v24, 0.0 }
 0x139   :  { %v388_v30 = vadd.f32 %v387_v29, %v5433_v43  ;;  %v475_v33 = vmax.f32 %v384_v26, 0.0 }
 0x13a   :  { %v476_v32 = vmax.f32 %v386_v28, 0.0 }
 0x13b   :  { %v477_v34 = vmax.f32 %v388_v30, 0.0 }
 0x13c   :  { %v516_v35 = vpack.c.bf16 %v476_v32, %v474_v31 }
 0x13d   :  { %v517_v36 = vpack.c.bf16 %v477_v34, %v475_v33  ;;  %v391_v40 = vpop.f32.mrb[48].mxu0 }
 0x13e   :  { %v392_v44 = vadd.f32 %v391_v40, %v5430_v42  ;;  %v393_v45 = vpop.f32.mrb[49].mxu0 }
 0x13f   :  { %v394_v46 = vadd.f32 %v393_v45, %v5433_v43  ;;  %v395_v47 = vpop.f32.mrb[50].mxu0  ;;  %781 = vmatprep.mubr.bf16.mxu1 %v517_v36  ;;  %v5526_v45 = vld [vmem:[%s6639_s4] ss:$0 sm:$0xff] }
 0x140   :  { %v396_v48 = vadd.f32 %v395_v47, %v5430_v42  ;;  %v397_v49 = vpop.f32.mrb[51].mxu0  ;;  %782 = vmatmul.mubr.bf16.gmra.mrb[44].mxu1 %v516_v35  ;;  %v478_v52 = vmax.f32 %v392_v44, 0.0 }
 0x141   :  { %v398_v50 = vadd.f32 %v397_v49, %v5433_v43  ;;  %v479_v54 = vmax.f32 %v394_v46, 0.0 }
 0x142   :  { %v480_v53 = vmax.f32 %v396_v48, 0.0 }
 0x143   :  { %v481_v55 = vmax.f32 %v398_v50, 0.0  ;;  %v5081_v50 = vld [vmem:[%s6640_s7] sm:$0xff]  }
 0x144   :  { %v518_v56 = vpack.c.bf16 %v480_v53, %v478_v52  ;;  %5023 = vmatprep.subr.bf16.mxu1 %v5081_v50  ;;  %v5082_v53 = vld [vmem:[%s6640_s7 + $0x8] sm:$0xff]   ;;  %4983 = vmatprep.subr.bf16.mxu0 %v5081_v50 }
 0x145   :  { %v519_v57 = vpack.c.bf16 %v481_v55, %v479_v54  ;;  %v401_v58 = vpop.f32.mrb[52].mxu0  ;;  %5027 = vmatpush3.bf16.msra.mxu1 %v5081_v50 }
 0x146   :  { %v402_v60 = vadd.f32 %v401_v58, %v5430_v42  ;;  %v403_v61 = vpop.f32.mrb[53].mxu0  ;;  %5024 = vmatprep.subr.bf16.mxu1 %v5082_v53 }
 0x147   :  { %v404_v62 = vadd.f32 %v403_v61, %v5433_v43  ;;  %v405_v63 = vpop.f32.mrb[54].mxu0  ;;  %789 = vmatprep.mubr.bf16.mxu1 %v519_v57  ;;  %v5083_v61 = vld [vmem:[%s6640_s7 + $0x10] sm:$0xff]  }
 0x148   :  { %v406_v0 = vadd.f32 %v405_v63, %v5430_v42  ;;  %v407_v1 = vpop.f32.mrb[55].mxu0  ;;  %790 = vmatmul.mubr.bf16.gmra.mrb[48].mxu1 %v518_v56  ;;  %v482_v4 = vmax.f32 %v402_v60, 0.0 }
 0x149   :  { %v408_v2 = vadd.f32 %v407_v1, %v5433_v43  ;;  %v483_v6 = vmax.f32 %v404_v62, 0.0  ;;  %5028 = vmatpush3.bf16.msra.mxu1 %v5082_v53 }
 0x14a   :  { %v484_v5 = vmax.f32 %v406_v0, 0.0  ;;  %5025 = vmatprep.subr.bf16.mxu1 %v5083_v61 }
 0x14b   :  { %v485_v7 = vmax.f32 %v408_v2, 0.0 }
 0x14c   :  { %v520_v8 = vpack.c.bf16 %v484_v5, %v482_v4 }
 0x14d   :  { %v521_v9 = vpack.c.bf16 %v485_v7, %v483_v6  ;;  %v411_v10 = vpop.f32.mrb[56].mxu0  ;;  %5029 = vmatpush3.bf16.msra.mxu1 %v5083_v61 }
 0x14e   :  { %v412_v11 = vadd.f32 %v411_v10, %v5430_v42  ;;  %v413_v12 = vpop.f32.mrb[57].mxu0 }
 0x14f   :  { %v414_v13 = vadd.f32 %v413_v12, %v5433_v43  ;;  %v415_v14 = vpop.f32.mrb[58].mxu0  ;;  %797 = vmatprep.mubr.bf16.mxu1 %v521_v9 }
 0x150   :  { %v416_v15 = vadd.f32 %v415_v14, %v5430_v42  ;;  %v417_v16 = vpop.f32.mrb[59].mxu0  ;;  %798 = vmatmul.mubr.bf16.gmra.mrb[52].mxu1 %v520_v8  ;;  %v486_v18 = vmax.f32 %v412_v11, 0.0 }
 0x151   :  { %v418_v17 = vadd.f32 %v417_v16, %v5433_v43  ;;  %v487_v20 = vmax.f32 %v414_v13, 0.0 }
 0x152   :  { %v488_v19 = vmax.f32 %v416_v15, 0.0 }
 0x153   :  { %v489_v21 = vmax.f32 %v418_v17, 0.0 }
 0x154   :  { %v522_v22 = vpack.c.bf16 %v488_v19, %v486_v18 }
 0x155   :  { %v523_v23 = vpack.c.bf16 %v489_v21, %v487_v20  ;;  %v421_v24 = vpop.f32.mrb[60].mxu0 }
 0x156   :  { %v422_v25 = vadd.f32 %v421_v24, %v5430_v42  ;;  %v423_v26 = vpop.f32.mrb[61].mxu0 }
 0x157   :  { %v424_v27 = vadd.f32 %v423_v26, %v5433_v43  ;;  %v425_v28 = vpop.f32.mrb[62].mxu0  ;;  %805 = vmatprep.mubr.bf16.mxu1 %v523_v23 }
 0x158   :  { %v426_v29 = vadd.f32 %v425_v28, %v5430_v42  ;;  %v427_v30 = vpop.f32.mrb[63].mxu0  ;;  %806 = vmatmul.mubr.bf16.gmra.mrb[56].mxu1 %v522_v22  ;;  %v490_v32 = vmax.f32 %v422_v25, 0.0 }
 0x159   :  { %v428_v31 = vadd.f32 %v427_v30, %v5433_v43  ;;  %v491_v34 = vmax.f32 %v424_v27, 0.0 }
 0x15a   :  { %v492_v33 = vmax.f32 %v426_v29, 0.0 }
 0x15b   :  { %v493_v35 = vmax.f32 %v428_v31, 0.0 }
 0x15c   :  { %v524_v36 = vpack.c.bf16 %v492_v33, %v490_v32 }
 0x15d   :  { %v525_v40 = vpack.c.bf16 %v493_v35, %v491_v34 }
 0x15f   :  { %813 = vmatprep.mubr.bf16.mxu1 %v525_v40 }
 0x160   :  { %814 = vmatmul.mubr.bf16.gmra.mrb[60].mxu1 %v524_v36 }
 0x1bb   :  { %v4795_v44 = vpop.f32.mrb[0].mxu1 }
 0x1bc   :  { %v4796_v46 = vpop.f32.mrb[1].mxu1 }
 0x1bd   :  { %v4797_v42 = vadd.f32 %v4796_v46, %v4795_v44  ;;  %v4798_v47 = vpop.f32.mrb[2].mxu1 }
 0x1be   :  { %v4799_v48 = vpop.f32.mrb[3].mxu1 }
 0x1bf   :  { %v696_v43 = vadd.f32 %v4797_v42, %v5526_v45  ;;  %v4800_v49 = vadd.f32 %v4799_v48, %v4798_v47 }
 0x1c1   :  { %v699_v51 = vadd.f32 %v4800_v49, %v5526_v45  ;;  %v822_v52 = vmax.f32 %v696_v43, 0.0 }
 0x1c3   :  { %v823_v54 = vmax.f32 %v699_v51, 0.0  ;;  %v4801_v55 = vpop.f32.mrb[4].mxu1 }
 0x1c4   :  { %v4802_v56 = vpop.f32.mrb[5].mxu1 }
 0x1c5   :  { %v4803_v57 = vadd.f32 %v4802_v56, %v4801_v55  ;;  %v4804_v58 = vpop.f32.mrb[6].mxu1  ;;  %v854_v59 = vpack.c.bf16 %v823_v54, %v822_v52 }
 0x1c6   :  { %v4805_v60 = vpop.f32.mrb[7].mxu1 }
 0x1c7   :  { %v704_v62 = vadd.f32 %v4803_v57, %v5526_v45  ;;  %v4806_v63 = vadd.f32 %v4805_v60, %v4804_v58  ;;  %4951 = vmatprep.mubr.bf16.mxu0 %v854_v59 }
 0x1c9   :  { %v707_v0 = vadd.f32 %v4806_v63, %v5526_v45  ;;  %v824_v1 = vmax.f32 %v704_v62, 0.0 }
 0x1cb   :  { %v825_v2 = vmax.f32 %v707_v0, 0.0  ;;  %v4807_v3 = vpop.f32.mrb[8].mxu1 }
 0x1cc   :  { %v4808_v4 = vpop.f32.mrb[9].mxu1 }
 0x1cd   :  { %v855_v5 = vpack.c.bf16 %v825_v2, %v824_v1  ;;  %v4809_v6 = vadd.f32 %v4808_v4, %v4807_v3  ;;  %v4810_v7 = vpop.f32.mrb[10].mxu1 }
 0x1ce   :  { %v4811_v8 = vpop.f32.mrb[11].mxu1 }
 0x1cf   :  { %v712_v9 = vadd.f32 %v4809_v6, %v5526_v45  ;;  %v4812_v10 = vadd.f32 %v4811_v8, %v4810_v7  ;;  %4952 = vmatmul.mubr.bf16.vlgmr.msra.gmra.mrb[64].mxu0 %v855_v5 }
 0x1d0   :  { %4984 = vmatpush3.bf16.msra.mxu0 %v5081_v50 }
 0x1d1   :  { %v715_v11 = vadd.f32 %v4812_v10, %v5526_v45  ;;  %4985 = vmatprep.subr.bf16.mxu0 %v5082_v53  ;;  %v826_v12 = vmax.f32 %v712_v9, 0.0 }
 0x1d3   :  { %v827_v13 = vmax.f32 %v715_v11, 0.0  ;;  %v4813_v14 = vpop.f32.mrb[12].mxu1 }
 0x1d4   :  { %v4814_v15 = vpop.f32.mrb[13].mxu1  ;;  %4986 = vmatpush3.bf16.msra.mxu0 %v5082_v53 }
 0x1d5   :  { %v4815_v16 = vadd.f32 %v4814_v15, %v4813_v14  ;;  %v4816_v17 = vpop.f32.mrb[14].mxu1  ;;  %v856_v18 = vpack.c.bf16 %v827_v13, %v826_v12  ;;  %4987 = vmatprep.subr.bf16.mxu0 %v5083_v61 }
 0x1d6   :  { %v4817_v19 = vpop.f32.mrb[15].mxu1 }
 0x1d7   :  { %v720_v20 = vadd.f32 %v4815_v16, %v5526_v45  ;;  %v4818_v21 = vadd.f32 %v4817_v19, %v4816_v17  ;;  %4955 = vmatprep.mubr.bf16.mxu0 %v856_v18 }
 0x1d8   :  { %4988 = vmatpush3.bf16.msra.mxu0 %v5083_v61 }
 0x1d9   :  { %v723_v22 = vadd.f32 %v4818_v21, %v5526_v45  ;;  %v828_v23 = vmax.f32 %v720_v20, 0.0 }
 0x1db   :  { %v829_v24 = vmax.f32 %v723_v22, 0.0  ;;  %v4819_v25 = vpop.f32.mrb[16].mxu1 }
 0x1dc   :  { %v4820_v26 = vpop.f32.mrb[17].mxu1 }
 0x1dd   :  { %v4821_v27 = vadd.f32 %v4820_v26, %v4819_v25  ;;  %v4822_v28 = vpop.f32.mrb[18].mxu1  ;;  %v857_v29 = vpack.c.bf16 %v829_v24, %v828_v23 }
 0x1de   :  { %v4823_v30 = vpop.f32.mrb[19].mxu1 }
 0x1df   :  { %v728_v31 = vadd.f32 %v4821_v27, %v5526_v45  ;;  %v4824_v32 = vadd.f32 %v4823_v30, %v4822_v28  ;;  %4956 = vmatmul.mubr.bf16.gmra.mrb[68].mxu0 %v857_v29 }
 0x1e1   :  { %v731_v33 = vadd.f32 %v4824_v32, %v5526_v45  ;;  %v830_v34 = vmax.f32 %v728_v31, 0.0 }
 0x1e3   :  { %v831_v35 = vmax.f32 %v731_v33, 0.0  ;;  %v4825_v36 = vpop.f32.mrb[20].mxu1 }
 0x1e4   :  { %v4826_v40 = vpop.f32.mrb[21].mxu1 }
 0x1e5   :  { %v4827_v44 = vadd.f32 %v4826_v40, %v4825_v36  ;;  %v4828_v46 = vpop.f32.mrb[22].mxu1  ;;  %v858_v42 = vpack.c.bf16 %v831_v35, %v830_v34 }
 0x1e6   :  { %v4829_v47 = vpop.f32.mrb[23].mxu1 }
 0x1e7   :  { %v736_v48 = vadd.f32 %v4827_v44, %v5526_v45  ;;  %v4830_v43 = vadd.f32 %v4829_v47, %v4828_v46  ;;  %4959 = vmatprep.mubr.bf16.mxu0 %v858_v42 }
 0x1e9   :  { %v739_v49 = vadd.f32 %v4830_v43, %v5526_v45  ;;  %v832_v50 = vmax.f32 %v736_v48, 0.0 }
 0x1eb   :  { %v833_v51 = vmax.f32 %v739_v49, 0.0  ;;  %v4831_v52 = vpop.f32.mrb[24].mxu1 }
 0x1ec   :  { %v4832_v53 = vpop.f32.mrb[25].mxu1 }
 0x1ed   :  { %v4833_v54 = vadd.f32 %v4832_v53, %v4831_v52  ;;  %v4834_v55 = vpop.f32.mrb[26].mxu1  ;;  %v859_v56 = vpack.c.bf16 %v833_v51, %v832_v50 }
 0x1ee   :  { %v4835_v57 = vpop.f32.mrb[27].mxu1 }
 0x1ef   :  { %v744_v58 = vadd.f32 %v4833_v54, %v5526_v45  ;;  %v4836_v59 = vadd.f32 %v4835_v57, %v4834_v55  ;;  %4960 = vmatmul.mubr.bf16.gmra.mrb[72].mxu0 %v859_v56 }
 0x1f1   :  { %v747_v60 = vadd.f32 %v4836_v59, %v5526_v45  ;;  %v834_v61 = vmax.f32 %v744_v58, 0.0 }
 0x1f3   :  { %v835_v62 = vmax.f32 %v747_v60, 0.0  ;;  %v4837_v63 = vpop.f32.mrb[28].mxu1 }
 0x1f4   :  { %v4838_v0 = vpop.f32.mrb[29].mxu1 }
 0x1f5   :  { %v4839_v1 = vadd.f32 %v4838_v0, %v4837_v63  ;;  %v4840_v2 = vpop.f32.mrb[30].mxu1  ;;  %v860_v3 = vpack.c.bf16 %v835_v62, %v834_v61 }
 0x1f6   :  { %v4841_v4 = vpop.f32.mrb[31].mxu1 }
 0x1f7   :  { %v752_v5 = vadd.f32 %v4839_v1, %v5526_v45  ;;  %v4842_v6 = vadd.f32 %v4841_v4, %v4840_v2  ;;  %4963 = vmatprep.mubr.bf16.mxu0 %v860_v3 }
 0x1f9   :  { %v755_v7 = vadd.f32 %v4842_v6, %v5526_v45  ;;  %v836_v8 = vmax.f32 %v752_v5, 0.0 }
 0x1fb   :  { %v837_v9 = vmax.f32 %v755_v7, 0.0  ;;  %v4843_v10 = vpop.f32.mrb[32].mxu1 }
 0x1fc   :  { %v4844_v11 = vpop.f32.mrb[33].mxu1 }
 0x1fd   :  { %v4845_v12 = vadd.f32 %v4844_v11, %v4843_v10  ;;  %v4846_v13 = vpop.f32.mrb[34].mxu1  ;;  %v861_v14 = vpack.c.bf16 %v837_v9, %v836_v8 }
 0x1fe   :  { %v4847_v15 = vpop.f32.mrb[35].mxu1 }
 0x1ff   :  { %v760_v16 = vadd.f32 %v4845_v12, %v5526_v45  ;;  %v4848_v17 = vadd.f32 %v4847_v15, %v4846_v13  ;;  %4964 = vmatmul.mubr.bf16.gmra.mrb[76].mxu0 %v861_v14  ;;  %v5084_v14 = vld [vmem:[%s6640_s7 + $0x18] sm:$0xff]  }
 0x200   :  { %4989 = vmatprep.subr.bf16.mxu0 %v5084_v14  ;;  %5026 = vmatprep.subr.bf16.mxu1 %v5084_v14 }
 0x201   :  { %v763_v18 = vadd.f32 %v4848_v17, %v5526_v45  ;;  %v838_v19 = vmax.f32 %v760_v16, 0.0  ;;  %4990 = vmatpush3.bf16.msra.mxu0 %v5084_v14  ;;  %5030 = vmatpush3.bf16.msra.mxu1 %v5084_v14 }
 0x203   :  { %v839_v20 = vmax.f32 %v763_v18, 0.0  ;;  %v4849_v21 = vpop.f32.mrb[36].mxu1 }
 0x204   :  { %v4850_v22 = vpop.f32.mrb[37].mxu1 }
 0x205   :  { %v4851_v23 = vadd.f32 %v4850_v22, %v4849_v21  ;;  %v4852_v24 = vpop.f32.mrb[38].mxu1  ;;  %v862_v25 = vpack.c.bf16 %v839_v20, %v838_v19 }
 0x206   :  { %v4853_v26 = vpop.f32.mrb[39].mxu1 }
 0x207   :  { %v768_v27 = vadd.f32 %v4851_v23, %v5526_v45  ;;  %v4854_v28 = vadd.f32 %v4853_v26, %v4852_v24  ;;  %4967 = vmatprep.mubr.bf16.mxu0 %v862_v25 }
 0x209   :  { %v771_v29 = vadd.f32 %v4854_v28, %v5526_v45  ;;  %v840_v30 = vmax.f32 %v768_v27, 0.0 }
 0x20b   :  { %v841_v31 = vmax.f32 %v771_v29, 0.0  ;;  %v4855_v32 = vpop.f32.mrb[40].mxu1 }
 0x20c   :  { %v4856_v33 = vpop.f32.mrb[41].mxu1 }
 0x20d   :  { %v4857_v34 = vadd.f32 %v4856_v33, %v4855_v32  ;;  %v4858_v35 = vpop.f32.mrb[42].mxu1  ;;  %v863_v36 = vpack.c.bf16 %v841_v31, %v840_v30 }
 0x20e   :  { %v4859_v40 = vpop.f32.mrb[43].mxu1 }
 0x20f   :  { %v776_v44 = vadd.f32 %v4857_v34, %v5526_v45  ;;  %v4860_v46 = vadd.f32 %v4859_v40, %v4858_v35  ;;  %4968 = vmatmul.mubr.bf16.gmra.mrb[80].mxu0 %v863_v36 }
 0x211   :  { %v779_v42 = vadd.f32 %v4860_v46, %v5526_v45  ;;  %v842_v47 = vmax.f32 %v776_v44, 0.0 }
 0x213   :  { %v843_v48 = vmax.f32 %v779_v42, 0.0  ;;  %v4861_v43 = vpop.f32.mrb[44].mxu1 }
 0x214   :  { %v4862_v49 = vpop.f32.mrb[45].mxu1 }
 0x215   :  { %v4863_v50 = vadd.f32 %v4862_v49, %v4861_v43  ;;  %v4864_v51 = vpop.f32.mrb[46].mxu1  ;;  %v864_v52 = vpack.c.bf16 %v843_v48, %v842_v47  ;;  %v5575_v47 = vld [vmem:[%s6641_s6] ss:$0 sm:$0xff] }
 0x216   :  { %v4865_v53 = vpop.f32.mrb[47].mxu1 }
 0x217   :  { %v784_v54 = vadd.f32 %v4863_v50, %v5526_v45  ;;  %v4866_v55 = vadd.f32 %v4865_v53, %v4864_v51  ;;  %4971 = vmatprep.mubr.bf16.mxu0 %v864_v52 }
 0x219   :  { %v787_v56 = vadd.f32 %v4866_v55, %v5526_v45  ;;  %v844_v57 = vmax.f32 %v784_v54, 0.0 }
 0x21b   :  { %v845_v58 = vmax.f32 %v787_v56, 0.0  ;;  %v4867_v59 = vpop.f32.mrb[48].mxu1 }
 0x21c   :  { %v4868_v60 = vpop.f32.mrb[49].mxu1 }
 0x21d   :  { %v4869_v61 = vadd.f32 %v4868_v60, %v4867_v59  ;;  %v4870_v62 = vpop.f32.mrb[50].mxu1  ;;  %v865_v63 = vpack.c.bf16 %v845_v58, %v844_v57 }
 0x21e   :  { %v4871_v0 = vpop.f32.mrb[51].mxu1 }
 0x21f   :  { %v792_v1 = vadd.f32 %v4869_v61, %v5526_v45  ;;  %v4872_v2 = vadd.f32 %v4871_v0, %v4870_v62  ;;  %4972 = vmatmul.mubr.bf16.gmra.mrb[84].mxu0 %v865_v63 }
 0x221   :  { %v795_v3 = vadd.f32 %v4872_v2, %v5526_v45  ;;  %v846_v4 = vmax.f32 %v792_v1, 0.0 }
 0x223   :  { %v847_v5 = vmax.f32 %v795_v3, 0.0  ;;  %v4873_v6 = vpop.f32.mrb[52].mxu1 }
 0x224   :  { %v4874_v7 = vpop.f32.mrb[53].mxu1 }
 0x225   :  { %v4875_v8 = vadd.f32 %v4874_v7, %v4873_v6  ;;  %v4876_v9 = vpop.f32.mrb[54].mxu1  ;;  %v866_v10 = vpack.c.bf16 %v847_v5, %v846_v4 }
 0x226   :  { %v4877_v11 = vpop.f32.mrb[55].mxu1 }
 0x227   :  { %v800_v12 = vadd.f32 %v4875_v8, %v5526_v45  ;;  %v4878_v13 = vadd.f32 %v4877_v11, %v4876_v9  ;;  %4975 = vmatprep.mubr.bf16.mxu0 %v866_v10 }
 0x229   :  { %v803_v15 = vadd.f32 %v4878_v13, %v5526_v45  ;;  %v848_v16 = vmax.f32 %v800_v12, 0.0 }
 0x22b   :  { %v849_v17 = vmax.f32 %v803_v15, 0.0  ;;  %v4879_v18 = vpop.f32.mrb[56].mxu1 }
 0x22c   :  { %v4880_v19 = vpop.f32.mrb[57].mxu1 }
 0x22d   :  { %v4881_v20 = vadd.f32 %v4880_v19, %v4879_v18  ;;  %v4882_v21 = vpop.f32.mrb[58].mxu1  ;;  %v867_v22 = vpack.c.bf16 %v849_v17, %v848_v16 }
 0x22e   :  { %v4883_v23 = vpop.f32.mrb[59].mxu1 }
 0x22f   :  { %v808_v24 = vadd.f32 %v4881_v20, %v5526_v45  ;;  %v4884_v25 = vadd.f32 %v4883_v23, %v4882_v21  ;;  %4976 = vmatmul.mubr.bf16.gmra.mrb[88].mxu0 %v867_v22 }
 0x231   :  { %v811_v26 = vadd.f32 %v4884_v25, %v5526_v45  ;;  %v850_v27 = vmax.f32 %v808_v24, 0.0 }
 0x233   :  { %v851_v28 = vmax.f32 %v811_v26, 0.0  ;;  %v4885_v29 = vpop.f32.mrb[60].mxu1 }
 0x234   :  { %v4886_v30 = vpop.f32.mrb[61].mxu1 }
 0x235   :  { %v4887_v31 = vadd.f32 %v4886_v30, %v4885_v29  ;;  %v4888_v32 = vpop.f32.mrb[62].mxu1  ;;  %v868_v33 = vpack.c.bf16 %v851_v28, %v850_v27 }
 0x236   :  { %v4889_v34 = vpop.f32.mrb[63].mxu1 }
 0x237   :  { %v816_v35 = vadd.f32 %v4887_v31, %v5526_v45  ;;  %v4890_v36 = vadd.f32 %v4889_v34, %v4888_v32  ;;  %4979 = vmatprep.mubr.bf16.mxu0 %v868_v33 }
 0x239   :  { %v819_v40 = vadd.f32 %v4890_v36, %v5526_v45  ;;  %v852_v44 = vmax.f32 %v816_v35, 0.0 }
 0x23b   :  { %v853_v46 = vmax.f32 %v819_v40, 0.0 }
 0x23d   :  { %v869_v42 = vpack.c.bf16 %v853_v46, %v852_v44 }
 0x23f   :  { %4980 = vmatmul.mubr.bf16.gmra.mrb[92].mxu0 %v869_v42 }
 0x2a2   :  { %v4953_v48 = vpop.f32.mrb[64].mxu0 }
 0x2a3   :  { %v984_v43 = vadd.f32 %v4953_v48, %v5575_v47  ;;  %v975_v49 = vpop.f32.mrb[65].mxu0 }
 0x2a4   :  { %v976_v50 = vadd.f32 %v5575_v47, %v975_v49  ;;  %v4954_v51 = vpop.f32.mrb[66].mxu0 }
 0x2a5   :  { %v987_v52 = vadd.f32 %v4954_v51, %v5575_v47  ;;  %v978_v53 = vpop.f32.mrb[67].mxu0  ;;  %v1104_v54 = vmax.f32 %v984_v43, 0.0 }
 0x2a6   :  { %v979_v45 = vadd.f32 %v5575_v47, %v978_v53  ;;  %v1102_v56 = vmax.f32 %v976_v50, 0.0 }
 0x2a7   :  { %v1105_v55 = vmax.f32 %v987_v52, 0.0 }
 0x2a8   :  { %v1103_v57 = vmax.f32 %v979_v45, 0.0 }
 0x2a9   :  { %v1135_v58 = vpack.c.bf16 %v1105_v55, %v1104_v54 }
 0x2aa   :  { %v1134_v59 = vpack.c.bf16 %v1103_v57, %v1102_v56 }
 0x2ac   :  { %4991 = vmatprep.mubr.msk.bf16.mxu0 %vm1189_vm1, %v1134_v59 }
 0x2ad   :  { %4992 = vmatmul.mubr.msk.bf16.vlgmr.msra.gmra.mrb[96].mxu0 %vm1189_vm1, %v1135_v58 }
 0x2b2   :  { %v4957_v60 = vpop.f32.mrb[68].mxu0 }
 0x2b3   :  { %v1000_v61 = vadd.f32 %v4957_v60, %v5575_v47  ;;  %v991_v62 = vpop.f32.mrb[69].mxu0 }
 0x2b4   :  { %v992_v63 = vadd.f32 %v5575_v47, %v991_v62  ;;  %v4958_v0 = vpop.f32.mrb[70].mxu0 }
 0x2b5   :  { %v1003_v1 = vadd.f32 %v4958_v0, %v5575_v47  ;;  %v994_v2 = vpop.f32.mrb[71].mxu0  ;;  %v1108_v4 = vmax.f32 %v1000_v61, 0.0 }
 0x2b6   :  { %v995_v3 = vadd.f32 %v5575_v47, %v994_v2  ;;  %v1106_v6 = vmax.f32 %v992_v63, 0.0 }
 0x2b7   :  { %v1109_v5 = vmax.f32 %v1003_v1, 0.0 }
 0x2b8   :  { %v1107_v7 = vmax.f32 %v995_v3, 0.0 }
 0x2b9   :  { %v1137_v8 = vpack.c.bf16 %v1109_v5, %v1108_v4 }
 0x2ba   :  { %v1136_v9 = vpack.c.bf16 %v1107_v7, %v1106_v6 }
 0x2bc   :  { %4995 = vmatprep.mubr.msk.bf16.mxu1 %vm1189_vm1, %v1136_v9 }
 0x2bd   :  { %4996 = vmatmul.mubr.msk.bf16.vlgmr.msra.gmra.mrb[64].mxu1 %vm1189_vm1, %v1137_v8 }
 0x2c2   :  { %v4961_v10 = vpop.f32.mrb[72].mxu0 }
 0x2c3   :  { %v1016_v11 = vadd.f32 %v4961_v10, %v5575_v47  ;;  %v1007_v12 = vpop.f32.mrb[73].mxu0 }
 0x2c4   :  { %v1008_v13 = vadd.f32 %v5575_v47, %v1007_v12  ;;  %v4962_v14 = vpop.f32.mrb[74].mxu0 }
 0x2c5   :  { %v1019_v15 = vadd.f32 %v4962_v14, %v5575_v47  ;;  %v1010_v16 = vpop.f32.mrb[75].mxu0  ;;  %v1112_v18 = vmax.f32 %v1016_v11, 0.0 }
 0x2c6   :  { %v1011_v17 = vadd.f32 %v5575_v47, %v1010_v16  ;;  %v1110_v20 = vmax.f32 %v1008_v13, 0.0 }
 0x2c7   :  { %v1113_v19 = vmax.f32 %v1019_v15, 0.0 }
 0x2c8   :  { %v1111_v21 = vmax.f32 %v1011_v17, 0.0 }
 0x2c9   :  { %v1139_v22 = vpack.c.bf16 %v1113_v19, %v1112_v18 }
 0x2ca   :  { %v1138_v23 = vpack.c.bf16 %v1111_v21, %v1110_v20 }
 0x2cc   :  { %4999 = vmatprep.mubr.msk.bf16.mxu1 %vm1189_vm1, %v1138_v23 }
 0x2cd   :  { %5000 = vmatmul.mubr.msk.bf16.gmra.mrb[68].mxu1 %vm1189_vm1, %v1139_v22 }
 0x2d2   :  { %v4965_v24 = vpop.f32.mrb[76].mxu0 }
 0x2d3   :  { %v1032_v25 = vadd.f32 %v4965_v24, %v5575_v47  ;;  %v1023_v26 = vpop.f32.mrb[77].mxu0 }
 0x2d4   :  { %v1024_v27 = vadd.f32 %v5575_v47, %v1023_v26  ;;  %v4966_v28 = vpop.f32.mrb[78].mxu0 }
 0x2d5   :  { %v1035_v29 = vadd.f32 %v4966_v28, %v5575_v47  ;;  %v1026_v30 = vpop.f32.mrb[79].mxu0  ;;  %v1116_v32 = vmax.f32 %v1032_v25, 0.0 }
 0x2d6   :  { %v1027_v31 = vadd.f32 %v5575_v47, %v1026_v30  ;;  %v1114_v34 = vmax.f32 %v1024_v27, 0.0 }
 0x2d7   :  { %v1117_v33 = vmax.f32 %v1035_v29, 0.0 }
 0x2d8   :  { %v1115_v35 = vmax.f32 %v1027_v31, 0.0 }
 0x2d9   :  { %v1141_v36 = vpack.c.bf16 %v1117_v33, %v1116_v32 }
 0x2da   :  { %v1140_v40 = vpack.c.bf16 %v1115_v35, %v1114_v34  ;;  %v5628_v35 = vld [vmem:[%s6642_s8] ss:$0 sm:$0xff] }
 0x2dc   :  { %5003 = vmatprep.mubr.msk.bf16.mxu1 %vm1189_vm1, %v1140_v40 }
 0x2dd   :  { %5004 = vmatmul.mubr.msk.bf16.gmra.mrb[72].mxu1 %vm1189_vm1, %v1141_v36 }
 0x2e2   :  { %v4969_v44 = vpop.f32.mrb[80].mxu0 }
 0x2e3   :  { %v1048_v46 = vadd.f32 %v4969_v44, %v5575_v47  ;;  %v1039_v42 = vpop.f32.mrb[81].mxu0 }
 0x2e4   :  { %v1040_v48 = vadd.f32 %v5575_v47, %v1039_v42  ;;  %v4970_v43 = vpop.f32.mrb[82].mxu0  ;;  %v5635_v42 = vld [vmem:[%s6643_s9] ss:$0 sm:$0xff] }
 0x2e5   :  { %v1051_v49 = vadd.f32 %v4970_v43, %v5575_v47  ;;  %v1042_v50 = vpop.f32.mrb[83].mxu0  ;;  %v1120_v52 = vmax.f32 %v1048_v46, 0.0 }
 0x2e6   :  { %v1043_v51 = vadd.f32 %v5575_v47, %v1042_v50  ;;  %v1118_v45 = vmax.f32 %v1040_v48, 0.0 }
 0x2e7   :  { %v1121_v53 = vmax.f32 %v1051_v49, 0.0 }
 0x2e8   :  { %v1119_v54 = vmax.f32 %v1043_v51, 0.0 }
 0x2e9   :  { %v1143_v55 = vpack.c.bf16 %v1121_v53, %v1120_v52 }
 0x2ea   :  { %v1142_v56 = vpack.c.bf16 %v1119_v54, %v1118_v45 }
 0x2ec   :  { %5007 = vmatprep.mubr.msk.bf16.mxu1 %vm1189_vm1, %v1142_v56 }
 0x2ed   :  { %5008 = vmatmul.mubr.msk.bf16.gmra.mrb[76].mxu1 %vm1189_vm1, %v1143_v55 }
 0x2f2   :  { %v4973_v57 = vpop.f32.mrb[84].mxu0 }
 0x2f3   :  { %v1064_v58 = vadd.f32 %v4973_v57, %v5575_v47  ;;  %v1055_v59 = vpop.f32.mrb[85].mxu0 }
 0x2f4   :  { %v1056_v60 = vadd.f32 %v5575_v47, %v1055_v59  ;;  %v4974_v61 = vpop.f32.mrb[86].mxu0 }
 0x2f5   :  { %v1067_v62 = vadd.f32 %v4974_v61, %v5575_v47  ;;  %v1058_v63 = vpop.f32.mrb[87].mxu0  ;;  %v1124_v1 = vmax.f32 %v1064_v58, 0.0 }
 0x2f6   :  { %v1059_v0 = vadd.f32 %v5575_v47, %v1058_v63  ;;  %v1122_v3 = vmax.f32 %v1056_v60, 0.0 }
 0x2f7   :  { %v1125_v2 = vmax.f32 %v1067_v62, 0.0 }
 0x2f8   :  { %v1123_v4 = vmax.f32 %v1059_v0, 0.0 }
 0x2f9   :  { %v1145_v5 = vpack.c.bf16 %v1125_v2, %v1124_v1 }
 0x2fa   :  { %v1144_v6 = vpack.c.bf16 %v1123_v4, %v1122_v3 }
 0x2fc   :  { %5011 = vmatprep.mubr.msk.bf16.mxu1 %vm1189_vm1, %v1144_v6 }
 0x2fd   :  { %5012 = vmatmul.mubr.msk.bf16.gmra.mrb[80].mxu1 %vm1189_vm1, %v1145_v5 }
 0x302   :  { %v4977_v7 = vpop.f32.mrb[88].mxu0 }
 0x303   :  { %v1080_v8 = vadd.f32 %v4977_v7, %v5575_v47  ;;  %v1071_v9 = vpop.f32.mrb[89].mxu0 }
 0x304   :  { %v1072_v10 = vadd.f32 %v5575_v47, %v1071_v9  ;;  %v4978_v11 = vpop.f32.mrb[90].mxu0 }
 0x305   :  { %v1083_v12 = vadd.f32 %v4978_v11, %v5575_v47  ;;  %v1074_v13 = vpop.f32.mrb[91].mxu0  ;;  %v1128_v15 = vmax.f32 %v1080_v8, 0.0 }
 0x306   :  { %v1075_v14 = vadd.f32 %v5575_v47, %v1074_v13  ;;  %v1126_v17 = vmax.f32 %v1072_v10, 0.0 }
 0x307   :  { %v1129_v16 = vmax.f32 %v1083_v12, 0.0 }
 0x308   :  { %v1127_v18 = vmax.f32 %v1075_v14, 0.0 }
 0x309   :  { %v1147_v19 = vpack.c.bf16 %v1129_v16, %v1128_v15 }
 0x30a   :  { %v1146_v20 = vpack.c.bf16 %v1127_v18, %v1126_v17 }
 0x30c   :  { %5015 = vmatprep.mubr.msk.bf16.mxu1 %vm1189_vm1, %v1146_v20 }
 0x30d   :  { %5016 = vmatmul.mubr.msk.bf16.gmra.mrb[84].mxu1 %vm1189_vm1, %v1147_v19 }
 0x312   :  { %v4981_v21 = vpop.f32.mrb[92].mxu0 }
 0x313   :  { %v1096_v22 = vadd.f32 %v4981_v21, %v5575_v47  ;;  %v1087_v23 = vpop.f32.mrb[93].mxu0 }
 0x314   :  { %v1088_v24 = vadd.f32 %v5575_v47, %v1087_v23  ;;  %v4982_v25 = vpop.f32.mrb[94].mxu0 }
 0x315   :  { %v1099_v26 = vadd.f32 %v4982_v25, %v5575_v47  ;;  %v1090_v27 = vpop.f32.mrb[95].mxu0  ;;  %v1132_v29 = vmax.f32 %v1096_v22, 0.0 }
 0x316   :  { %v1091_v28 = vadd.f32 %v5575_v47, %v1090_v27  ;;  %v1130_v31 = vmax.f32 %v1088_v24, 0.0 }
 0x317   :  { %v1133_v30 = vmax.f32 %v1099_v26, 0.0 }
 0x318   :  { %v1131_v32 = vmax.f32 %v1091_v28, 0.0 }
 0x319   :  { %v1149_v33 = vpack.c.bf16 %v1133_v30, %v1132_v29 }
 0x31a   :  { %v1148_v34 = vpack.c.bf16 %v1131_v32, %v1130_v31 }
 0x31c   :  { %5019 = vmatprep.mubr.msk.bf16.mxu1 %vm1189_vm1, %v1148_v34 }
 0x31d   :  { %5020 = vmatmul.mubr.msk.bf16.gmra.mrb[88].mxu1 %vm1189_vm1, %v1149_v33  ;;  %vm4688_vm1 = vcmp.lt.s32.totalorder %v78_v37, 256 }
 0x380   :  { %v4993_v36 = vpop.f32.mrb[96].mxu0 }
 0x381   :  { %v1281_v40 = vadd.f32 %v4993_v36, %v5628_v35  ;;  %v1272_v44 = vpop.f32.mrb[97].mxu0 }
 0x382   :  { %v1273_v47 = vadd.f32 %v5628_v35, %v1272_v44  ;;  %v4994_v46 = vpop.f32.mrb[98].mxu0 }
 0x383   :  { %v1401_v48 = vmax.f32 %v1281_v40, 0.0  ;;  %v1284_v43 = vadd.f32 %v4994_v46, %v5628_v35  ;;  %v1275_v49 = vpop.f32.mrb[99].mxu0 }
 0x384   :  { %v1399_v50 = vmax.f32 %v1273_v47, 0.0  ;;  %v1276_v51 = vadd.f32 %v5628_v35, %v1275_v49 }
 0x385   :  { %v1402_v52 = vmax.f32 %v1284_v43, 0.0  ;;  %v1440_v53 = vmul.f32 %v5635_v42, %v1401_v48 }
 0x386   :  { %v1400_v45 = vmax.f32 %v1276_v51, 0.0  ;;  %v1438_v54 = vmul.f32 %v5635_v42, %v1399_v50 }
 0x387   :  { %v1476_v55 = vsel %vm188_vm0, %v1440_v53, 0.0  ;;  %v1441_v56 = vmul.f32 %v5635_v42, %v1402_v52 }
 0x388   :  { %1477 = vadd.xlane.f32.xlu1 %v1476_v55  ;;  %v1470_v57 = vsel %vm188_vm0, %v1438_v54, 0.0  ;;  %v1439_v58 = vmul.f32 %v5635_v42, %v1400_v45 }
 0x389   :  { %1471 = vadd.xlane.f32.xlu0 %v1470_v57  ;;  %v1479_v59 = vsel %vm188_vm0, %v1441_v56, 0.0 }
 0x38a   :  { %v1473_v60 = vsel %vm188_vm0, %v1439_v58, 0.0 }
 0x38c   :  { %1480 = vadd.xlane.f32.xlu1 %v1479_v59 }
 0x38d   :  { %1474 = vadd.xlane.f32.xlu0 %v1473_v60 }
 0x390   :  { %v4997_v61 = vpop.f32.mrb[64].mxu1 }
 0x391   :  { %v1297_v62 = vadd.f32 %v4997_v61, %v5628_v35  ;;  %v1288_v63 = vpop.f32.mrb[65].mxu1 }
 0x392   :  { %v1289_v0 = vadd.f32 %v5628_v35, %v1288_v63  ;;  %v4998_v1 = vpop.f32.mrb[66].mxu1 }
 0x393   :  { %v1405_v2 = vmax.f32 %v1297_v62, 0.0  ;;  %v1300_v3 = vadd.f32 %v4998_v1, %v5628_v35  ;;  %v1291_v4 = vpop.f32.mrb[67].mxu1 }
 0x394   :  { %v1403_v5 = vmax.f32 %v1289_v0, 0.0  ;;  %v1292_v8 = vadd.f32 %v5628_v35, %v1291_v4 }
 0x395   :  { %v1444_v6 = vmul.f32 %v5635_v42, %v1405_v2  ;;  %v1406_v7 = vmax.f32 %v1300_v3, 0.0 }
 0x396   :  { %v1442_v10 = vmul.f32 %v5635_v42, %v1403_v5  ;;  %v1404_v11 = vmax.f32 %v1292_v8, 0.0 }
 0x397   :  { %v1488_v9 = vsel %vm188_vm0, %v1444_v6, 0.0  ;;  %v1445_v13 = vmul.f32 %v5635_v42, %v1406_v7 }
 0x398   :  { %1489 = vadd.xlane.f32.xlu0 %v1488_v9  ;;  %v1482_v12 = vsel %vm188_vm0, %v1442_v10, 0.0  ;;  %v1443_v15 = vmul.f32 %v5635_v42, %v1404_v11 }
 0x399   :  { %v1491_v14 = vsel %vm188_vm0, %v1445_v13, 0.0 }
 0x39a   :  { %v1485_v24 = vsel %vm188_vm0, %v1443_v15, 0.0 }
 0x39c   :  { %1483 = vadd.xlane.f32.xlu0 %v1482_v12 }
 0x3a0   :  { %v5001_v16 = vpop.f32.mrb[68].mxu1  ;;  %1492 = vadd.xlane.f32.xlu0 %v1491_v14 }
 0x3a1   :  { %v1313_v17 = vadd.f32 %v5001_v16, %v5628_v35  ;;  %v1304_v18 = vpop.f32.mrb[69].mxu1 }
 0x3a2   :  { %v1305_v19 = vadd.f32 %v5628_v35, %v1304_v18  ;;  %v5002_v20 = vpop.f32.mrb[70].mxu1 }
 0x3a3   :  { %v1409_v21 = vmax.f32 %v1313_v17, 0.0  ;;  %v1316_v22 = vadd.f32 %v5002_v20, %v5628_v35  ;;  %v1307_v23 = vpop.f32.mrb[71].mxu1 }
 0x3a4   :  { %v1407_v25 = vmax.f32 %v1305_v19, 0.0  ;;  %1486 = vadd.xlane.f32.xlu0 %v1485_v24  ;;  %v1308_v28 = vadd.f32 %v5628_v35, %v1307_v23 }
 0x3a5   :  { %v1448_v26 = vmul.f32 %v5635_v42, %v1409_v21  ;;  %v1410_v27 = vmax.f32 %v1316_v22, 0.0 }
 0x3a6   :  { %v1446_v30 = vmul.f32 %v5635_v42, %v1407_v25  ;;  %v1408_v31 = vmax.f32 %v1308_v28, 0.0 }
 0x3a7   :  { %v1500_v29 = vsel %vm188_vm0, %v1448_v26, 0.0  ;;  %v1449_v33 = vmul.f32 %v5635_v42, %v1410_v27 }
 0x3a8   :  { %1501 = vadd.xlane.f32.xlu0 %v1500_v29  ;;  %v1494_v32 = vsel %vm188_vm0, %v1446_v30, 0.0  ;;  %v1447_v36 = vmul.f32 %v5635_v42, %v1408_v31 }
 0x3a9   :  { %v1503_v34 = vsel %vm188_vm0, %v1449_v33, 0.0 }
 0x3aa   :  { %v1497_v48 = vsel %vm188_vm0, %v1447_v36, 0.0 }
 0x3ac   :  { %1495 = vadd.xlane.f32.xlu0 %v1494_v32 }
 0x3b0   :  { %v5005_v40 = vpop.f32.mrb[72].mxu1  ;;  %1504 = vadd.xlane.f32.xlu0 %v1503_v34 }
 0x3b1   :  { %v1320_v44 = vpop.f32.mrb[73].mxu1  ;;  %v1329_v4 = vadd.f32 %v5005_v40, %v5628_v35 }
 0x3b2   :  { %v5006_v47 = vpop.f32.mrb[74].mxu1  ;;  %v1321_v51 = vadd.f32 %v5628_v35, %v1320_v44 }
 0x3b3   :  { %v1323_v46 = vpop.f32.mrb[75].mxu1  ;;  %v1413_v9 = vmax.f32 %v1329_v4, 0.0  ;;  %v1332_v10 = vadd.f32 %v5006_v47, %v5628_v35 }
 0x3b4   :  { %1498 = vadd.xlane.f32.xlu0 %v1497_v48  ;;  %v1411_v60 = vmax.f32 %v1321_v51, 0.0  ;;  %v1324_v62 = vadd.f32 %v5628_v35, %v1323_v46 }
 0x3b5   :  { %v1414_v16 = vmax.f32 %v1332_v10, 0.0  ;;  %v1452_v19 = vmul.f32 %v5635_v42, %v1413_v9 }
 0x3b6   :  { %v1412_v5 = vmax.f32 %v1324_v62, 0.0  ;;  %v1450_v7 = vmul.f32 %v5635_v42, %v1411_v60 }
 0x3b7   :  { %v1512_v26 = vsel %vm188_vm0, %v1452_v19, 0.0  ;;  %v1453_v27 = vmul.f32 %v5635_v42, %v1414_v16 }
 0x3b8   :  { %v1506_v11 = vsel %vm188_vm0, %v1450_v7, 0.0  ;;  %v1451_v12 = vmul.f32 %v5635_v42, %v1412_v5 }
 0x3b9   :  { %v1515_v34 = vsel %vm188_vm0, %v1453_v27, 0.0 }
 0x3ba   :  { %v1509_v23 = vsel %vm188_vm0, %v1451_v12, 0.0 }
 0x3c0   :  { %v5009_v43 = vpop.f32.mrb[76].mxu1 }
 0x3c1   :  { %v1345_v49 = vadd.f32 %v5009_v43, %v5628_v35  ;;  %v1336_v50 = vpop.f32.mrb[77].mxu1 }
 0x3c2   :  { %v1337_v52 = vadd.f32 %v5628_v35, %v1336_v50  ;;  %v5010_v53 = vpop.f32.mrb[78].mxu1 }
 0x3c3   :  { %v1417_v45 = vmax.f32 %v1345_v49, 0.0  ;;  %v1348_v54 = vadd.f32 %v5010_v53, %v5628_v35  ;;  %v1339_v55 = vpop.f32.mrb[79].mxu1 }
 0x3c4   :  { %v1415_v56 = vmax.f32 %v1337_v52, 0.0  ;;  %v1340_v57 = vadd.f32 %v5628_v35, %v1339_v55 }
 0x3c5   :  { %v1418_v58 = vmax.f32 %v1348_v54, 0.0  ;;  %v1456_v59 = vmul.f32 %v5635_v42, %v1417_v45 }
 0x3c6   :  { %v1416_v61 = vmax.f32 %v1340_v57, 0.0  ;;  %v1454_v1 = vmul.f32 %v5635_v42, %v1415_v56 }
 0x3c7   :  { %v1524_v63 = vsel %vm188_vm0, %v1456_v59, 0.0  ;;  %v1457_v0 = vmul.f32 %v5635_v42, %v1418_v58 }
 0x3c8   :  { %1525 = vadd.xlane.f32.xlu0 %v1524_v63  ;;  %v1455_v3 = vmul.f32 %v5635_v42, %v1416_v61  ;;  %v1518_v6 = vsel %vm188_vm0, %v1454_v1, 0.0 }
 0x3c9   :  { %v1527_v2 = vsel %vm188_vm0, %v1457_v0, 0.0 }
 0x3ca   :  { %1528 = vadd.xlane.f32.xlu1 %v1527_v2  ;;  %v1521_v8 = vsel %vm188_vm0, %v1455_v3, 0.0 }
 0x3cc   :  { %1519 = vadd.xlane.f32.xlu0 %v1518_v6 }
 0x3ce   :  { %1522 = vadd.xlane.f32.xlu1 %v1521_v8 }
 0x3d0   :  { %v5013_v13 = vpop.f32.mrb[80].mxu1  ;;  %1507 = vadd.xlane.f32.xlu0 %v1506_v11 }
 0x3d1   :  { %v1361_v14 = vadd.f32 %v5013_v13, %v5628_v35  ;;  %v1352_v15 = vpop.f32.mrb[81].mxu1 }
 0x3d2   :  { %v1353_v17 = vadd.f32 %v5628_v35, %v1352_v15  ;;  %v5014_v18 = vpop.f32.mrb[82].mxu1 }
 0x3d3   :  { %v1421_v20 = vmax.f32 %v1361_v14, 0.0  ;;  %v1364_v21 = vadd.f32 %v5014_v18, %v5628_v35  ;;  %v1355_v22 = vpop.f32.mrb[83].mxu1 }
 0x3d4   :  { %v1419_v24 = vmax.f32 %v1353_v17, 0.0  ;;  %1510 = vadd.xlane.f32.xlu0 %v1509_v23  ;;  %v1356_v29 = vadd.f32 %v5628_v35, %v1355_v22 }
 0x3d5   :  { %v1460_v25 = vmul.f32 %v5635_v42, %v1421_v20  ;;  %v1422_v28 = vmax.f32 %v1364_v21, 0.0 }
 0x3d6   :  { %v1458_v31 = vmul.f32 %v5635_v42, %v1419_v24  ;;  %v1420_v32 = vmax.f32 %v1356_v29, 0.0 }
 0x3d7   :  { %v1536_v30 = vsel %vm188_vm0, %v1460_v25, 0.0  ;;  %v1461_v36 = vmul.f32 %v5635_v42, %v1422_v28 }
 0x3d8   :  { %1537 = vadd.xlane.f32.xlu1 %v1536_v30  ;;  %1513 = vadd.xlane.f32.xlu0 %v1512_v26  ;;  %v1530_v33 = vsel %vm188_vm0, %v1458_v31, 0.0  ;;  %v1459_v44 = vmul.f32 %v5635_v42, %v1420_v32 }
 0x3d9   :  { %v1539_v40 = vsel %vm188_vm0, %v1461_v36, 0.0 }
 0x3da   :  { %v1533_v53 = vsel %vm188_vm0, %v1459_v44, 0.0 }
 0x3dc   :  { %1531 = vadd.xlane.f32.xlu1 %v1530_v33  ;;  %1516 = vadd.xlane.f32.xlu0 %v1515_v34 }
 0x3e0   :  { %v5017_v47 = vpop.f32.mrb[84].mxu1  ;;  %1540 = vadd.xlane.f32.xlu1 %v1539_v40 }
 0x3e1   :  { %v1377_v46 = vadd.f32 %v5017_v47, %v5628_v35  ;;  %v1368_v48 = vpop.f32.mrb[85].mxu1 }
 0x3e2   :  { %v1369_v43 = vadd.f32 %v5628_v35, %v1368_v48  ;;  %v5018_v49 = vpop.f32.mrb[86].mxu1 }
 0x3e3   :  { %v1425_v50 = vmax.f32 %v1377_v46, 0.0  ;;  %v1380_v51 = vadd.f32 %v5018_v49, %v5628_v35  ;;  %v1371_v52 = vpop.f32.mrb[87].mxu1 }
 0x3e4   :  { %v1423_v45 = vmax.f32 %v1369_v43, 0.0  ;;  %1534 = vadd.xlane.f32.xlu1 %v1533_v53  ;;  %v1372_v56 = vadd.f32 %v5628_v35, %v1371_v52 }
 0x3e5   :  { %v1464_v54 = vmul.f32 %v5635_v42, %v1425_v50  ;;  %v1426_v55 = vmax.f32 %v1380_v51, 0.0 }
 0x3e6   :  { %v1462_v58 = vmul.f32 %v5635_v42, %v1423_v45  ;;  %v1424_v59 = vmax.f32 %v1372_v56, 0.0  ;;  %v5214_v45 = vmov 1966171168  }
 0x3e7   :  { %v1548_v57 = vsel %vm188_vm0, %v1464_v54, 0.0  ;;  %v1465_v61 = vmul.f32 %v5635_v42, %v1426_v55  ;;  %v2821_v54 = vunpack.c.l.s4 %v5214_v45 }
 0x3e8   :  { %1549 = vadd.xlane.f32.xlu1 %v1548_v57  ;;  %v1542_v60 = vsel %vm188_vm0, %v1462_v58, 0.0  ;;  %v1463_v63 = vmul.f32 %v5635_v42, %v1424_v59 }
 0x3e9   :  { %v1551_v62 = vsel %vm188_vm0, %v1465_v61, 0.0 }
 0x3ea   :  { %v1545_v7 = vsel %vm188_vm0, %v1463_v63, 0.0 }
 0x3ec   :  { %1543 = vadd.xlane.f32.xlu1 %v1542_v60 }
 0x3f0   :  { %v5021_v0 = vpop.f32.mrb[88].mxu1  ;;  %1552 = vadd.xlane.f32.xlu1 %v1551_v62  ;;  %v2822_v62 = vunpack.c.0.s8 %v2821_v54 }
 0x3f1   :  { %v1393_v1 = vadd.f32 %v5021_v0, %v5628_v35  ;;  %v1384_v2 = vpop.f32.mrb[89].mxu1  ;;  %v5744_v0 = vsub.s32 2, %v5418_v38 }
 0x3f2   :  { %v1385_v3 = vadd.f32 %v5628_v35, %v1384_v2  ;;  %v5022_v4 = vpop.f32.mrb[90].mxu1  ;;  %v5747_v2 = vsub.s32 3, %v5418_v38 }
 0x3f3   :  { %v1429_v5 = vmax.f32 %v1393_v1, 0.0  ;;  %v1387_v6 = vpop.f32.mrb[91].mxu1  ;;  %v1396_v11 = vadd.f32 %v5022_v4, %v5628_v35  ;;  %v5753_v4 = vsub.s32 5, %v5418_v38 }
 0x3f4   :  { %v1427_v8 = vmax.f32 %v1385_v3, 0.0  ;;  %v1388_v9 = vadd.f32 %v5628_v35, %v1387_v6  ;;  %1546 = vadd.xlane.f32.xlu1 %v1545_v7  ;;  %v5734_v35 = vstv %s6644_s10  ;;  %v5750_v3 = vsub.s32 4, %v5418_v38 }
 0x3f5   :  { %v1468_v10 = vmul.f32 %v5635_v42, %v1429_v5  ;;  %v1430_v15 = vmax.f32 %v1396_v11, 0.0  ;;  %v5756_v5 = vsub.s32 6, %v5418_v38 }
 0x3f6   :  { %v1428_v12 = vmax.f32 %v1388_v9, 0.0  ;;  %v1466_v14 = vmul.f32 %v5635_v42, %v1427_v8  ;;  %v5760_v8 = vsub.s32 7, %v5418_v38 }
 0x3f7   :  { %v1560_v13 = vsel %vm188_vm0, %v1468_v10, 0.0  ;;  %v1469_v19 = vmul.f32 %v5635_v42, %v1430_v15  ;;  %v5763_v10 = vsub.s32 %v2822_v62, %v5418_v38 }
 0x3f8   :  { %1561 = vadd.xlane.f32.xlu1 %v1560_v13  ;;  %v1554_v16 = vsel %vm188_vm0, %v1466_v14, 0.0  ;;  %v1467_v17 = vmul.f32 %v5635_v42, %v1428_v12 }
 0x3f9   :  { %v1563_v20 = vsel %vm188_vm0, %v1469_v19, 0.0 }
 0x3fa   :  { %v1557_v18 = vsel %vm188_vm0, %v1467_v17, 0.0  ;;  %vm4589_vm0 = vcmask 1048512  }
 0x3fc   :  { %1555 = vadd.xlane.f32.xlu1 %v1554_v16 }
 0x400   :  { %1558 = vadd.xlane.f32.xlu1 %v1557_v18 }
 0x404   :  { %1564 = vadd.xlane.f32.xlu1 %v1563_v20 }
 0x415   :  { %v1478_v21 = vpop.xlane.xlu1 %1477 }
 0x416   :  { %v1570_v22 = vadd.f32 %v5734_v35, %v1478_v21  ;;  %v1472_v23 = vpop.xlane.xlu0 %1471 }
 0x417   :  { %v1568_v24 = vadd.f32 %v5734_v35, %v1472_v23 }
 0x418   :  { %v1602_v25 = vsub.f32 0.0, %v1570_v22 }
 0x419   :  { %v1600_v26 = vsub.f32 0.0, %v1568_v24  ;;  %v1481_v27 = vpop.xlane.xlu1 %1480 }
 0x41a   :  { %v1636_v28 = vmul.f32 1.442695, %v1602_v25  ;;  %v1571_v42 = vadd.f32 %v5734_v35, %v1481_v27  ;;  %v1475_v29 = vpop.xlane.xlu0 %1474 }
 0x41b   :  { %v1632_v30 = vmul.f32 1.442695, %v1600_v26  ;;  %v1569_v31 = vadd.f32 %v5734_v35, %v1475_v29 }
 0x41c   :  { %5085 = vpow2.f32 %v1636_v28  ;;  %v1603_v32 = vsub.f32 0.0, %v1571_v42 }
 0x41d   :  { %5087 = vpow2.f32 %v1632_v30  ;;  %v1601_v33 = vsub.f32 0.0, %v1569_v31 }
 0x41e   :  { %v1638_v34 = vmul.f32 1.442695, %v1603_v32 }
 0x41f   :  { %v1634_v36 = vmul.f32 1.442695, %v1601_v33 }
 0x420   :  { %5089 = vpow2.f32 %v1638_v34 }
 0x421   :  { %5091 = vpow2.f32 %v1634_v36 }
 0x425   :  { %v1490_v40 = vpop.xlane.xlu0 %1489 }
 0x426   :  { %v5086_v44 = vpop.eup %5085  ;;  %v1574_v47 = vadd.f32 %v5734_v35, %v1490_v40 }
 0x427   :  { %v5088_v46 = vpop.eup %5087  ;;  %v1698_v48 = vadd.f32 1.0, %v5086_v44 }
 0x428   :  { %v1696_v43 = vadd.f32 1.0, %v5088_v46  ;;  %v1606_v49 = vsub.f32 0.0, %v1574_v47 }
 0x429   :  { %5093 = vrcp.f32 %v1698_v48  ;;  %v1484_v50 = vpop.xlane.xlu0 %1483 }
 0x42a   :  { %v1644_v51 = vmul.f32 1.442695, %v1606_v49  ;;  %v1572_v52 = vadd.f32 %v5734_v35, %v1484_v50  ;;  %v5090_v53 = vpop.eup %5089  ;;  %5095 = vrcp.f32 %v1696_v43 }
 0x42b   :  { %v5092_v55 = vpop.eup %5091  ;;  %v1699_v58 = vadd.f32 1.0, %v5090_v53 }
 0x42c   :  { %5097 = vpow2.f32 %v1644_v51  ;;  %v1604_v56 = vsub.f32 0.0, %v1572_v52  ;;  %v1697_v61 = vadd.f32 1.0, %v5092_v55 }
 0x42d   :  { %v1493_v57 = vpop.xlane.xlu0 %1492 }
 0x42e   :  { %v1640_v59 = vmul.f32 1.442695, %v1604_v56  ;;  %v1575_v60 = vadd.f32 %v5734_v35, %v1493_v57 }
 0x430   :  { %5099 = vpow2.f32 %v1640_v59  ;;  %v1607_v63 = vsub.f32 0.0, %v1575_v60 }
 0x431   :  { %v1487_v1 = vpop.xlane.xlu0 %1486  ;;  %5101 = vrcp.f32 %v1699_v58 }
 0x432   :  { %v1646_v6 = vmul.f32 1.442695, %v1607_v63  ;;  %v1573_v7 = vadd.f32 %v5734_v35, %v1487_v1  ;;  %5103 = vrcp.f32 %v1697_v61 }
 0x433   :  { %v5094_v9 = vpop.eup %5093 }
 0x434   :  { %5105 = vpow2.f32 %v1646_v6  ;;  %v1605_v11 = vsub.f32 0.0, %v1573_v7  ;;  %v1859_v12 = vrot.slane %v5094_v9, %v5421_v39  ;;  %v1863_v13 = vrot.slane %v5094_v9, %v5427_v41  ;;  %v5096_v14 = vpop.eup %5095 }
 0x435   :  { %v1502_v15 = vpop.xlane.xlu0 %1501  ;;  %v1867_v16 = vrot.slane %v5094_v9, %v5744_v0  ;;  %v1871_v17 = vrot.slane %v5094_v9, %v5747_v2  ;;  %v1875_v18 = vrot.slane %v5094_v9, %v5750_v3  ;;  %v1879_v19 = vrot.slane %v5094_v9, %v5753_v4 }
 0x436   :  { %v5098_v20 = vpop.eup %5097  ;;  %v1642_v21 = vmul.f32 1.442695, %v1605_v11  ;;  %v1578_v22 = vadd.f32 %v5734_v35, %v1502_v15  ;;  %v1883_v23 = vrot.slane %v5094_v9, %v5756_v5  ;;  %v1887_v24 = vrot.slane %v5094_v9, %v5760_v8 }
 0x437   :  { %v1702_v25 = vadd.f32 1.0, %v5098_v20  ;;  %v2914_v26 = vcombine.low %v1859_v12, %v1863_v13  ;;  %v2915_v27 = vcombine.low %v1867_v16, %v1871_v17  ;;  %v2916_v28 = vcombine.low %v1875_v18, %v1879_v19 }
 0x438   :  { %5107 = vpow2.f32 %v1642_v21  ;;  %v1610_v42 = vsub.f32 0.0, %v1578_v22  ;;  %v2917_v29 = vcombine.low %v1883_v23, %v1887_v24  ;;  %v1795_v30 = vrot.slane %v5096_v14, %v5421_v39 }
 0x439   :  { %5109 = vrcp.f32 %v1702_v25  ;;  %v1496_v31 = vpop.xlane.xlu0 %1495  ;;  %v2924_v32 = vrot.slane %v2914_v26, %v5763_v10  ;;  %v2931_v33 = vrot.slane %v2915_v27, %v5763_v10  ;;  %v2938_v34 = vrot.slane %v2916_v28, %v5763_v10 }
 0x43a   :  { %v5100_v36 = vpop.eup %5099  ;;  %v1652_v40 = vmul.f32 1.442695, %v1610_v42  ;;  %v1576_v44 = vadd.f32 %v5734_v35, %v1496_v31  ;;  %v2945_v47 = vrot.slane %v2917_v29, %v5763_v10  ;;  %v1799_v46 = vrot.slane %v5096_v14, %v5427_v41 }
 0x43b   :  { %v1700_v48 = vadd.f32 1.0, %v5100_v36  ;;  %v2946_v43 = vcombine.low %v2924_v32, %v2931_v33  ;;  %v1803_v49 = vrot.slane %v5096_v14, %v5744_v0  ;;  %v1807_v50 = vrot.slane %v5096_v14, %v5747_v2  ;;  %v5102_v51 = vpop.eup %5101 }
 0x43c   :  { %5111 = vpow2.f32 %v1652_v40  ;;  %v1608_v52 = vsub.f32 0.0, %v1576_v44  ;;  %v2947_v53 = vcombine.low %v2938_v34, %v2945_v47  ;;  %v1811_v45 = vrot.slane %v5096_v14, %v5750_v3  ;;  %v5784_v54 = vpop.eup %5103 }
 0x43d   :  { %5113 = vrcp.f32 %v1700_v48  ;;  %v1505_v55 = vpop.xlane.xlu0 %1504  ;;  %v2954_v56 = vrot.slane %v2946_v43, %v5763_v10  ;;  %v1815_v57 = vrot.slane %v5096_v14, %v5753_v4  ;;  %v1819_v58 = vrot.slane %v5096_v14, %v5756_v5 }
 0x43e   :  { %v5106_v59 = vpop.eup %5105  ;;  %v1648_v60 = vmul.f32 1.442695, %v1608_v52  ;;  %v1579_v61 = vadd.f32 %v5734_v35, %v1505_v55  ;;  %v2961_v62 = vrot.slane %v2947_v53, %v5763_v10  ;;  %v1823_v63 = vrot.slane %v5096_v14, %v5760_v8 }
 0x43f   :  { %v1703_v1 = vadd.f32 1.0, %v5106_v59  ;;  %v2816_v6 = vcombine.low %v1795_v30, %v1799_v46  ;;  %v2817_v7 = vcombine.low %v1803_v49, %v1807_v50  ;;  %v2818_v9 = vcombine.low %v1811_v45, %v1815_v57 }
 0x440   :  { %5115 = vpow2.f32 %v1648_v60  ;;  %v1611_v11 = vsub.f32 0.0, %v1579_v61  ;;  %v2962_v12 = vcombine.low %v2954_v56, %v2961_v62  ;;  %v2819_v13 = vcombine.low %v1819_v58, %v1823_v63 }
 0x441   :  { %5117 = vrcp.f32 %v1703_v1  ;;  %v2826_v15 = vrot.slane %v2816_v6, %v5763_v10  ;;  %v2833_v16 = vrot.slane %v2817_v7, %v5763_v10  ;;  %v2840_v17 = vrot.slane %v2818_v9, %v5763_v10  ;;  %v1499_v18 = vpop.xlane.xlu0 %1498 }
 0x442   :  { %v5108_v19 = vpop.eup %5107  ;;  %v1654_v20 = vmul.f32 1.442695, %v1611_v11  ;;  %4391 = vperm.xlu1 %5033, %v2962_v12   ;;  %v2847_v14 = vrot.slane %v2819_v13, %v5763_v10  ;;  %v1577_v21 = vadd.f32 %v5734_v35, %v1499_v18  ;;  %v1891_v22 = vrot.slane %v5102_v51, %v5421_v39 }
 0x443   :  { %v5798_v23 = vpop.eup %5109  ;;  %v1701_v24 = vadd.f32 1.0, %v5108_v19  ;;  %v2848_v25 = vcombine.low %v2826_v15, %v2833_v16  ;;  %v1895_v26 = vrot.slane %v5102_v51, %v5427_v41  ;;  %v1899_v27 = vrot.slane %v5102_v51, %v5744_v0 }
 0x444   :  { %5119 = vpow2.f32 %v1654_v20  ;;  %v2849_v28 = vcombine.low %v2840_v17, %v2847_v14  ;;  %v1609_v42 = vsub.f32 0.0, %v1577_v21  ;;  %v1903_v29 = vrot.slane %v5102_v51, %v5747_v2 }
 0x445   :  { %5121 = vrcp.f32 %v1701_v24  ;;  %v2856_v30 = vrot.slane %v2848_v25, %v5763_v10  ;;  %v1907_v31 = vrot.slane %v5102_v51, %v5750_v3  ;;  %v1911_v32 = vrot.slane %v5102_v51, %v5753_v4 }
 0x446   :  { %v5112_v33 = vpop.eup %5111  ;;  %v2863_v34 = vrot.slane %v2849_v28, %v5763_v10  ;;  %v1650_v36 = vmul.f32 1.442695, %v1609_v42  ;;  %v1915_v40 = vrot.slane %v5102_v51, %v5756_v5  ;;  %v1919_v44 = vrot.slane %v5102_v51, %v5760_v8 }
 0x447   :  { %v5809_v47 = vpop.eup %5113  ;;  %v1706_v46 = vadd.f32 1.0, %v5112_v33  ;;  %v2963_v48 = vcombine.low %v1891_v22, %v1895_v26  ;;  %v2964_v43 = vcombine.low %v1899_v27, %v1903_v29  ;;  %v2965_v49 = vcombine.low %v1907_v31, %v1911_v32 }
 0x448   :  { %v2864_v50 = vcombine.low %v2856_v30, %v2863_v34  ;;  %5123 = vpow2.f32 %v1650_v36  ;;  %v2966_v52 = vcombine.low %v1915_v40, %v1919_v44  ;;  %v1827_v53 = vrot.slane %v5784_v54, %v5421_v39 }
 0x449   :  { %5125 = vrcp.f32 %v1706_v46  ;;  %v2973_v45 = vrot.slane %v2963_v48, %v5763_v10  ;;  %v2980_v55 = vrot.slane %v2964_v43, %v5763_v10  ;;  %v2987_v56 = vrot.slane %v2965_v49, %v5763_v10 }
 0x44a   :  { %v5116_v51 = vpop.eup %5115  ;;  %4385 = vperm.xlu0 %5034, %v2864_v50   ;;  %v2994_v57 = vrot.slane %v2966_v52, %v5763_v10  ;;  %v1831_v58 = vrot.slane %v5784_v54, %v5427_v41  ;;  %v1835_v59 = vrot.slane %v5784_v54, %v5744_v0  ;;  %v1839_v60 = vrot.slane %v5784_v54, %v5747_v2 }
 0x44b   :  { %v5823_v61 = vpop.eup %5117  ;;  %v1704_v62 = vadd.f32 1.0, %v5116_v51  ;;  %v2995_v63 = vcombine.low %v2973_v45, %v2980_v55  ;;  %v1843_v1 = vrot.slane %v5784_v54, %v5750_v3  ;;  %v1847_v6 = vrot.slane %v5784_v54, %v5753_v4 }
 0x44c   :  { %v2996_v7 = vcombine.low %v2987_v56, %v2994_v57  ;;  %v1851_v9 = vrot.slane %v5784_v54, %v5756_v5  ;;  %v1855_v11 = vrot.slane %v5784_v54, %v5760_v8  ;;  %v2865_v12 = vcombine.low %v1827_v53, %v1831_v58 }
 0x44d   :  { %5127 = vrcp.f32 %v1704_v62  ;;  %v3003_v13 = vrot.slane %v2995_v63, %v5763_v10  ;;  %v2866_v15 = vcombine.low %v1835_v59, %v1839_v60  ;;  %v2867_v16 = vcombine.low %v1843_v1, %v1847_v6 }
 0x44e   :  { %v5120_v17 = vpop.eup %5119  ;;  %v3010_v18 = vrot.slane %v2996_v7, %v5763_v10  ;;  %v2868_v19 = vcombine.low %v1851_v9, %v1855_v11  ;;  %v2875_v20 = vrot.slane %v2865_v12, %v5763_v10  ;;  %v1987_v14 = vrot.slane %v5798_v23, %v5421_v39 }
 0x44f   :  { %v5838_v21 = vpop.eup %5121  ;;  %v1707_v22 = vadd.f32 1.0, %v5120_v17  ;;  %v2882_v54 = vrot.slane %v2866_v15, %v5763_v10  ;;  %v2889_v24 = vrot.slane %v2867_v16, %v5763_v10  ;;  %v1991_v25 = vrot.slane %v5798_v23, %v5427_v41 }
 0x450   :  { %v3011_v26 = vcombine.low %v3003_v13, %v3010_v18  ;;  %v2896_v27 = vrot.slane %v2868_v19, %v5763_v10  ;;  %v1995_v28 = vrot.slane %v5798_v23, %v5744_v0  ;;  %v1999_v42 = vrot.slane %v5798_v23, %v5747_v2 }
 0x451   :  { %5129 = vrcp.f32 %v1707_v22  ;;  %v2897_v29 = vcombine.low %v2875_v20, %v2882_v54  ;;  %v2003_v30 = vrot.slane %v5798_v23, %v5750_v3  ;;  %v2007_v31 = vrot.slane %v5798_v23, %v5753_v4 }
 0x452   :  { %v5124_v32 = vpop.eup %5123  ;;  %4394 = vperm.xlu1 %5033, %v3011_v26   ;;  %v2898_v33 = vcombine.low %v2889_v24, %v2896_v27  ;;  %v2011_v34 = vrot.slane %v5798_v23, %v5756_v5  ;;  %v2015_v36 = vrot.slane %v5798_v23, %v5760_v8  ;;  %v3110_v40 = vcombine.low %v1987_v14, %v1991_v25 }
 0x453   :  { %v5857_v44 = vpop.eup %5125  ;;  %v1705_v46 = vadd.f32 1.0, %v5124_v32  ;;  %v2905_v48 = vrot.slane %v2897_v29, %v5763_v10  ;;  %v3111_v43 = vcombine.low %v1995_v28, %v1999_v42  ;;  %v3112_v49 = vcombine.low %v2003_v30, %v2007_v31 }
 0x454   :  { %v2912_v50 = vrot.slane %v2898_v33, %v5763_v10  ;;  %v3113_v52 = vcombine.low %v2011_v34, %v2015_v36  ;;  %v3120_v53 = vrot.slane %v3110_v40, %v5763_v10  ;;  %v1923_v45 = vrot.slane %v5809_v47, %v5421_v39 }
 0x455   :  { %5131 = vrcp.f32 %v1705_v46  ;;  %v3127_v55 = vrot.slane %v3111_v43, %v5763_v10  ;;  %v3134_v23 = vrot.slane %v3112_v49, %v5763_v10  ;;  %v1927_v56 = vrot.slane %v5809_v47, %v5427_v41  ;;  %v1526_v60 = vpop.xlane.xlu0 %1525 }
 0x456   :  { %v2913_v51 = vcombine.low %v2905_v48, %v2912_v50  ;;  %v3141_v57 = vrot.slane %v3113_v52, %v5763_v10  ;;  %v1931_v58 = vrot.slane %v5809_v47, %v5744_v0  ;;  %v1935_v59 = vrot.slane %v5809_v47, %v5747_v2 }
 0x457   :  { %v5873_v62 = vpop.eup %5127  ;;  %v3142_v63 = vcombine.low %v3120_v53, %v3127_v55  ;;  %v1939_v1 = vrot.slane %v5809_v47, %v5750_v3  ;;  %v1943_v6 = vrot.slane %v5809_v47, %v5753_v4  ;;  %v1947_v7 = vrot.slane %v5809_v47, %v5756_v5  ;;  %v1529_v9 = vpop.xlane.xlu1 %1528 }
 0x458   :  { %4388 = vperm.xlu1 %5033, %v2913_v51   ;;  %v3143_v11 = vcombine.low %v3134_v23, %v3141_v57  ;;  %v1951_v12 = vrot.slane %v5809_v47, %v5760_v8  ;;  %v3012_v13 = vcombine.low %v1923_v45, %v1927_v56  ;;  %v3013_v15 = vcombine.low %v1931_v58, %v1935_v59 }
 0x459   :  { %v3150_v16 = vrot.slane %v3142_v63, %v5763_v10  ;;  %v3014_v17 = vcombine.low %v1939_v1, %v1943_v6  ;;  %v1586_v18 = vadd.f32 %v5734_v35, %v1526_v60  ;;  %v1587_v19 = vadd.f32 %v5734_v35, %v1529_v9  ;;  %v1520_v43 = vpop.xlane.xlu0 %1519 }
 0x45a   :  { %v3157_v20 = vrot.slane %v3143_v11, %v5763_v10  ;;  %v3015_v14 = vcombine.low %v1947_v7, %v1951_v12  ;;  %v3022_v22 = vrot.slane %v3012_v13, %v5763_v10  ;;  %v3029_v54 = vrot.slane %v3013_v15, %v5763_v10 }
 0x45b   :  { %v5889_v24 = vpop.eup %5129  ;;  %v3036_v47 = vrot.slane %v3014_v17, %v5763_v10  ;;  %v1618_v25 = vsub.f32 0.0, %v1586_v18  ;;  %v1619_v26 = vsub.f32 0.0, %v1587_v19  ;;  %v2019_v27 = vrot.slane %v5823_v61, %v5421_v39  ;;  %v1523_v49 = vpop.xlane.xlu1 %1522 }
 0x45c   :  { %v3158_v28 = vcombine.low %v3150_v16, %v3157_v20  ;;  %v3043_v42 = vrot.slane %v3015_v14, %v5763_v10  ;;  %v3044_v29 = vcombine.low %v3022_v22, %v3029_v54  ;;  %v2023_v30 = vrot.slane %v5823_v61, %v5427_v41 }
 0x45d   :  { %v1668_v31 = vmul.f32 1.442695, %v1618_v25  ;;  %v1670_v32 = vmul.f32 1.442695, %v1619_v26  ;;  %v2027_v33 = vrot.slane %v5823_v61, %v5744_v0  ;;  %v2031_v34 = vrot.slane %v5823_v61, %v5747_v2  ;;  %v1508_v14 = vpop.xlane.xlu0 %1507 }
 0x45e   :  { %4403 = vperm.xlu1 %5033, %v3158_v28   ;;  %v3045_v36 = vcombine.low %v3036_v47, %v3043_v42  ;;  %v3052_v40 = vrot.slane %v3044_v29, %v5763_v10  ;;  %v2035_v46 = vrot.slane %v5823_v61, %v5750_v3  ;;  %v2039_v48 = vrot.slane %v5823_v61, %v5753_v4 }
 0x45f   :  { %v5906_v50 = vpop.eup %5131  ;;  %5133 = vpow2.f32 %v1668_v31  ;;  %v2043_v52 = vrot.slane %v5823_v61, %v5756_v5  ;;  %v2047_v53 = vrot.slane %v5823_v61, %v5760_v8  ;;  %v3159_v45 = vcombine.low %v2019_v27, %v2023_v30 }
 0x460   :  { %v3059_v55 = vrot.slane %v3045_v36, %v5763_v10  ;;  %5135 = vpow2.f32 %v1670_v32  ;;  %v3160_v23 = vcombine.low %v2027_v33, %v2031_v34  ;;  %v3161_v56 = vcombine.low %v2035_v46, %v2039_v48 }
 0x461   :  { %v3162_v51 = vcombine.low %v2043_v52, %v2047_v53  ;;  %v3169_v57 = vrot.slane %v3159_v45, %v5763_v10  ;;  %v1584_v58 = vadd.f32 %v5734_v35, %v1520_v43  ;;  %v1585_v59 = vadd.f32 %v5734_v35, %v1523_v49 }
 0x462   :  { %v3060_v60 = vcombine.low %v3052_v40, %v3059_v55  ;;  %v3176_v63 = vrot.slane %v3160_v23, %v5763_v10  ;;  %v3183_v1 = vrot.slane %v3161_v56, %v5763_v10  ;;  %v1955_v61 = vrot.slane %v5838_v21, %v5421_v39 }
 0x463   :  { %v3190_v6 = vrot.slane %v3162_v51, %v5763_v10  ;;  %v1616_v7 = vsub.f32 0.0, %v1584_v58  ;;  %v1617_v9 = vsub.f32 0.0, %v1585_v59  ;;  %v1959_v11 = vrot.slane %v5838_v21, %v5427_v41  ;;  %v1511_v58 = vpop.xlane.xlu0 %1510 }
 0x464   :  { %4397 = vperm.xlu1 %5033, %v3060_v60   ;;  %v3191_v12 = vcombine.low %v3169_v57, %v3176_v63  ;;  %v1963_v13 = vrot.slane %v5838_v21, %v5744_v0  ;;  %v1967_v15 = vrot.slane %v5838_v21, %v5747_v2  ;;  %v1971_v16 = vrot.slane %v5838_v21, %v5750_v3 }
 0x465   :  { %v3192_v17 = vcombine.low %v3183_v1, %v3190_v6  ;;  %v1664_v18 = vmul.f32 1.442695, %v1616_v7  ;;  %v1666_v19 = vmul.f32 1.442695, %v1617_v9  ;;  %v1975_v20 = vrot.slane %v5838_v21, %v5753_v4  ;;  %v5931_v22 = vpop.xlane.xlu1 %1537 }
 0x466   :  { %v3199_v54 = vrot.slane %v3191_v12, %v5763_v10  ;;  %v1979_v47 = vrot.slane %v5838_v21, %v5756_v5  ;;  %v1983_v25 = vrot.slane %v5838_v21, %v5760_v8  ;;  %v3061_v26 = vcombine.low %v1955_v61, %v1959_v11 }
 0x467   :  { %v3206_v27 = vrot.slane %v3192_v17, %v5763_v10  ;;  %5137 = vpow2.f32 %v1664_v18  ;;  %v3062_v28 = vcombine.low %v1963_v13, %v1967_v15  ;;  %v3063_v42 = vcombine.low %v1971_v16, %v1975_v20 }
 0x468   :  { %5139 = vpow2.f32 %v1666_v19  ;;  %v3064_v29 = vcombine.low %v1979_v47, %v1983_v25  ;;  %v3071_v30 = vrot.slane %v3061_v26, %v5763_v10  ;;  %v1580_v31 = vadd.f32 %v5734_v35, %v1508_v14 }
 0x469   :  { %v5134_v32 = vpop.eup %5133  ;;  %v3207_v33 = vcombine.low %v3199_v54, %v3206_v27  ;;  %v3078_v34 = vrot.slane %v3062_v28, %v5763_v10  ;;  %v3085_v36 = vrot.slane %v3063_v42, %v5763_v10  ;;  %v2115_v21 = vrot.slane %v5857_v44, %v5421_v39  ;;  %v5945_v40 = vpop.xlane.xlu1 %1531 }
 0x46a   :  { %v5136_v46 = vpop.eup %5135  ;;  %v1714_v48 = vadd.f32 1.0, %v5134_v32  ;;  %v3092_v43 = vrot.slane %v3064_v29, %v5763_v10  ;;  %v1612_v49 = vsub.f32 0.0, %v1580_v31  ;;  %v2119_v52 = vrot.slane %v5857_v44, %v5427_v41 }
 0x46b   :  { %v1715_v53 = vadd.f32 1.0, %v5136_v46  ;;  %4406 = vperm.xlu1 %5033, %v3207_v33   ;;  %v3093_v45 = vcombine.low %v3071_v30, %v3078_v34  ;;  %v2123_v55 = vrot.slane %v5857_v44, %v5744_v0  ;;  %v2127_v23 = vrot.slane %v5857_v44, %v5747_v2 }
 0x46c   :  { %5141 = vrcp.f32 %v1714_v48  ;;  %v3094_v56 = vcombine.low %v3085_v36, %v3092_v43  ;;  %v1656_v51 = vmul.f32 1.442695, %v1612_v49  ;;  %v2131_v57 = vrot.slane %v5857_v44, %v5750_v3 }
 0x46d   :  { %5143 = vrcp.f32 %v1715_v53  ;;  %v3101_v59 = vrot.slane %v3093_v45, %v5763_v10  ;;  %v2135_v60 = vrot.slane %v5857_v44, %v5753_v4  ;;  %v2139_v63 = vrot.slane %v5857_v44, %v5756_v5  ;;  %v5961_v1 = vpop.xlane.xlu1 %1540 }
 0x46e   :  { %v3108_v61 = vrot.slane %v3094_v56, %v5763_v10  ;;  %5145 = vpow2.f32 %v1656_v51  ;;  %v2143_v6 = vrot.slane %v5857_v44, %v5760_v8  ;;  %v3306_v7 = vcombine.low %v2115_v21, %v2119_v52  ;;  %v1514_v21 = vpop.xlane.xlu0 %1513 }
 0x46f   :  { %v3307_v9 = vcombine.low %v2123_v55, %v2127_v23  ;;  %v3308_v11 = vcombine.low %v2131_v57, %v2135_v60  ;;  %v1581_v12 = vadd.f32 %v5734_v35, %v1511_v58  ;;  %v2051_v13 = vrot.slane %v5873_v62, %v5421_v39 }
 0x470   :  { %v3109_v15 = vcombine.low %v3101_v59, %v3108_v61  ;;  %v3309_v16 = vcombine.low %v2139_v63, %v2143_v6  ;;  %v3316_v17 = vrot.slane %v3306_v7, %v5763_v10  ;;  %v2055_v18 = vrot.slane %v5873_v62, %v5427_v41 }
 0x471   :  { %v5138_v19 = vpop.eup %5137  ;;  %v3323_v20 = vrot.slane %v3307_v9, %v5763_v10  ;;  %v3330_v44 = vrot.slane %v3308_v11, %v5763_v10  ;;  %v1613_v14 = vsub.f32 0.0, %v1581_v12  ;;  %v2059_v54 = vrot.slane %v5873_v62, %v5744_v0  ;;  %v5981_v42 = vpop.xlane.xlu1 %1534 }
 0x472   :  { %v5140_v47 = vpop.eup %5139  ;;  %v1712_v25 = vadd.f32 1.0, %v5138_v19  ;;  %4400 = vperm.xlu1 %5033, %v3109_v15   ;;  %v3337_v26 = vrot.slane %v3309_v16, %v5763_v10  ;;  %v2063_v27 = vrot.slane %v5873_v62, %v5747_v2  ;;  %v2067_v28 = vrot.slane %v5873_v62, %v5750_v3 }
 0x473   :  { %v1713_v29 = vadd.f32 1.0, %v5140_v47  ;;  %v3338_v30 = vcombine.low %v3316_v17, %v3323_v20  ;;  %v1658_v31 = vmul.f32 1.442695, %v1613_v14  ;;  %v2071_v32 = vrot.slane %v5873_v62, %v5753_v4 }
 0x474   :  { %5147 = vrcp.f32 %v1712_v25  ;;  %v3339_v33 = vcombine.low %v3330_v44, %v3337_v26  ;;  %v2075_v34 = vrot.slane %v5873_v62, %v5756_v5  ;;  %v2079_v36 = vrot.slane %v5873_v62, %v5760_v8 }
 0x475   :  { %5149 = vrcp.f32 %v1713_v29  ;;  %v3346_v46 = vrot.slane %v3338_v30, %v5763_v10  ;;  %v3208_v48 = vcombine.low %v2051_v13, %v2055_v18  ;;  %v3209_v43 = vcombine.low %v2059_v54, %v2063_v27  ;;  %v6004_v61 = vpop.xlane.xlu1 %1549  ;;  %v1517_v54 = vpop.xlane.xlu0 %1516 }
 0x476   :  { %v5990_v49 = vpop.eup %5141  ;;  %v3353_v52 = vrot.slane %v3339_v33, %v5763_v10  ;;  %5151 = vpow2.f32 %v1658_v31  ;;  %v3210_v53 = vcombine.low %v2067_v28, %v2071_v32  ;;  %v3211_v45 = vcombine.low %v2075_v34, %v2079_v36 }
 0x477   :  { %v5993_v55 = vpop.eup %5143  ;;  %v3218_v23 = vrot.slane %v3208_v48, %v5763_v10  ;;  %v3225_v56 = vrot.slane %v3209_v43, %v5763_v10  ;;  %v1590_v62 = vadd.f32 %v5734_v35, %v5931_v22  ;;  %v1582_v51 = vadd.f32 %v5734_v35, %v1514_v21 }
 0x478   :  { %v5146_v57 = vpop.eup %5145  ;;  %v3354_v58 = vcombine.low %v3346_v46, %v3353_v52  ;;  %v3232_v59 = vrot.slane %v3210_v53, %v5763_v10  ;;  %v3239_v60 = vrot.slane %v3211_v45, %v5763_v10  ;;  %v2147_v63 = vrot.slane %v5889_v24, %v5421_v39 }
 0x479   :  { %v1708_v6 = vadd.f32 1.0, %v5146_v57  ;;  %v3240_v7 = vcombine.low %v3218_v23, %v3225_v56  ;;  %v1622_v9 = vsub.f32 0.0, %v1590_v62  ;;  %v1614_v11 = vsub.f32 0.0, %v1582_v51  ;;  %v1544_v31 = vpop.xlane.xlu1 %1543 }
 0x47a   :  { %4415 = vperm.xlu1 %5033, %v3354_v58   ;;  %v3241_v12 = vcombine.low %v3232_v59, %v3239_v60  ;;  %v2151_v22 = vrot.slane %v5889_v24, %v5427_v41  ;;  %v2155_v13 = vrot.slane %v5889_v24, %v5744_v0  ;;  %v2159_v15 = vrot.slane %v5889_v24, %v5747_v2 }
 0x47b   :  { %5153 = vrcp.f32 %v1708_v6  ;;  %v3248_v16 = vrot.slane %v3240_v7, %v5763_v10  ;;  %v1676_v17 = vmul.f32 1.442695, %v1622_v9  ;;  %v1660_v18 = vmul.f32 1.442695, %v1614_v11 }
 0x47c   :  { %v3255_v19 = vrot.slane %v3241_v12, %v5763_v10  ;;  %v2163_v20 = vrot.slane %v5889_v24, %v5750_v3  ;;  %v2167_v44 = vrot.slane %v5889_v24, %v5753_v4  ;;  %v2171_v14 = vrot.slane %v5889_v24, %v5756_v5 }
 0x47d   :  { %5155 = vpow2.f32 %v1676_v17  ;;  %v2175_v47 = vrot.slane %v5889_v24, %v5760_v8  ;;  %v3355_v25 = vcombine.low %v2147_v63, %v2151_v22  ;;  %v3356_v26 = vcombine.low %v2155_v13, %v2159_v15  ;;  %v1553_v9 = vpop.xlane.xlu1 %1552 }
 0x47e   :  { %v6022_v27 = vpop.eup %5147  ;;  %v3256_v28 = vcombine.low %v3248_v16, %v3255_v19  ;;  %5157 = vpow2.f32 %v1660_v18  ;;  %v3357_v29 = vcombine.low %v2163_v20, %v2167_v44  ;;  %v1588_v30 = vadd.f32 %v5734_v35, %v5945_v40 }
 0x47f   :  { %v6026_v32 = vpop.eup %5149  ;;  %v3358_v33 = vcombine.low %v2171_v14, %v2175_v47  ;;  %v3365_v34 = vrot.slane %v3355_v25, %v5763_v10  ;;  %v3372_v36 = vrot.slane %v3356_v26, %v5763_v10  ;;  %v1583_v24 = vadd.f32 %v5734_v35, %v1517_v54 }
 0x480   :  { %v5152_v21 = vpop.eup %5151  ;;  %4409 = vperm.xlu1 %5033, %v3256_v28   ;;  %v3379_v46 = vrot.slane %v3357_v29, %v5763_v10  ;;  %v1620_v48 = vsub.f32 0.0, %v1588_v30  ;;  %v2083_v43 = vrot.slane %v5906_v50, %v5421_v39  ;;  %v2087_v40 = vrot.slane %v5906_v50, %v5427_v41 }
 0x481   :  { %v1709_v52 = vadd.f32 1.0, %v5152_v21  ;;  %v3386_v53 = vrot.slane %v3358_v33, %v5763_v10  ;;  %v3387_v45 = vcombine.low %v3365_v34, %v3372_v36  ;;  %v1615_v23 = vsub.f32 0.0, %v1583_v24  ;;  %v1547_v24 = vpop.xlane.xlu1 %1546 }
 0x482   :  { %v1672_v56 = vmul.f32 1.442695, %v1620_v48  ;;  %v2091_v62 = vrot.slane %v5906_v50, %v5744_v0  ;;  %v2095_v51 = vrot.slane %v5906_v50, %v5747_v2  ;;  %v2099_v57 = vrot.slane %v5906_v50, %v5750_v3 }
 0x483   :  { %5159 = vrcp.f32 %v1709_v52  ;;  %v3388_v58 = vcombine.low %v3379_v46, %v3386_v53  ;;  %v3395_v59 = vrot.slane %v3387_v45, %v5763_v10  ;;  %v1662_v60 = vmul.f32 1.442695, %v1615_v23 }
 0x484   :  { %5161 = vpow2.f32 %v1672_v56  ;;  %v2103_v63 = vrot.slane %v5906_v50, %v5753_v4  ;;  %v2107_v6 = vrot.slane %v5906_v50, %v5756_v5  ;;  %v2111_v7 = vrot.slane %v5906_v50, %v5760_v8 }
 0x485   :  { %v6050_v11 = vpop.eup %5153  ;;  %v3402_v12 = vrot.slane %v3388_v58, %v5763_v10  ;;  %5163 = vpow2.f32 %v1662_v60  ;;  %v3257_v22 = vcombine.low %v2083_v43, %v2087_v40  ;;  %v3258_v13 = vcombine.low %v2091_v62, %v2095_v51 }
 0x486   :  { %v3259_v15 = vcombine.low %v2099_v57, %v2103_v63  ;;  %v3260_v16 = vcombine.low %v2107_v6, %v2111_v7  ;;  %v1591_v17 = vadd.f32 %v5734_v35, %v5961_v1  ;;  %v1589_v18 = vadd.f32 %v5734_v35, %v5981_v42 }
 0x487   :  { %v5156_v19 = vpop.eup %5155  ;;  %v3403_v20 = vcombine.low %v3395_v59, %v3402_v12  ;;  %v3267_v50 = vrot.slane %v3257_v22, %v5763_v10  ;;  %v3274_v44 = vrot.slane %v3258_v13, %v5763_v10  ;;  %v1594_v14 = vadd.f32 %v5734_v35, %v6004_v61  ;;  %v1562_v12 = vpop.xlane.xlu1 %1561 }
 0x488   :  { %v5158_v54 = vpop.eup %5157  ;;  %v1718_v47 = vadd.f32 1.0, %v5156_v19  ;;  %v3281_v25 = vrot.slane %v3259_v15, %v5763_v10  ;;  %v3288_v26 = vrot.slane %v3260_v16, %v5763_v10  ;;  %v1623_v28 = vsub.f32 0.0, %v1591_v17 }
 0x489   :  { %v1710_v1 = vadd.f32 1.0, %v5158_v54  ;;  %4418 = vperm.xlu1 %5033, %v3403_v20   ;;  %v3289_v29 = vcombine.low %v3267_v50, %v3274_v44  ;;  %v1621_v42 = vsub.f32 0.0, %v1589_v18  ;;  %v1626_v30 = vsub.f32 0.0, %v1594_v14 }
 0x48a   :  { %5165 = vrcp.f32 %v1718_v47  ;;  %v3290_v33 = vcombine.low %v3281_v25, %v3288_v26  ;;  %v1678_v34 = vmul.f32 1.442695, %v1623_v28  ;;  %v1592_v36 = vadd.f32 %v5734_v35, %v1544_v31 }
 0x48b   :  { %5167 = vrcp.f32 %v1710_v1  ;;  %v3297_v61 = vrot.slane %v3289_v29, %v5763_v10  ;;  %v1674_v21 = vmul.f32 1.442695, %v1621_v42  ;;  %v1684_v46 = vmul.f32 1.442695, %v1626_v30 }
 0x48c   :  { %v3304_v48 = vrot.slane %v3290_v33, %v5763_v10  ;;  %5169 = vpow2.f32 %v1678_v34  ;;  %v1624_v43 = vsub.f32 0.0, %v1592_v36  ;;  %v1595_v40 = vadd.f32 %v5734_v35, %v1553_v9 }
 0x48d   :  { %v6067_v52 = vpop.eup %5159  ;;  %5171 = vpow2.f32 %v1674_v21  ;;  %v1593_v53 = vadd.f32 %v5734_v35, %v1547_v24  ;;  %v2403_v31 = vrot.slane %v5993_v55, %v5421_v39  ;;  %v2407_v45 = vrot.slane %v5993_v55, %v5427_v41 }
 0x48e   :  { %v5162_v23 = vpop.eup %5161  ;;  %v3305_v56 = vcombine.low %v3297_v61, %v3304_v48  ;;  %5173 = vpow2.f32 %v1684_v46  ;;  %v1680_v62 = vmul.f32 1.442695, %v1624_v43  ;;  %v1627_v51 = vsub.f32 0.0, %v1595_v40 }
 0x48f   :  { %v5164_v57 = vpop.eup %5163  ;;  %v1716_v58 = vadd.f32 1.0, %v5162_v23  ;;  %v1625_v59 = vsub.f32 0.0, %v1593_v53  ;;  %v2411_v60 = vrot.slane %v5993_v55, %v5744_v0  ;;  %v2415_v63 = vrot.slane %v5993_v55, %v5747_v2 }
 0x490   :  { %v1711_v6 = vadd.f32 1.0, %v5164_v57  ;;  %4412 = vperm.xlu0 %5034, %v3305_v56   ;;  %5175 = vpow2.f32 %v1680_v62  ;;  %v1686_v7 = vmul.f32 1.442695, %v1627_v51  ;;  %v2419_v9 = vrot.slane %v5993_v55, %v5750_v3 }
 0x491   :  { %5177 = vrcp.f32 %v1716_v58  ;;  %v1682_v22 = vmul.f32 1.442695, %v1625_v59  ;;  %v2423_v13 = vrot.slane %v5993_v55, %v5753_v4  ;;  %v2427_v15 = vrot.slane %v5993_v55, %v5756_v5 }
 0x492   :  { %5179 = vrcp.f32 %v1711_v6  ;;  %v2431_v16 = vrot.slane %v5993_v55, %v5760_v8  ;;  %v3747_v17 = vcombine.low %v2403_v31, %v2407_v45  ;;  %v3748_v18 = vcombine.low %v2411_v60, %v2415_v63 }
 0x493   :  { %5181 = vpow2.f32 %v1686_v7  ;;  %v3749_v19 = vcombine.low %v2419_v9, %v2423_v13  ;;  %v1598_v20 = vadd.f32 %v5734_v35, %v1562_v12  ;;  %v2339_v50 = vrot.slane %v6026_v32, %v5421_v39 }
 0x494   :  { %v6089_v44 = vpop.eup %5165  ;;  %5183 = vpow2.f32 %v1682_v22  ;;  %v3750_v14 = vcombine.low %v2427_v15, %v2431_v16  ;;  %v3757_v54 = vrot.slane %v3747_v17, %v5763_v10  ;;  %v3764_v47 = vrot.slane %v3748_v18, %v5763_v10 }
 0x495   :  { %v6093_v25 = vpop.eup %5167  ;;  %v3771_v55 = vrot.slane %v3749_v19, %v5763_v10  ;;  %v1630_v26 = vsub.f32 0.0, %v1598_v20  ;;  %v2343_v28 = vrot.slane %v6026_v32, %v5427_v41  ;;  %v2347_v1 = vrot.slane %v6026_v32, %v5744_v0 }
 0x496   :  { %v5170_v29 = vpop.eup %5169  ;;  %v3778_v42 = vrot.slane %v3750_v14, %v5763_v10  ;;  %v3779_v30 = vcombine.low %v3757_v54, %v3764_v47  ;;  %v2351_v33 = vrot.slane %v6026_v32, %v5747_v2  ;;  %v2355_v34 = vrot.slane %v6026_v32, %v5750_v3 }
 0x497   :  { %v5172_v36 = vpop.eup %5171  ;;  %v1719_v24 = vadd.f32 1.0, %v5170_v29  ;;  %v1692_v61 = vmul.f32 1.442695, %v1630_v26  ;;  %v2359_v21 = vrot.slane %v6026_v32, %v5753_v4  ;;  %v2363_v46 = vrot.slane %v6026_v32, %v5756_v5  ;;  %v1556_v26 = vpop.xlane.xlu1 %1555 }
 0x498   :  { %v5174_v48 = vpop.eup %5173  ;;  %v1717_v43 = vadd.f32 1.0, %v5172_v36  ;;  %v3780_v40 = vcombine.low %v3771_v55, %v3778_v42  ;;  %v3787_v53 = vrot.slane %v3779_v30, %v5763_v10  ;;  %v2367_v31 = vrot.slane %v6026_v32, %v5760_v8 }
 0x499   :  { %5185 = vrcp.f32 %v1719_v24  ;;  %v1722_v45 = vadd.f32 1.0, %v5174_v48  ;;  %v3649_v23 = vcombine.low %v2339_v50, %v2343_v28  ;;  %v3650_v56 = vcombine.low %v2347_v1, %v2351_v33 }
 0x49a   :  { %v5176_v62 = vpop.eup %5175  ;;  %5187 = vrcp.f32 %v1717_v43  ;;  %v3794_v51 = vrot.slane %v3780_v40, %v5763_v10  ;;  %v3651_v57 = vcombine.low %v2355_v34, %v2359_v21  ;;  %v3652_v58 = vcombine.low %v2363_v46, %v2367_v31 }
 0x49b   :  { %v6113_v59 = vpop.eup %5177  ;;  %5189 = vrcp.f32 %v1722_v45  ;;  %v1720_v60 = vadd.f32 1.0, %v5176_v62  ;;  %v3659_v63 = vrot.slane %v3649_v23, %v5763_v10  ;;  %v3666_v6 = vrot.slane %v3650_v56, %v5763_v10 }
 0x49c   :  { %v6117_v7 = vpop.eup %5179  ;;  %v3795_v32 = vcombine.low %v3787_v53, %v3794_v51  ;;  %5191 = vpow2.f32 %v1692_v61  ;;  %v3673_v9 = vrot.slane %v3651_v57, %v5763_v10  ;;  %v3680_v12 = vrot.slane %v3652_v58, %v5763_v10 }
 0x49d   :  { %v5182_v22 = vpop.eup %5181  ;;  %5193 = vrcp.f32 %v1720_v60  ;;  %v3681_v13 = vcombine.low %v3659_v63, %v3666_v6  ;;  %v2179_v15 = vrot.slane %v6050_v11, %v5421_v39  ;;  %v2183_v16 = vrot.slane %v6050_v11, %v5427_v41  ;;  %v1559_v60 = vpop.xlane.xlu1 %1558 }
 0x49e   :  { %v5184_v17 = vpop.eup %5183  ;;  %v1723_v18 = vadd.f32 1.0, %v5182_v22  ;;  %4442 = vperm.xlu0 %5034, %v3795_v32   ;;  %v3682_v19 = vcombine.low %v3673_v9, %v3680_v12  ;;  %v2187_v20 = vrot.slane %v6050_v11, %v5744_v0  ;;  %v2191_v50 = vrot.slane %v6050_v11, %v5747_v2 }
 0x49f   :  { %v1721_v14 = vadd.f32 1.0, %v5184_v17  ;;  %v3689_v54 = vrot.slane %v3681_v13, %v5763_v10  ;;  %v2195_v47 = vrot.slane %v6050_v11, %v5750_v3  ;;  %v2199_v55 = vrot.slane %v6050_v11, %v5753_v4 }
 0x4a0   :  { %5195 = vrcp.f32 %v1723_v18  ;;  %v3696_v28 = vrot.slane %v3682_v19, %v5763_v10  ;;  %v2203_v1 = vrot.slane %v6050_v11, %v5756_v5  ;;  %v2207_v29 = vrot.slane %v6050_v11, %v5760_v8 }
 0x4a1   :  { %5197 = vrcp.f32 %v1721_v14  ;;  %v3404_v42 = vcombine.low %v2179_v15, %v2183_v16  ;;  %v3405_v30 = vcombine.low %v2187_v20, %v2191_v50  ;;  %v3406_v33 = vcombine.low %v2195_v47, %v2199_v55 }
 0x4a2   :  { %v3697_v34 = vcombine.low %v3689_v54, %v3696_v28  ;;  %v3407_v36 = vcombine.low %v2203_v1, %v2207_v29  ;;  %v1596_v24 = vadd.f32 %v5734_v35, %v1556_v26  ;;  %v2211_v61 = vrot.slane %v6067_v52, %v5421_v39 }
 0x4a3   :  { %v6142_v21 = vpop.eup %5185  ;;  %v3414_v46 = vrot.slane %v3404_v42, %v5763_v10  ;;  %v3421_v48 = vrot.slane %v3405_v30, %v5763_v10  ;;  %v3428_v43 = vrot.slane %v3406_v33, %v5763_v10  ;;  %v2215_v11 = vrot.slane %v6067_v52, %v5427_v41 }
 0x4a4   :  { %v6149_v40 = vpop.eup %5187  ;;  %4436 = vperm.xlu0 %5034, %v3697_v34   ;;  %v3435_v53 = vrot.slane %v3407_v36, %v5763_v10  ;;  %v1628_v31 = vsub.f32 0.0, %v1596_v24  ;;  %v2219_v45 = vrot.slane %v6067_v52, %v5744_v0  ;;  %v2223_v23 = vrot.slane %v6067_v52, %v5747_v2  ;;  %v1565_v34 = vpop.xlane.xlu1 %1564 }
 0x4a5   :  { %v6156_v56 = vpop.eup %5189  ;;  %v3436_v62 = vcombine.low %v3414_v46, %v3421_v48  ;;  %v2227_v51 = vrot.slane %v6067_v52, %v5750_v3  ;;  %v2231_v57 = vrot.slane %v6067_v52, %v5753_v4  ;;  %v2235_v58 = vrot.slane %v6067_v52, %v5756_v5 }
 0x4a6   :  { %v5192_v63 = vpop.eup %5191  ;;  %v3437_v6 = vcombine.low %v3428_v43, %v3435_v53  ;;  %v1688_v32 = vmul.f32 1.442695, %v1628_v31  ;;  %v2239_v9 = vrot.slane %v6067_v52, %v5760_v8  ;;  %v3453_v12 = vcombine.low %v2211_v61, %v2215_v11 }
 0x4a7   :  { %v6166_v22 = vpop.eup %5193  ;;  %v1726_v13 = vadd.f32 1.0, %v5192_v63  ;;  %v3444_v15 = vrot.slane %v3436_v62, %v5763_v10  ;;  %v3454_v16 = vcombine.low %v2219_v45, %v2223_v23  ;;  %v3455_v17 = vcombine.low %v2227_v51, %v2231_v57 }
 0x4a8   :  { %v3451_v18 = vrot.slane %v3437_v6, %v5763_v10  ;;  %5199 = vpow2.f32 %v1688_v32  ;;  %v3456_v19 = vcombine.low %v2235_v58, %v2239_v9  ;;  %v3463_v20 = vrot.slane %v3453_v12, %v5763_v10 }
 0x4a9   :  { %5201 = vrcp.f32 %v1726_v13  ;;  %v3470_v50 = vrot.slane %v3454_v16, %v5763_v10  ;;  %v3477_v14 = vrot.slane %v3455_v17, %v5763_v10  ;;  %v1597_v52 = vadd.f32 %v5734_v35, %v1559_v60 }
 0x4aa   :  { %v6174_v54 = vpop.eup %5195  ;;  %v3452_v47 = vcombine.low %v3444_v15, %v3451_v18  ;;  %v3484_v55 = vrot.slane %v3456_v19, %v5763_v10  ;;  %v2371_v26 = vrot.slane %v5990_v49, %v5421_v39  ;;  %v2375_v28 = vrot.slane %v5990_v49, %v5427_v41 }
 0x4ab   :  { %v6181_v1 = vpop.eup %5197  ;;  %v3485_v29 = vcombine.low %v3463_v20, %v3470_v50  ;;  %v1629_v42 = vsub.f32 0.0, %v1597_v52  ;;  %v2379_v30 = vrot.slane %v5990_v49, %v5744_v0  ;;  %v2383_v33 = vrot.slane %v5990_v49, %v5747_v2 }
 0x4ac   :  { %4421 = vperm.xlu1 %5033, %v3452_v47   ;;  %v3486_v36 = vcombine.low %v3477_v14, %v3484_v55  ;;  %v2387_v24 = vrot.slane %v5990_v49, %v5750_v3  ;;  %v2391_v61 = vrot.slane %v5990_v49, %v5753_v4  ;;  %v2395_v46 = vrot.slane %v5990_v49, %v5756_v5 }
 0x4ad   :  { %v3493_v48 = vrot.slane %v3485_v29, %v5763_v10  ;;  %v1690_v43 = vmul.f32 1.442695, %v1629_v42  ;;  %v2399_v11 = vrot.slane %v5990_v49, %v5760_v8  ;;  %v3698_v53 = vcombine.low %v2371_v26, %v2375_v28 }
 0x4ae   :  { %v3500_v31 = vrot.slane %v3486_v36, %v5763_v10  ;;  %v3699_v45 = vcombine.low %v2379_v30, %v2383_v33  ;;  %v3700_v23 = vcombine.low %v2387_v24, %v2391_v61  ;;  %v1599_v62 = vadd.f32 %v5734_v35, %v1565_v34 }
 0x4af   :  { %5203 = vpow2.f32 %v1690_v43  ;;  %v3701_v51 = vcombine.low %v2395_v46, %v2399_v11  ;;  %v3708_v57 = vrot.slane %v3698_v53, %v5763_v10  ;;  %v2307_v58 = vrot.slane %v6022_v27, %v5421_v39 }
 0x4b0   :  { %v3501_v60 = vcombine.low %v3493_v48, %v3500_v31  ;;  %v3715_v63 = vrot.slane %v3699_v45, %v5763_v10  ;;  %v3722_v6 = vrot.slane %v3700_v23, %v5763_v10  ;;  %v1631_v49 = vsub.f32 0.0, %v1599_v62 }
 0x4b1   :  { %v3729_v32 = vrot.slane %v3701_v51, %v5763_v10  ;;  %v2311_v9 = vrot.slane %v6022_v27, %v5427_v41  ;;  %v2315_v35 = vrot.slane %v6022_v27, %v5744_v0  ;;  %v2319_v12 = vrot.slane %v6022_v27, %v5747_v2 }
 0x4b2   :  { %v5200_v13 = vpop.eup %5199  ;;  %4424 = vperm.xlu1 %5033, %v3501_v60   ;;  %v3730_v15 = vcombine.low %v3708_v57, %v3715_v63  ;;  %v1694_v16 = vmul.f32 1.442695, %v1631_v49  ;;  %v2323_v17 = vrot.slane %v6022_v27, %v5750_v3  ;;  %v2327_v18 = vrot.slane %v6022_v27, %v5753_v4 }
 0x4b3   :  { %v6214_v19 = vpop.eup %5201  ;;  %v1724_v20 = vadd.f32 1.0, %v5200_v13  ;;  %v3731_v50 = vcombine.low %v3722_v6, %v3729_v32  ;;  %v2331_v14 = vrot.slane %v6022_v27, %v5756_v5  ;;  %v2335_v52 = vrot.slane %v6022_v27, %v5760_v8 }
 0x4b4   :  { %v3738_v47 = vrot.slane %v3730_v15, %v5763_v10  ;;  %5205 = vpow2.f32 %v1694_v16  ;;  %v3600_v55 = vcombine.low %v2307_v58, %v2311_v9  ;;  %v3601_v26 = vcombine.low %v2315_v35, %v2319_v12 }
 0x4b5   :  { %5207 = vrcp.f32 %v1724_v20  ;;  %v3745_v28 = vrot.slane %v3731_v50, %v5763_v10  ;;  %v3602_v29 = vcombine.low %v2323_v17, %v2327_v18  ;;  %v3603_v42 = vcombine.low %v2331_v14, %v2335_v52 }
 0x4b6   :  { %v3610_v30 = vrot.slane %v3600_v55, %v5763_v10  ;;  %v3617_v33 = vrot.slane %v3601_v26, %v5763_v10  ;;  %v2531_v34 = vrot.slane %v6142_v21, %v5421_v39  ;;  %v2535_v27 = vrot.slane %v6142_v21, %v5427_v41 }
 0x4b7   :  { %v3746_v36 = vcombine.low %v3738_v47, %v3745_v28  ;;  %v3624_v24 = vrot.slane %v3602_v29, %v5763_v10  ;;  %v3631_v61 = vrot.slane %v3603_v42, %v5763_v10  ;;  %v2539_v46 = vrot.slane %v6142_v21, %v5744_v0 }
 0x4b8   :  { %v3632_v48 = vcombine.low %v3610_v30, %v3617_v33  ;;  %v2543_v43 = vrot.slane %v6142_v21, %v5747_v2  ;;  %v2547_v11 = vrot.slane %v6142_v21, %v5750_v3  ;;  %v2551_v53 = vrot.slane %v6142_v21, %v5753_v4 }
 0x4b9   :  { %v5204_v31 = vpop.eup %5203  ;;  %4439 = vperm.xlu1 %5033, %v3746_v36   ;;  %v3633_v45 = vcombine.low %v3624_v24, %v3631_v61  ;;  %v2555_v23 = vrot.slane %v6142_v21, %v5756_v5  ;;  %v2559_v62 = vrot.slane %v6142_v21, %v5760_v8  ;;  %v3943_v51 = vcombine.low %v2531_v34, %v2535_v27 }
 0x4ba   :  { %v1725_v57 = vadd.f32 1.0, %v5204_v31  ;;  %v3640_v58 = vrot.slane %v3632_v48, %v5763_v10  ;;  %v3944_v60 = vcombine.low %v2539_v46, %v2543_v43  ;;  %v3945_v63 = vcombine.low %v2547_v11, %v2551_v53 }
 0x4bb   :  { %v3647_v6 = vrot.slane %v3633_v45, %v5763_v10  ;;  %v3946_v49 = vcombine.low %v2555_v23, %v2559_v62  ;;  %v3953_v32 = vrot.slane %v3943_v51, %v5763_v10  ;;  %v2499_v9 = vrot.slane %v6089_v44, %v5421_v39 }
 0x4bc   :  { %5209 = vrcp.f32 %v1725_v57  ;;  %v3960_v35 = vrot.slane %v3944_v60, %v5763_v10  ;;  %v3967_v12 = vrot.slane %v3945_v63, %v5763_v10  ;;  %v2503_v21 = vrot.slane %v6089_v44, %v5427_v41 }
 0x4bd   :  { %v3648_v13 = vcombine.low %v3640_v58, %v3647_v6  ;;  %v3974_v15 = vrot.slane %v3946_v49, %v5763_v10  ;;  %v2507_v16 = vrot.slane %v6089_v44, %v5744_v0  ;;  %v2511_v17 = vrot.slane %v6089_v44, %v5747_v2 }
 0x4be   :  { %v5206_v18 = vpop.eup %5205  ;;  %v3975_v20 = vcombine.low %v3953_v32, %v3960_v35  ;;  %v2515_v50 = vrot.slane %v6089_v44, %v5750_v3  ;;  %v2519_v14 = vrot.slane %v6089_v44, %v5753_v4  ;;  %v2523_v52 = vrot.slane %v6089_v44, %v5756_v5 }
 0x4bf   :  { %v6262_v47 = vpop.eup %5207  ;;  %v1727_v55 = vadd.f32 1.0, %v5206_v18  ;;  %4433 = vperm.xlu1 %5033, %v3648_v13   ;;  %v3976_v26 = vcombine.low %v3967_v12, %v3974_v15  ;;  %v2527_v28 = vrot.slane %v6089_v44, %v5760_v8  ;;  %v3894_v29 = vcombine.low %v2499_v9, %v2503_v21 }
 0x4c0   :  { %v3983_v42 = vrot.slane %v3975_v20, %v5763_v10  ;;  %v3895_v30 = vcombine.low %v2507_v16, %v2511_v17  ;;  %v3896_v33 = vcombine.low %v2515_v50, %v2519_v14  ;;  %v2467_v34 = vrot.slane %v6149_v40, %v5421_v39 }
 0x4c1   :  { %5211 = vrcp.f32 %v1727_v55  ;;  %v3990_v27 = vrot.slane %v3976_v26, %v5763_v10  ;;  %v3897_v36 = vcombine.low %v2523_v52, %v2527_v28  ;;  %v3904_v24 = vrot.slane %v3894_v29, %v5763_v10 }
 0x4c2   :  { %v3911_v61 = vrot.slane %v3895_v30, %v5763_v10  ;;  %v3918_v46 = vrot.slane %v3896_v33, %v5763_v10  ;;  %v2471_v44 = vrot.slane %v6149_v40, %v5427_v41  ;;  %v2475_v48 = vrot.slane %v6149_v40, %v5744_v0 }
 0x4c3   :  { %v3991_v43 = vcombine.low %v3983_v42, %v3990_v27  ;;  %v3925_v11 = vrot.slane %v3897_v36, %v5763_v10  ;;  %v2479_v53 = vrot.slane %v6149_v40, %v5747_v2  ;;  %v2483_v31 = vrot.slane %v6149_v40, %v5750_v3 }
 0x4c4   :  { %v3926_v45 = vcombine.low %v3904_v24, %v3911_v61  ;;  %v2487_v23 = vrot.slane %v6149_v40, %v5753_v4  ;;  %v2491_v62 = vrot.slane %v6149_v40, %v5756_v5  ;;  %v2495_v51 = vrot.slane %v6149_v40, %v5760_v8 }
 0x4c5   :  { %4454 = vperm.xlu0 %5034, %v3991_v43   ;;  %v3927_v57 = vcombine.low %v3918_v46, %v3925_v11  ;;  %v3845_v58 = vcombine.low %v2467_v34, %v2471_v44  ;;  %v3846_v60 = vcombine.low %v2475_v48, %v2479_v53  ;;  %v2435_v63 = vrot.slane %v6113_v59, %v5421_v39 }
 0x4c6   :  { %v6290_v6 = vpop.eup %5209  ;;  %v3934_v49 = vrot.slane %v3926_v45, %v5763_v10  ;;  %v3847_v32 = vcombine.low %v2483_v31, %v2487_v23  ;;  %v3848_v9 = vcombine.low %v2491_v62, %v2495_v51  ;;  %v2439_v35 = vrot.slane %v6113_v59, %v5427_v41 }
 0x4c7   :  { %v3941_v12 = vrot.slane %v3927_v57, %v5763_v10  ;;  %v3855_v40 = vrot.slane %v3845_v58, %v5763_v10  ;;  %v3862_v21 = vrot.slane %v3846_v60, %v5763_v10  ;;  %v2443_v13 = vrot.slane %v6113_v59, %v5744_v0 }
 0x4c8   :  { %v3869_v15 = vrot.slane %v3847_v32, %v5763_v10  ;;  %v3876_v16 = vrot.slane %v3848_v9, %v5763_v10  ;;  %v2447_v17 = vrot.slane %v6113_v59, %v5747_v2  ;;  %v2451_v18 = vrot.slane %v6113_v59, %v5750_v3 }
 0x4c9   :  { %v3942_v20 = vcombine.low %v3934_v49, %v3941_v12  ;;  %v3877_v50 = vcombine.low %v3855_v40, %v3862_v21  ;;  %v2455_v14 = vrot.slane %v6113_v59, %v5753_v4  ;;  %v2459_v52 = vrot.slane %v6113_v59, %v5756_v5 }
 0x4ca   :  { %v3878_v55 = vcombine.low %v3869_v15, %v3876_v16  ;;  %v2463_v26 = vrot.slane %v6113_v59, %v5760_v8  ;;  %v3796_v28 = vcombine.low %v2435_v63, %v2439_v35  ;;  %v3797_v29 = vcombine.low %v2443_v13, %v2447_v17 }
 0x4cb   :  { %v6312_v42 = vpop.eup %5211  ;;  %4451 = vperm.xlu1 %5033, %v3942_v20   ;;  %v3885_v30 = vrot.slane %v3877_v50, %v5763_v10  ;;  %v3798_v33 = vcombine.low %v2451_v18, %v2455_v14  ;;  %v2627_v34 = vrot.slane %v6156_v56, %v5421_v39  ;;  %v2631_v27 = vrot.slane %v6156_v56, %v5427_v41 }
 0x4cc   :  { %v3892_v36 = vrot.slane %v3878_v55, %v5763_v10  ;;  %v3799_v24 = vcombine.low %v2459_v52, %v2463_v26  ;;  %v3806_v61 = vrot.slane %v3796_v28, %v5763_v10  ;;  %v3813_v59 = vrot.slane %v3797_v29, %v5763_v10 }
 0x4cd   :  { %v3820_v46 = vrot.slane %v3798_v33, %v5763_v10  ;;  %v2635_v44 = vrot.slane %v6156_v56, %v5744_v0  ;;  %v2639_v48 = vrot.slane %v6156_v56, %v5747_v2  ;;  %v2643_v43 = vrot.slane %v6156_v56, %v5750_v3 }
 0x4ce   :  { %v3893_v11 = vcombine.low %v3885_v30, %v3892_v36  ;;  %v3827_v53 = vrot.slane %v3799_v24, %v5763_v10  ;;  %v3828_v31 = vcombine.low %v3806_v61, %v3813_v59  ;;  %v2647_v45 = vrot.slane %v6156_v56, %v5753_v4 }
 0x4cf   :  { %v2651_v23 = vrot.slane %v6156_v56, %v5756_v5  ;;  %v2655_v62 = vrot.slane %v6156_v56, %v5760_v8  ;;  %v4090_v51 = vcombine.low %v2627_v34, %v2631_v27  ;;  %v4091_v57 = vcombine.low %v2635_v44, %v2639_v48 }
 0x4d0   :  { %4448 = vperm.xlu0 %5034, %v3893_v11   ;;  %v3829_v58 = vcombine.low %v3820_v46, %v3827_v53  ;;  %v3836_v60 = vrot.slane %v3828_v31, %v5763_v10  ;;  %v4092_v63 = vcombine.low %v2643_v43, %v2647_v45  ;;  %v2563_v49 = vrot.slane %v6166_v22, %v5421_v39 }
 0x4d1   :  { %v4093_v32 = vcombine.low %v2651_v23, %v2655_v62  ;;  %v4100_v9 = vrot.slane %v4090_v51, %v5763_v10  ;;  %v4107_v35 = vrot.slane %v4091_v57, %v5763_v10  ;;  %v2567_v12 = vrot.slane %v6166_v22, %v5427_v41 }
 0x4d2   :  { %v3843_v56 = vrot.slane %v3829_v58, %v5763_v10  ;;  %v4114_v40 = vrot.slane %v4092_v63, %v5763_v10  ;;  %v2571_v21 = vrot.slane %v6166_v22, %v5744_v0  ;;  %v2575_v13 = vrot.slane %v6166_v22, %v5747_v2 }
 0x4d3   :  { %v4121_v15 = vrot.slane %v4093_v32, %v5763_v10  ;;  %v4122_v16 = vcombine.low %v4100_v9, %v4107_v35  ;;  %v2579_v17 = vrot.slane %v6166_v22, %v5750_v3  ;;  %v2583_v18 = vrot.slane %v6166_v22, %v5753_v4 }
 0x4d4   :  { %v3844_v20 = vcombine.low %v3836_v60, %v3843_v56  ;;  %v2587_v50 = vrot.slane %v6166_v22, %v5756_v5  ;;  %v2591_v14 = vrot.slane %v6166_v22, %v5760_v8  ;;  %v3992_v52 = vcombine.low %v2563_v49, %v2567_v12 }
 0x4d5   :  { %v4123_v55 = vcombine.low %v4114_v40, %v4121_v15  ;;  %v4130_v26 = vrot.slane %v4122_v16, %v5763_v10  ;;  %v3993_v28 = vcombine.low %v2571_v21, %v2575_v13  ;;  %v3994_v29 = vcombine.low %v2579_v17, %v2583_v18 }
 0x4d6   :  { %4445 = vperm.xlu1 %5033, %v3844_v20   ;;  %v3995_v30 = vcombine.low %v2587_v50, %v2591_v14  ;;  %v4002_v33 = vrot.slane %v3992_v52, %v5763_v10  ;;  %v2659_v34 = vrot.slane %v6174_v54, %v5421_v39  ;;  %v2663_v27 = vrot.slane %v6174_v54, %v5427_v41 }
 0x4d7   :  { %v4137_v36 = vrot.slane %v4123_v55, %v5763_v10  ;;  %v4009_v22 = vrot.slane %v3993_v28, %v5763_v10  ;;  %v4016_v24 = vrot.slane %v3994_v29, %v5763_v10  ;;  %v2667_v61 = vrot.slane %v6174_v54, %v5744_v0 }
 0x4d8   :  { %v4023_v59 = vrot.slane %v3995_v30, %v5763_v10  ;;  %v2671_v46 = vrot.slane %v6174_v54, %v5747_v2  ;;  %v2675_v44 = vrot.slane %v6174_v54, %v5750_v3  ;;  %v2679_v48 = vrot.slane %v6174_v54, %v5753_v4 }
 0x4d9   :  { %v4138_v43 = vcombine.low %v4130_v26, %v4137_v36  ;;  %v4024_v11 = vcombine.low %v4002_v33, %v4009_v22  ;;  %v2683_v53 = vrot.slane %v6174_v54, %v5756_v5  ;;  %v2687_v31 = vrot.slane %v6174_v54, %v5760_v8 }
 0x4da   :  { %v4025_v45 = vcombine.low %v4016_v24, %v4023_v59  ;;  %v4139_v23 = vcombine.low %v2659_v34, %v2663_v27  ;;  %v4140_v62 = vcombine.low %v2667_v61, %v2671_v46  ;;  %v4141_v51 = vcombine.low %v2675_v44, %v2679_v48 }
 0x4db   :  { %4463 = vperm.xlu0 %5034, %v4138_v43   ;;  %v4032_v57 = vrot.slane %v4024_v11, %v5763_v10  ;;  %v4142_v58 = vcombine.low %v2683_v53, %v2687_v31  ;;  %v2243_v60 = vrot.slane %v6093_v25, %v5421_v39  ;;  %v2247_v63 = vrot.slane %v6093_v25, %v5427_v41 }
 0x4dc   :  { %v4039_v49 = vrot.slane %v4025_v45, %v5763_v10  ;;  %v4149_v32 = vrot.slane %v4139_v23, %v5763_v10  ;;  %v4156_v54 = vrot.slane %v4140_v62, %v5763_v10  ;;  %v4163_v9 = vrot.slane %v4141_v51, %v5763_v10 }
 0x4dd   :  { %v4170_v35 = vrot.slane %v4142_v58, %v5763_v10  ;;  %v2251_v12 = vrot.slane %v6093_v25, %v5744_v0  ;;  %v2255_v56 = vrot.slane %v6093_v25, %v5747_v2  ;;  %v2259_v40 = vrot.slane %v6093_v25, %v5750_v3 }
 0x4de   :  { %v4040_v21 = vcombine.low %v4032_v57, %v4039_v49  ;;  %v4171_v13 = vcombine.low %v4149_v32, %v4156_v54  ;;  %v2263_v15 = vrot.slane %v6093_v25, %v5753_v4  ;;  %v2267_v16 = vrot.slane %v6093_v25, %v5756_v5 }
 0x4df   :  { %v4172_v17 = vcombine.low %v4163_v9, %v4170_v35  ;;  %v2271_v18 = vrot.slane %v6093_v25, %v5760_v8  ;;  %v3502_v20 = vcombine.low %v2243_v60, %v2247_v63  ;;  %v3503_v50 = vcombine.low %v2251_v12, %v2255_v56 }
 0x4e0   :  { %4457 = vperm.xlu1 %5033, %v4040_v21   ;;  %v4179_v14 = vrot.slane %v4171_v13, %v5763_v10  ;;  %v3504_v52 = vcombine.low %v2259_v40, %v2263_v15  ;;  %v2595_v55 = vrot.slane %v6181_v1, %v5421_v39  ;;  %v2599_v26 = vrot.slane %v6181_v1, %v5427_v41 }
 0x4e1   :  { %v4186_v28 = vrot.slane %v4172_v17, %v5763_v10  ;;  %v3505_v29 = vcombine.low %v2267_v16, %v2271_v18  ;;  %v3512_v30 = vrot.slane %v3502_v20, %v5763_v10  ;;  %v3519_v33 = vrot.slane %v3503_v50, %v5763_v10 }
 0x4e2   :  { %v3526_v25 = vrot.slane %v3504_v52, %v5763_v10  ;;  %v2603_v34 = vrot.slane %v6181_v1, %v5744_v0  ;;  %v2607_v27 = vrot.slane %v6181_v1, %v5747_v2  ;;  %v2611_v36 = vrot.slane %v6181_v1, %v5750_v3 }
 0x4e3   :  { %v4187_v22 = vcombine.low %v4179_v14, %v4186_v28  ;;  %v3533_v24 = vrot.slane %v3505_v29, %v5763_v10  ;;  %v3534_v61 = vcombine.low %v3512_v30, %v3519_v33  ;;  %v2615_v59 = vrot.slane %v6181_v1, %v5753_v4 }
 0x4e4   :  { %v2619_v46 = vrot.slane %v6181_v1, %v5756_v5  ;;  %v2623_v44 = vrot.slane %v6181_v1, %v5760_v8  ;;  %v4041_v48 = vcombine.low %v2595_v55, %v2599_v26  ;;  %v4042_v43 = vcombine.low %v2603_v34, %v2607_v27 }
 0x4e5   :  { %4466 = vperm.xlu0 %5034, %v4187_v22   ;;  %v3535_v11 = vcombine.low %v3526_v25, %v3533_v24  ;;  %v3542_v53 = vrot.slane %v3534_v61, %v5763_v10  ;;  %v4043_v31 = vcombine.low %v2611_v36, %v2615_v59  ;;  %v2275_v45 = vrot.slane %v6117_v7, %v5421_v39 }
 0x4e6   :  { %v4044_v23 = vcombine.low %v2619_v46, %v2623_v44  ;;  %v4051_v62 = vrot.slane %v4041_v48, %v5763_v10  ;;  %v4058_v51 = vrot.slane %v4042_v43, %v5763_v10  ;;  %v2279_v57 = vrot.slane %v6117_v7, %v5427_v41 }
 0x4e7   :  { %v3549_v1 = vrot.slane %v3535_v11, %v5763_v10  ;;  %v4065_v58 = vrot.slane %v4043_v31, %v5763_v10  ;;  %v2283_v60 = vrot.slane %v6117_v7, %v5744_v0  ;;  %v2287_v63 = vrot.slane %v6117_v7, %v5747_v2 }
 0x4e8   :  { %v4072_v49 = vrot.slane %v4044_v23, %v5763_v10  ;;  %v4073_v32 = vcombine.low %v4051_v62, %v4058_v51  ;;  %v2291_v54 = vrot.slane %v6117_v7, %v5750_v3  ;;  %v2295_v9 = vrot.slane %v6117_v7, %v5753_v4 }
 0x4e9   :  { %v3550_v35 = vcombine.low %v3542_v53, %v3549_v1  ;;  %v2299_v12 = vrot.slane %v6117_v7, %v5756_v5  ;;  %v2303_v56 = vrot.slane %v6117_v7, %v5760_v8  ;;  %v3551_v40 = vcombine.low %v2275_v45, %v2279_v57 }
 0x4ea   :  { %v4074_v21 = vcombine.low %v4065_v58, %v4072_v49  ;;  %v4081_v13 = vrot.slane %v4073_v32, %v5763_v10  ;;  %v3552_v15 = vcombine.low %v2283_v60, %v2287_v63  ;;  %v3553_v16 = vcombine.low %v2291_v54, %v2295_v9 }
 0x4eb   :  { %4427 = vperm.xlu1 %5033, %v3550_v35   ;;  %v3554_v17 = vcombine.low %v2299_v12, %v2303_v56  ;;  %v3561_v18 = vrot.slane %v3551_v40, %v5763_v10  ;;  %v2755_v20 = vrot.slane %v6214_v19, %v5421_v39  ;;  %v2759_v50 = vrot.slane %v6214_v19, %v5427_v41 }
 0x4ec   :  { %v4088_v14 = vrot.slane %v4074_v21, %v5763_v10  ;;  %v3568_v7 = vrot.slane %v3552_v15, %v5763_v10  ;;  %v3575_v52 = vrot.slane %v3553_v16, %v5763_v10  ;;  %v2763_v55 = vrot.slane %v6214_v19, %v5744_v0 }
 0x4ed   :  { %v3582_v26 = vrot.slane %v3554_v17, %v5763_v10  ;;  %v2767_v28 = vrot.slane %v6214_v19, %v5747_v2  ;;  %v2771_v29 = vrot.slane %v6214_v19, %v5750_v3  ;;  %v2775_v30 = vrot.slane %v6214_v19, %v5753_v4 }
 0x4ee   :  { %v4089_v33 = vcombine.low %v4081_v13, %v4088_v14  ;;  %v3583_v25 = vcombine.low %v3561_v18, %v3568_v7  ;;  %v2779_v34 = vrot.slane %v6214_v19, %v5756_v5  ;;  %v2783_v27 = vrot.slane %v6214_v19, %v5760_v8 }
 0x4ef   :  { %v3584_v36 = vcombine.low %v3575_v52, %v3582_v26  ;;  %v4286_v22 = vcombine.low %v2755_v20, %v2759_v50  ;;  %v4287_v24 = vcombine.low %v2763_v55, %v2767_v28  ;;  %v4288_v61 = vcombine.low %v2771_v29, %v2775_v30 }
 0x4f0   :  { %4460 = vperm.xlu0 %5034, %v4089_v33   ;;  %v3591_v59 = vrot.slane %v3583_v25, %v5763_v10  ;;  %v4289_v46 = vcombine.low %v2779_v34, %v2783_v27  ;;  %v2691_v44 = vrot.slane %v6262_v47, %v5421_v39  ;;  %v2695_v48 = vrot.slane %v6262_v47, %v5427_v41 }
 0x4f1   :  { %v3598_v43 = vrot.slane %v3584_v36, %v5763_v10  ;;  %v4296_v11 = vrot.slane %v4286_v22, %v5763_v10  ;;  %v4303_v19 = vrot.slane %v4287_v24, %v5763_v10  ;;  %v4310_v53 = vrot.slane %v4288_v61, %v5763_v10 }
 0x4f2   :  { %v4317_v31 = vrot.slane %v4289_v46, %v5763_v10  ;;  %v2699_v45 = vrot.slane %v6262_v47, %v5744_v0  ;;  %v2703_v23 = vrot.slane %v6262_v47, %v5747_v2  ;;  %v2707_v62 = vrot.slane %v6262_v47, %v5750_v3 }
 0x4f3   :  { %v3599_v51 = vcombine.low %v3591_v59, %v3598_v43  ;;  %v4318_v57 = vcombine.low %v4296_v11, %v4303_v19  ;;  %v2711_v1 = vrot.slane %v6262_v47, %v5753_v4  ;;  %v2715_v58 = vrot.slane %v6262_v47, %v5756_v5 }
 0x4f4   :  { %v4319_v60 = vcombine.low %v4310_v53, %v4317_v31  ;;  %v2719_v63 = vrot.slane %v6262_v47, %v5760_v8  ;;  %v4188_v49 = vcombine.low %v2691_v44, %v2695_v48  ;;  %v4189_v32 = vcombine.low %v2699_v45, %v2703_v23 }
 0x4f5   :  { %4430 = vperm.xlu1 %5033, %v3599_v51   ;;  %v4326_v54 = vrot.slane %v4318_v57, %v5763_v10  ;;  %v4190_v9 = vcombine.low %v2707_v62, %v2711_v1  ;;  %v2723_v35 = vrot.slane %v6290_v6, %v5421_v39  ;;  %v2727_v12 = vrot.slane %v6290_v6, %v5427_v41 }
 0x4f6   :  { %v4333_v56 = vrot.slane %v4319_v60, %v5763_v10  ;;  %v4191_v40 = vcombine.low %v2715_v58, %v2719_v63  ;;  %v4198_v21 = vrot.slane %v4188_v49, %v5763_v10  ;;  %v4205_v13 = vrot.slane %v4189_v32, %v5763_v10  ;;  %v4392_v58 = vpop.permute.xlu1 %4391 }
 0x4f7   :  { %v4212_v47 = vrot.slane %v4190_v9, %v5763_v10  ;;  %v2731_v15 = vrot.slane %v6290_v6, %v5744_v0  ;;  %v2735_v16 = vrot.slane %v6290_v6, %v5747_v2  ;;  %v2739_v17 = vrot.slane %v6290_v6, %v5750_v3 }
 0x4f8   :  { %v4334_v18 = vcombine.low %v4326_v54, %v4333_v56  ;;  %v4219_v20 = vrot.slane %v4191_v40, %v5763_v10  ;;  %v4220_v50 = vcombine.low %v4198_v21, %v4205_v13  ;;  %v2743_v14 = vrot.slane %v6290_v6, %v5753_v4  ;;  %v4386_v56 = vpop.permute.xlu0 %4385 }
 0x4f9   :  { %v2747_v7 = vrot.slane %v6290_v6, %v5756_v5  ;;  %v2751_v52 = vrot.slane %v6290_v6, %v5760_v8  ;;  %v4237_v55 = vcombine.low %v2723_v35, %v2727_v12  ;;  %v4238_v26 = vcombine.low %v2731_v15, %v2735_v16 }
 0x4fa   :  { %4475 = vperm.xlu0 %5034, %v4334_v18   ;;  %v4221_v28 = vcombine.low %v4212_v47, %v4219_v20  ;;  %v4228_v29 = vrot.slane %v4220_v50, %v5763_v10  ;;  %v4239_v30 = vcombine.low %v2739_v17, %v2743_v14  ;;  %v2787_v33 = vrot.slane %v6312_v42, %v5421_v39  ;;  %v6542_v60 = vpop.permute.xlu1 %4394 }
 0x4fb   :  { %v4240_v25 = vcombine.low %v2747_v7, %v2751_v52  ;;  %v4247_v34 = vrot.slane %v4237_v55, %v5763_v10  ;;  %v4254_v27 = vrot.slane %v4238_v26, %v5763_v10  ;;  %v2791_v36 = vrot.slane %v6312_v42, %v5427_v41 }
 0x4fc   :  { %v4235_v6 = vrot.slane %v4221_v28, %v5763_v10  ;;  %v4261_v22 = vrot.slane %v4239_v30, %v5763_v10  ;;  %v2795_v24 = vrot.slane %v6312_v42, %v5744_v0  ;;  %v2799_v61 = vrot.slane %v6312_v42, %v5747_v2 }
 0x4fd   :  { %v4268_v39 = vrot.slane %v4240_v25, %v5763_v10  ;;  %v4269_v59 = vcombine.low %v4247_v34, %v4254_v27  ;;  %v2803_v46 = vrot.slane %v6312_v42, %v5750_v3  ;;  %v2807_v44 = vrot.slane %v6312_v42, %v5753_v4 }
 0x4fe   :  { %v4236_v41 = vcombine.low %v4228_v29, %v4235_v6  ;;  %v2811_v48 = vrot.slane %v6312_v42, %v5756_v5  ;;  %v2815_v43 = vrot.slane %v6312_v42, %v5760_v8  ;;  %v4335_v0 = vcombine.low %v2787_v33, %v2791_v36  ;;  %v4389_v63 = vpop.permute.xlu1 %4388 }
 0x4ff   :  { %v4270_v11 = vcombine.low %v4261_v22, %v4268_v39  ;;  %v4277_v2 = vrot.slane %v4269_v59, %v5763_v10  ;;  %v4336_v19 = vcombine.low %v2795_v24, %v2799_v61  ;;  %v4337_v53 = vcombine.low %v2803_v46, %v2807_v44 }
 0x500   :  { %4469 = vperm.xlu0 %5034, %v4236_v41   ;;  %v4338_v31 = vcombine.low %v2811_v48, %v2815_v43  ;;  %v4345_v3 = vrot.slane %v4335_v0, %v5763_v10  ;;  %v6567_v14 = vand.u32 127, %v78_v37 }
 0x501   :  { %v4284_v45 = vrot.slane %v4270_v11, %v5763_v10  ;;  %v4352_v4 = vrot.slane %v4336_v19, %v5763_v10  ;;  %v4359_v23 = vrot.slane %v4337_v53, %v5763_v10 }
 0x502   :  { %v4366_v5 = vrot.slane %v4338_v31, %v5763_v10  ;;  %v6544_v49 = vpop.permute.xlu1 %4403  ;;  %v4486_v7 = vadd.s32 4294967288, %v6567_v14  ;;  %v4484_v52 = vsub.s32 %v6567_v14, %v5418_v38  ;;  %v4493_v26 = vadd.s32 4294967280, %v6567_v14 }
 0x503   :  { %v4285_v62 = vcombine.low %v4277_v2, %v4284_v45  ;;  %v4367_v8 = vcombine.low %v4345_v3, %v4352_v4  ;;  %v4507_v33 = vadd.s32 4294967264, %v6567_v14  ;;  %v4500_v25 = vadd.s32 4294967272, %v6567_v14 }
 0x504   :  { %v4368_v42 = vcombine.low %v4359_v23, %v4366_v5  ;;  %v4489_v29 = vsub.s32 %v4486_v7, %v5418_v38  ;;  %v4496_v27 = vsub.s32 %v4493_v26, %v5418_v38  ;;  %v4514_v22 = vadd.s32 4294967256, %v6567_v14 }
 0x505   :  { %4472 = vperm.xlu0 %5034, %v4285_v62   ;;  %v4375_v51 = vrot.slane %v4367_v8, %v5763_v10  ;;  %v4510_v39 = vsub.s32 %v4507_v33, %v5418_v38  ;;  %v4485_v46 = vrot.slane %v4386_v56, %v4484_v52  ;;  %v4503_v44 = vsub.s32 %v4500_v25, %v5418_v38 }
 0x506   :  { %v4382_v57 = vrot.slane %v4368_v42, %v5763_v10  ;;  %v6546_v32 = vpop.permute.xlu1 %4397  ;;  %v4490_v6 = vrot.slane %v4389_v63, %v4489_v29  ;;  %v4517_v0 = vsub.s32 %v4514_v22, %v5418_v38  ;;  %v4497_v2 = vrot.slane %v4392_v58, %v4496_v27 }
 0x507   :  { %v4521_v19 = vadd.s32 4294967248, %v6567_v14  ;;  %v4528_v31 = vadd.s32 4294967240, %v6567_v14  ;;  %v4511_v23 = vrot.slane %v6546_v32, %v4510_v39  ;;  %v4535_v5 = vadd.s32 4294967232, %v6567_v14 }
 0x508   :  { %v4383_v1 = vcombine.low %v4375_v51, %v4382_v57  ;;  %v4492_v43 = vsel %vm4491_vm2, %v4490_v6, %v4485_v46  ;;  %v4504_v8 = vrot.slane %v6542_v60, %v4503_v44  ;;  %v4542_v51 = vadd.s32 4294967224, %v6567_v14 }
 0x509   :  { %v4499_v4 = vsel %vm4498_vm3, %v4497_v2, %v4492_v43  ;;  %v4524_v57 = vsub.s32 %v4521_v19, %v5418_v38  ;;  %v4531_v58 = vsub.s32 %v4528_v31, %v5418_v38  ;;  %v4563_v25 = vadd.s32 4294967200, %v6567_v14 }
 0x50a   :  { %4478 = vperm.xlu0 %5034, %v4383_v1   ;;  %v6548_v54 = vpop.permute.xlu1 %4406  ;;  %v4506_v1 = vsel %vm4505_vm4, %v4504_v8, %v4499_v4  ;;  %v4577_v22 = vadd.s32 4294967184, %v6567_v14 }
 0x50b   :  { %v4513_v32 = vsel %vm4512_vm5, %v4511_v23, %v4506_v1  ;;  %v4532_v26 = vrot.slane %v6548_v54, %v4531_v58  ;;  %v4566_v46 = vsub.s32 %v4563_v25, %v5418_v38 }
 0x50e   :  { %v6550_v9 = vpop.permute.xlu1 %4400 }
 0x50f   :  { %v6558_v21 = vpop.permute.xlu0 %4412  ;;  %v4518_v42 = vrot.slane %v6550_v9, %v4517_v0  ;;  %v4545_v9 = vsub.s32 %v4542_v51, %v5418_v38 }
 0x511   :  { %v4520_v60 = vsel %vm4519_vm6, %v4518_v42, %v4513_v32 }
 0x512   :  { %v6552_v35 = vpop.permute.xlu1 %4415 }
 0x516   :  { %v6554_v12 = vpop.permute.xlu1 %4409 }
 0x51a   :  { %v6556_v40 = vpop.permute.xlu1 %4418 }
 0x51d   :  { %v4443_v47 = vpop.permute.xlu0 %4442 }
 0x51e   :  { %v4608_v11 = vrot.slane %v4443_v47, %v4503_v44  ;;  %v4538_v47 = vsub.s32 %v4535_v5, %v5418_v38 }
 0x523   :  { %v4437_v16 = vpop.permute.xlu0 %4436 }
 0x524   :  { %v4598_v34 = vrot.slane %v4437_v16, %v4489_v29 }
 0x52b   :  { %v6560_v13 = vpop.permute.xlu1 %4421 }
 0x531   :  { %v6562_v15 = vpop.permute.xlu1 %4424 }
 0x538   :  { %v4440_v17 = vpop.permute.xlu1 %4439 }
 0x539   :  { %v4603_v59 = vrot.slane %v4440_v17, %v4496_v27  ;;  %v4570_v27 = vadd.s32 4294967192, %v6567_v14 }
 0x53b   :  { %v4573_v43 = vsub.s32 %v4570_v27, %v5418_v38 }
 0x53e   :  { %v4434_v20 = vpop.permute.xlu1 %4433 }
 0x53f   :  { %v4594_v30 = vrot.slane %v4434_v20, %v4484_v52  ;;  %v4525_v20 = vrot.slane %v6544_v49, %v4524_v57  ;;  %v4546_v49 = vrot.slane %v6558_v21, %v4545_v9 }
 0x541   :  { %v4599_v24 = vsel %vm4491_vm2, %v4598_v34, %v4594_v30  ;;  %v4527_v33 = vsel %vm4526_vm7, %v4525_v20, %v4520_v60  ;;  %v4556_v34 = vadd.s32 4294967208, %v6567_v14 }
 0x542   :  { %v4604_v41 = vsel %vm4498_vm3, %v4603_v59, %v4599_v24 }
 0x543   :  { %v4609_v3 = vsel %vm4505_vm4, %v4608_v11, %v4604_v41  ;;  %v4559_v41 = vsub.s32 %v4556_v34, %v5418_v38  ;;  %v4580_v11 = vsub.s32 %v4577_v22, %v5418_v38 }
 0x544   :  { %v6564_v18 = vpop.permute.xlu0 %4454 }
 0x545   :  { %v4628_v29 = vrot.slane %v6564_v18, %v4531_v58  ;;  %v4560_v23 = vrot.slane %v6556_v40, %v4559_v41 }
 0x54a   :  { %v4452_v55 = vpop.permute.xlu1 %4451 }
 0x54b   :  { %v4623_v16 = vrot.slane %v4452_v55, %v4524_v57  ;;  %v4539_v55 = vrot.slane %v6554_v12, %v4538_v47  ;;  %v4534_v12 = vsel %vm4533_vm8, %v4532_v26, %v4527_v33 }
 0x54d   :  { %v4541_v21 = vsel %vm4540_vm9, %v4539_v55, %v4534_v12 }
 0x54f   :  { %v4449_v50 = vpop.permute.xlu0 %4448 }
 0x550   :  { %v4618_v45 = vrot.slane %v4449_v50, %v4517_v0  ;;  %v4549_v50 = vadd.s32 4294967216, %v6567_v14 }
 0x552   :  { %v4552_v54 = vsub.s32 %v4549_v50, %v5418_v38 }
 0x554   :  { %v4553_v0 = vrot.slane %v6552_v35, %v4552_v54  ;;  %v4574_v35 = vrot.slane %v6562_v15, %v4573_v43 }
 0x555   :  { %v4446_v61 = vpop.permute.xlu1 %4445 }
 0x556   :  { %v4613_v48 = vrot.slane %v4446_v61, %v4510_v39  ;;  %v4584_v39 = vadd.s32 4294967176, %v6567_v14 }
 0x558   :  { %v4614_v62 = vsel %vm4512_vm5, %v4613_v48, %v4609_v3  ;;  %v4548_v48 = vsel %vm4547_vm10, %v4546_v49, %v4541_v21 }
 0x559   :  { %v4619_v63 = vsel %vm4519_vm6, %v4618_v45, %v4614_v62  ;;  %v4555_v3 = vsel %vm4554_vm11, %v4553_v0, %v4548_v48 }
 0x55a   :  { %v6573_v28 = vpop.permute.xlu0 %4463  ;;  %v4624_v7 = vsel %vm4526_vm7, %v4623_v16, %v4619_v63  ;;  %v4562_v42 = vsel %vm4561_vm12, %v4560_v23, %v4555_v3 }
 0x55b   :  { %v4629_v6 = vsel %vm4533_vm8, %v4628_v29, %v4624_v7  ;;  %v4643_v44 = vrot.slane %v6573_v28, %v4552_v54  ;;  %v4567_v28 = vrot.slane %v6560_v13, %v4566_v46 }
 0x55d   :  { %v4569_v51 = vsel %vm4568_vm13, %v4567_v28, %v4562_v42 }
 0x55e   :  { %v4576_v1 = vsel %vm4575_vm14, %v4574_v35, %v4569_v51 }
 0x55f   :  { %v4458_v56 = vpop.permute.xlu1 %4457 }
 0x560   :  { %v4633_v52 = vrot.slane %v4458_v56, %v4538_v47 }
 0x562   :  { %v4634_v18 = vsel %vm4540_vm9, %v4633_v52, %v4629_v6 }
 0x564   :  { %v6579_v36 = vpop.permute.xlu0 %4466 }
 0x565   :  { %v4648_v14 = vrot.slane %v6579_v36, %v4559_v41 }
 0x56a   :  { %v4428_v24 = vpop.permute.xlu1 %4427 }
 0x56b   :  { %v4581_v62 = vrot.slane %v4428_v24, %v4580_v11 }
 0x56d   :  { %v4583_v63 = vsel %vm4582_vm15, %v4581_v62, %v4576_v1 }
 0x56f   :  { %v4461_v53 = vpop.permute.xlu0 %4460 }
 0x570   :  { %v4638_v30 = vrot.slane %v4461_v53, %v4545_v9  ;;  %v4587_v53 = vsub.s32 %v4584_v39, %v5418_v38 }
 0x572   :  { %v4639_v59 = vsel %vm4547_vm10, %v4638_v30, %v4634_v18 }
 0x573   :  { %v4644_v2 = vsel %vm4554_vm11, %v4643_v44, %v4639_v59 }
 0x574   :  { %v4431_v45 = vpop.permute.xlu1 %4430  ;;  %v4649_v5 = vsel %vm4561_vm12, %v4648_v14, %v4644_v2 }
 0x575   :  { %v4588_v36 = vrot.slane %v4431_v45, %v4587_v53 }
 0x577   :  { %v4590_v56 = vsel %vm4589_vm0, %v4588_v36, %v4583_v63 }
 0x579   :  { %v6597_v17 = vpop.permute.xlu0 %4475 }
 0x57a   :  { %v4663_v57 = vrot.slane %v6597_v17, %v4580_v11 }
 0x57f   :  { %v4470_v61 = vpop.permute.xlu0 %4469 }
 0x580   :  { %v4653_v19 = vrot.slane %v4470_v61, %v4566_v46 }
 0x582   :  { %v4654_v8 = vsel %vm4568_vm13, %v4653_v19, %v4649_v5 }
 0x584   :  { %v4473_v31 = vpop.permute.xlu0 %4472 }
 0x585   :  { %v4658_v4 = vrot.slane %v4473_v31, %v4573_v43 }
 0x587   :  { %v4659_v38 = vsel %vm4575_vm14, %v4658_v4, %v4654_v8 }
 0x588   :  { %v4664_v40 = vsel %vm4582_vm15, %v4663_v57, %v4659_v38 }
 0x589   :  { %v4479_v13 = vpop.permute.xlu0 %4478 }
 0x58a   :  { %v4668_v58 = vrot.slane %v4479_v13, %v4587_v53 }
 0x58c   :  { %v4669_v32 = vsel %vm4589_vm0, %v4668_v58, %v4664_v40 }
 0x58d   :  { %v4670_v15 = vcombine.low %v4590_v56, %v4669_v32 }
 0x58f   :  { %v4677_v47 = vrot.slane %v4670_v15, %v5763_v10 }
 0x591   :  { %v4684_v16 = vrot.slane %v4677_v47, %v5763_v10 }
 0x593   :  { %4690 = vst.msk [vmem:[%s6645_s11] sm:$0x3] %vm4688_vm1, %v4684_v16 }

</bundles_post_ra>
